<compile_context>
chip_gen: v5e
topology: v5e:2x2
jax: 0.10.0
libtpu: 0.0.40
codegen_flags: <defaults>
</compile_context>

<pallas_src>
import jax
import jax.numpy as jnp
from jax import lax
from jax.experimental import pallas as pl
from jax.experimental.pallas import tpu as pltpu

# ---- ResNeXt stage config (ResNeXt-50 32x4d stage-1-like, scaled to a small run) ----
BATCH = 2
HEIGHT = WIDTH = 16
IN_CHANNELS = 64
OUT_CHANNELS = 256
CARDINALITY = 32
BOTTLENECK_WIDTH = 4
DEPTH = 2          # first block: stride 2 + conv residual; remaining: stride 1 + identity
STRIDE = 2
REDUCTION = 4
BN_EPS = 1e-5

BOTTLENECK_CHANNELS = int(OUT_CHANNELS // REDUCTION * (BOTTLENECK_WIDTH / 64)) * CARDINALITY  # 128

_VMEM_LIMIT = 32 * 1024 * 1024  # working set is only a few MiB; fine on v5e/v6e/v7x


def _round_up(x, m):
    return (x + m - 1) // m * m


# ----------------------------- Fused whole-stage kernel -----------------------------

def _make_stage_kernel(metas):
    """Build the per-image fused stage kernel.

    metas: tuple of dicts(stride=int, has_proj=bool) - static per-block structure.
    Kernel operand order: x, [xres], then per block: w1, b1, w2_kstack, b2, w3, b3,
    [wr, br], and finally the output ref.
    Only the first block of a ResNeXt stage can have a projection residual, so the
    single xres operand (stride-subsampled stage input) is sufficient.
    """
    nweights = [8 if m["has_proj"] else 6 for m in metas]
    any_proj = metas[0]["has_proj"]

    def kernel(*refs):
        refs = list(refs)
        o_ref = refs.pop()                 # output ref is last
        x_ref = refs.pop(0)
        xres_ref = refs.pop(0) if any_proj else None

        h = x_ref[0]                       # (H, W, Cin) bf16, current block input
        w_idx = 0
        for m, nw in zip(metas, nweights):
            blk = refs[w_idx:w_idx + nw]
            w_idx += nw
            if m["has_proj"]:
                w1r, b1r, w2r, b2r, w3r, b3r, wrr, brr = blk
            else:
                w1r, b1r, w2r, b2r, w3r, b3r = blk

            stride = m["stride"]
            H, W, Cin = h.shape
            OH = (H - 1) // stride + 1     # == (H + 2 - 3) // stride + 1
            OW = (W - 1) // stride + 1
            Cb = w1r.shape[1]
            Cout = w3r.shape[1]

            # ---- 1x1 conv + folded BN + ReLU (MXU) ----
            y1 = jnp.dot(h.reshape(H * W, Cin), w1r[...],
                         preferred_element_type=jnp.float32) + b1r[...]
            y1 = jnp.maximum(y1, 0.0).astype(jnp.bfloat16).reshape(H, W, Cb)

            # ---- zero-padded layout: zs[i, j] == pad1(y1)[i, j + 1] ----
            # y1 stored at column offset 0 (sublane-aligned), zero rows top/bottom,
            # zero columns appended on the right (aligned, width >= 8).
            Wq = _round_up(W + 2, 8)
            zs = jnp.concatenate(
                [y1, jnp.zeros((H, Wq - W, Cb), jnp.bfloat16)], axis=1)
            zrow = jnp.zeros((1, Wq, Cb), jnp.bfloat16)
            zs = jnp.concatenate([zrow, zs, zrow], axis=0)          # (H+2, Wq, Cb)
            zcol = jnp.zeros((H + 2, 1, Cb), jnp.bfloat16)
            # cshift[kw][i, j] == pad1(y1)[i, j + kw]   (only 2 small sublane shifts)
            cshift = (
                jnp.concatenate([zcol, zs[:, :Wq - 1, :]], axis=1),  # kw = 0
                zs,                                                  # kw = 1
                jnp.concatenate([zs[:, 1:, :], zcol], axis=1),       # kw = 2
            )

            # ---- 3x3 grouped conv as ONE K-stacked matmul ----
            # tap (kh, kw) at output (oh, ow) needs pad1[s*oh+kh, s*ow+kw]
            #   = cshift[kw][s*oh+kh, s*ow]; compute for every column j and pick
            #   j = s*ow after the matmul (tiny, and keeps all slices aligned).
            taps = []
            for kh in range(3):
                for kw in range(3):
                    t = cshift[kw][kh:kh + stride * OH]             # (s*OH, Wq, Cb)
                    if stride > 1:
                        # keep rows kh + s*oh only (outer-axis reshape + aligned slice)
                        t = t.reshape(OH, stride * Wq, Cb)[:, :Wq, :]
                    taps.append(t.reshape(OH * Wq, Cb))
            taps = jnp.concatenate(taps, axis=-1)                   # (OH*Wq, 9*Cb)
            z = jnp.dot(taps, w2r[...], preferred_element_type=jnp.float32) + b2r[...]
            z = jnp.maximum(z, 0.0).astype(jnp.bfloat16).reshape(OH, Wq, Cb)
            if stride == 1:
                zv = z[:, :W, :]                                    # aligned (W % 8 == 0)
            else:
                zv = jnp.concatenate(
                    [z[:, stride * j:stride * j + 1, :] for j in range(OW)], axis=1)

            # ---- residual path (fused) ----
            if m["has_proj"]:
                xr = xres_ref[0].reshape(OH * OW, Cin)
                res = jnp.dot(xr, wrr[...], preferred_element_type=jnp.float32) + brr[...]
                res = res.astype(jnp.bfloat16).astype(jnp.float32)  # match reference rounding
            else:
                res = h.reshape(OH * OW, Cout).astype(jnp.float32)  # identity

            # ---- 1x1 conv + BN + residual add + ReLU (fused epilogue) ----
            y3 = (jnp.dot(zv.reshape(OH * OW, Cb), w3r[...],
                          preferred_element_type=jnp.float32) + b3r[...] + res)
            h = jnp.maximum(y3, 0.0).astype(jnp.bfloat16).reshape(OH, OW, Cout)

        o_ref[...] = h.reshape(o_ref.shape)

    return kernel


# ----------------------------- Weight / BN prep (trace-time glue) -----------------------------

def _fold_bn(w_pt, bn):
    """Fold inference BatchNorm into conv weight (scale) and a per-channel shift."""
    scale = bn["gamma"] / jnp.sqrt(bn["var"] + BN_EPS)
    shift = bn["beta"] - bn["mean"] * scale
    return w_pt * scale[:, None, None, None], shift


def _w1x1_to_mat(w_pt):
    # (Cout, Cin, 1, 1) -> (Cin, Cout)
    return jnp.transpose(w_pt[:, :, 0, 0], (1, 0))


def _grouped_w_to_kstack(w_pt, groups):
    # (Cout, Cin_g, 3, 3) -> block-diagonal dense, K-stacked over the 9 taps: (9*Cin, Cout)
    Cout, Cin_g, kh, kw = w_pt.shape
    Cout_g = Cout // groups
    Cin = Cin_g * groups
    w_t = jnp.transpose(w_pt, (2, 3, 1, 0))            # (3, 3, Cin_g, Cout)
    w_rep = jnp.tile(w_t, (1, 1, groups, 1))           # (3, 3, Cin, Cout)
    ci = jnp.arange(Cin)[:, None] // Cin_g
    co = jnp.arange(Cout)[None, :] // Cout_g
    mask = (ci == co).astype(w_pt.dtype)
    w_dense = w_rep * mask[None, None]                 # block-diagonal dense
    return w_dense.reshape(kh * kw * Cin, Cout)        # (kh*3+kw)*Cin + ci ordering


# ----------------------------- Stage forward -----------------------------

def resnext_stage_fused(x_nhwc, params):
    N, H, W, Cin = x_nhwc.shape
    x_nhwc = x_nhwc.astype(jnp.bfloat16)

    metas = []
    operands = [x_nhwc]
    in_specs = [pl.BlockSpec((1, H, W, Cin), lambda n: (n, 0, 0, 0))]

    # Residual-projection input for the first block = stride-subsampled stage input
    # (prepared in glue because it is a *kernel input*, not an intermediate).
    stride0 = STRIDE
    has_proj0 = (Cin != OUT_CHANNELS) or (stride0 != 1)
    if has_proj0:
        xres = x_nhwc[:, ::stride0, ::stride0, :]
        _, RH, RW, _ = xres.shape
        operands.append(xres)
        in_specs.append(pl.BlockSpec((1, RH, RW, Cin), lambda n: (n, 0, 0, 0)))

    h_sp, w_sp, cin = H, W, Cin
    for i, bp in enumerate(params["blocks"]):
        stride = STRIDE if i == 0 else 1
        has_proj = (cin != OUT_CHANNELS) or (stride != 1)
        metas.append(dict(stride=stride, has_proj=has_proj))

        w1, b1 = _fold_bn(bp["conv1"]["w"], bp["conv1"]["bn"])
        w2, b2 = _fold_bn(bp["conv2"]["w"], bp["conv2"]["bn"])
        w3, b3 = _fold_bn(bp["conv3"]["w"], bp["conv3"]["bn"])
        blk_ops = [
            _w1x1_to_mat(w1).astype(jnp.bfloat16), b1.reshape(1, -1).astype(jnp.float32),
            _grouped_w_to_kstack(w2, CARDINALITY).astype(jnp.bfloat16),
            b2.reshape(1, -1).astype(jnp.float32),
            _w1x1_to_mat(w3).astype(jnp.bfloat16), b3.reshape(1, -1).astype(jnp.float32),
        ]
        if has_proj:
            wr, br = _fold_bn(bp["res"]["w"], bp["res"]["bn"])
            blk_ops += [_w1x1_to_mat(wr).astype(jnp.bfloat16),
                        br.reshape(1, -1).astype(jnp.float32)]
        for op in blk_ops:
            operands.append(op)
            in_specs.append(pl.BlockSpec(op.shape, lambda n: (0, 0)))  # all weights are 2-D

        h_sp = (h_sp - 1) // stride + 1
        w_sp = (w_sp - 1) // stride + 1
        cin = OUT_CHANNELS

    return pl.pallas_call(
        _make_stage_kernel(tuple(metas)),
        out_shape=jax.ShapeDtypeStruct((N, h_sp, w_sp, OUT_CHANNELS), jnp.bfloat16),
        grid_spec=pltpu.PrefetchScalarGridSpec(
            num_scalar_prefetch=0,
            grid=(N,),                                   # 2 parallel steps -> both v7x TCs
            in_specs=in_specs,
            out_specs=pl.BlockSpec((1, h_sp, w_sp, OUT_CHANNELS),
                                   lambda n: (n, 0, 0, 0)),
        ),
        compiler_params=pltpu.CompilerParams(
            dimension_semantics=("parallel",),
            vmem_limit_bytes=_VMEM_LIMIT,
        ),
    )(*operands)


@jax.jit
def resnext_stage(pixel_values, params):
    x = jnp.transpose(pixel_values, (0, 2, 3, 1))                         # NCHW -> NHWC
    y = resnext_stage_fused(x, params)
    return jnp.transpose(y, (0, 3, 1, 2)).astype(jnp.float32)             # NHWC -> NCHW


# ----------------------------- Params / reference -----------------------------

def _init_conv_bn(key, cout, cin_g, k):
    kw_, kg, kb, km, kv = jax.random.split(key, 5)
    fan_in = cin_g * k * k
    w = jax.random.normal(kw_, (cout, cin_g, k, k), jnp.float32) * (2.0 / fan_in) ** 0.5
    bn = dict(
        gamma=1.0 + 0.1 * jax.random.normal(kg, (cout,), jnp.float32),
        beta=0.1 * jax.random.normal(kb, (cout,), jnp.float32),
        mean=0.1 * jax.random.normal(km, (cout,), jnp.float32),
        var=1.0 + 0.1 * jax.random.uniform(kv, (cout,), jnp.float32),
    )
    return dict(w=w, bn=bn)


def init_params(key):
    blocks = []
    cin = IN_CHANNELS
    for i in range(DEPTH):
        stride = STRIDE if i == 0 else 1
        key, k1, k2, k3, kr = jax.random.split(key, 5)
        block = dict(
            conv1=_init_conv_bn(k1, BOTTLENECK_CHANNELS, cin, 1),
            conv2=_init_conv_bn(k2, BOTTLENECK_CHANNELS, BOTTLENECK_CHANNELS // CARDINALITY, 3),
            conv3=_init_conv_bn(k3, OUT_CHANNELS, BOTTLENECK_CHANNELS, 1),
        )
        if cin != OUT_CHANNELS or stride != 1:
            block["res"] = _init_conv_bn(kr, OUT_CHANNELS, cin, 1)
        blocks.append(block)
        cin = OUT_CHANNELS
    return dict(blocks=blocks)


def _ref_conv_bn(x, w_pt, bn, stride, groups, relu, pad):
    scale = bn["gamma"] / jnp.sqrt(bn["var"] + BN_EPS)
    shift = bn["beta"] - bn["mean"] * scale
    w = jnp.transpose(w_pt * scale[:, None, None, None], (2, 3, 1, 0)).astype(jnp.bfloat16)
    y = lax.conv_general_dilated(
        x.astype(jnp.bfloat16), w, (stride, stride), ((pad, pad), (pad, pad)),
        dimension_numbers=("NHWC", "HWIO", "NHWC"), feature_group_count=groups,
        preferred_element_type=jnp.float32, precision=lax.Precision.HIGHEST)
    y = y + shift
    if relu:
        y = jnp.maximum(y, 0.0)
    return y


@jax.jit
def reference_stage(pixel_values, params):
    x = jnp.transpose(pixel_values, (0, 2, 3, 1)).astype(jnp.bfloat16)
    cin = IN_CHANNELS
    for i, bp in enumerate(params["blocks"]):
        stride = STRIDE if i == 0 else 1
        has_res = (cin != OUT_CHANNELS) or (stride != 1)
        y1 = _ref_conv_bn(x, bp["conv1"]["w"], bp["conv1"]["bn"], 1, 1, True, 0).astype(jnp.bfloat16)
        y2 = _ref_conv_bn(y1, bp["conv2"]["w"], bp["conv2"]["bn"], stride, CARDINALITY, True, 1
                          ).astype(jnp.bfloat16)
        y3 = _ref_conv_bn(y2, bp["conv3"]["w"], bp["conv3"]["bn"], 1, 1, False, 0)
        if has_res:
            res = _ref_conv_bn(x, bp["res"]["w"], bp["res"]["bn"], stride, 1, False, 0
                               ).astype(jnp.bfloat16)
        else:
            res = x
        x = jnp.maximum(y3 + res.astype(jnp.float32), 0.0).astype(jnp.bfloat16)
        cin = OUT_CHANNELS
    return jnp.transpose(x, (0, 3, 1, 2)).astype(jnp.float32)


# ----------------------------- Main -----------------------------

if __name__ == "__main__":
    key = jax.random.PRNGKey(0)
    kx, kp = jax.random.split(key)
    pixel_values = jax.random.normal(kx, (BATCH, IN_CHANNELS, HEIGHT, WIDTH), jnp.float32)
    params = init_params(kp)

    out = resnext_stage(pixel_values, params)
    out = jax.block_until_ready(out)

    ref = reference_stage(pixel_values, params)
    ref = jax.block_until_ready(ref)

    oh = (HEIGHT + 2 - 3) // STRIDE + 1
    assert out.shape == ref.shape == (BATCH, OUT_CHANNELS, oh, oh), out.shape
    max_err = float(jnp.max(jnp.abs(out - ref)))
    assert jnp.allclose(out, ref, atol=2e-2, rtol=2e-2), f"max abs err = {max_err}"
    print("KERNEL_OK")
</pallas_src>

<mosaic_0001>
module attributes {stable_mosaic.version = 11 : i64} {
  func.func @kernel(%arg0: i32, %arg1: memref<1x16x16x64xbf16, #tpu.memory_space<vmem>>, %arg2: memref<1x8x8x64xbf16, #tpu.memory_space<vmem>>, %arg3: memref<64x128xbf16, #tpu.memory_space<vmem>>, %arg4: memref<1x128xf32, #tpu.memory_space<vmem>>, %arg5: memref<1152x128xbf16, #tpu.memory_space<vmem>>, %arg6: memref<1x128xf32, #tpu.memory_space<vmem>>, %arg7: memref<128x256xbf16, #tpu.memory_space<vmem>>, %arg8: memref<1x256xf32, #tpu.memory_space<vmem>>, %arg9: memref<64x256xbf16, #tpu.memory_space<vmem>>, %arg10: memref<1x256xf32, #tpu.memory_space<vmem>>, %arg11: memref<256x128xbf16, #tpu.memory_space<vmem>>, %arg12: memref<1x128xf32, #tpu.memory_space<vmem>>, %arg13: memref<1152x128xbf16, #tpu.memory_space<vmem>>, %arg14: memref<1x128xf32, #tpu.memory_space<vmem>>, %arg15: memref<128x256xbf16, #tpu.memory_space<vmem>>, %arg16: memref<1x256xf32, #tpu.memory_space<vmem>>, %arg17: memref<1x8x8x256xbf16, #tpu.memory_space<vmem>>) attributes {dimension_semantics = [#tpu.dimension_semantics<parallel>], iteration_bounds = array<i64: 2>, scalar_prefetch = 0 : i64, scratch_operands = 0 : i64, tpu.core_type = #tpu.core_type<tc>, window_params = [{transform_indices = @transform_0, window_bounds = array<i64: 1, 16, 16, 64>}, {transform_indices = @transform_1, window_bounds = array<i64: 1, 8, 8, 64>}, {pipeline_mode = #tpu.pipeline_mode<synchronous>, transform_indices = @transform_2, window_bounds = array<i64: 64, 128>}, {pipeline_mode = #tpu.pipeline_mode<synchronous>, transform_indices = @transform_3, window_bounds = array<i64: 1, 128>}, {pipeline_mode = #tpu.pipeline_mode<synchronous>, transform_indices = @transform_4, window_bounds = array<i64: 1152, 128>}, {pipeline_mode = #tpu.pipeline_mode<synchronous>, transform_indices = @transform_5, window_bounds = array<i64: 1, 128>}, {pipeline_mode = #tpu.pipeline_mode<synchronous>, transform_indices = @transform_6, window_bounds = array<i64: 128, 256>}, {pipeline_mode = #tpu.pipeline_mode<synchronous>, transform_indices = @transform_7, window_bounds = array<i64: 1, 256>}, {pipeline_mode = #tpu.pipeline_mode<synchronous>, transform_indices = @transform_8, window_bounds = array<i64: 64, 256>}, {pipeline_mode = #tpu.pipeline_mode<synchronous>, transform_indices = @transform_9, window_bounds = array<i64: 1, 256>}, {pipeline_mode = #tpu.pipeline_mode<synchronous>, transform_indices = @transform_10, window_bounds = array<i64: 256, 128>}, {pipeline_mode = #tpu.pipeline_mode<synchronous>, transform_indices = @transform_11, window_bounds = array<i64: 1, 128>}, {pipeline_mode = #tpu.pipeline_mode<synchronous>, transform_indices = @transform_12, window_bounds = array<i64: 1152, 128>}, {pipeline_mode = #tpu.pipeline_mode<synchronous>, transform_indices = @transform_13, window_bounds = array<i64: 1, 128>}, {pipeline_mode = #tpu.pipeline_mode<synchronous>, transform_indices = @transform_14, window_bounds = array<i64: 128, 256>}, {pipeline_mode = #tpu.pipeline_mode<synchronous>, transform_indices = @transform_15, window_bounds = array<i64: 1, 256>}, {transform_indices = @transform_16, window_bounds = array<i64: 1, 8, 8, 256>}]} {
    %c0 = arith.constant 0 : index
    %c0_0 = arith.constant 0 : index
    %c0_1 = arith.constant 0 : index
    %c0_2 = arith.constant 0 : index
    %0 = vector.load %arg1[%c0, %c0_0, %c0_1, %c0_2] : memref<1x16x16x64xbf16, #tpu.memory_space<vmem>>, vector<1x16x16x64xbf16>
    %1 = vector.shape_cast %0 : vector<1x16x16x64xbf16> to vector<16x16x64xbf16>
    %2 = vector.shape_cast %1 : vector<16x16x64xbf16> to vector<256x64xbf16>
    %c0_3 = arith.constant 0 : index
    %c0_4 = arith.constant 0 : index
    %3 = vector.load %arg3[%c0_3, %c0_4] : memref<64x128xbf16, #tpu.memory_space<vmem>>, vector<64x128xbf16>
    %cst = arith.constant dense<0.000000e+00> : vector<256x128xf32>
    %4 = tpu.matmul %2, %3, %cst {dimension_numbers = #tpu.dot_dimension_numbers<[1], [0], [0], [1], [0, 0, 1, 1], [], []>} : vector<256x64xbf16>, vector<64x128xbf16>, vector<256x128xf32> -> vector<256x128xf32>
    %c0_5 = arith.constant 0 : index
    %c0_6 = arith.constant 0 : index
    %5 = vector.load %arg4[%c0_5, %c0_6] : memref<1x128xf32, #tpu.memory_space<vmem>>, vector<1x128xf32>
    %6 = vector.broadcast %5 : vector<1x128xf32> to vector<256x128xf32>
    %7 = arith.addf %4, %6 : vector<256x128xf32>
    %cst_7 = arith.constant 0.000000e+00 : f32
    %8 = vector.broadcast %cst_7 : f32 to vector<256x128xf32>
    %9 = arith.maximumf %7, %8 : vector<256x128xf32>
    %10 = arith.truncf %9 : vector<256x128xf32> to vector<256x128xbf16>
    %11 = vector.shape_cast %10 : vector<256x128xbf16> to vector<16x16x128xbf16>
    %cst_8 = arith.constant 0.000000e+00 : bf16
    %12 = vector.broadcast %cst_8 : bf16 to vector<16x8x128xbf16>
    %13 = tpu.concatenate %11, %12 in 1 : vector<16x16x128xbf16>, vector<16x8x128xbf16> -> vector<16x24x128xbf16>
    %cst_9 = arith.constant 0.000000e+00 : bf16
    %14 = vector.broadcast %cst_9 : bf16 to vector<1x24x128xbf16>
    %15 = tpu.concatenate %14, %13, %14 in 0 : vector<1x24x128xbf16>, vector<16x24x128xbf16>, vector<1x24x128xbf16> -> vector<18x24x128xbf16>
    %cst_10 = arith.constant 0.000000e+00 : bf16
    %16 = vector.broadcast %cst_10 : bf16 to vector<18x1x128xbf16>
    %17 = vector.extract_strided_slice %15 {offsets = [0, 0, 0], sizes = [18, 23, 128], strides = [1, 1, 1]} : vector<18x24x128xbf16> to vector<18x23x128xbf16>
    %18 = tpu.concatenate %16, %17 in 1 : vector<18x1x128xbf16>, vector<18x23x128xbf16> -> vector<18x24x128xbf16>
    %19 = vector.extract_strided_slice %15 {offsets = [0, 1, 0], sizes = [18, 23, 128], strides = [1, 1, 1]} : vector<18x24x128xbf16> to vector<18x23x128xbf16>
    %20 = tpu.concatenate %19, %16 in 1 : vector<18x23x128xbf16>, vector<18x1x128xbf16> -> vector<18x24x128xbf16>
    %21 = vector.extract_strided_slice %18 {offsets = [0, 0, 0], sizes = [16, 24, 128], strides = [1, 1, 1]} : vector<18x24x128xbf16> to vector<16x24x128xbf16>
    %22 = vector.shape_cast %21 : vector<16x24x128xbf16> to vector<8x48x128xbf16>
    %23 = vector.extract_strided_slice %22 {offsets = [0, 0, 0], sizes = [8, 24, 128], strides = [1, 1, 1]} : vector<8x48x128xbf16> to vector<8x24x128xbf16>
    %24 = vector.shape_cast %23 : vector<8x24x128xbf16> to vector<192x128xbf16>
    %25 = vector.extract_strided_slice %15 {offsets = [0, 0, 0], sizes = [16, 24, 128], strides = [1, 1, 1]} : vector<18x24x128xbf16> to vector<16x24x128xbf16>
    %26 = vector.shape_cast %25 : vector<16x24x128xbf16> to vector<8x48x128xbf16>
    %27 = vector.extract_strided_slice %26 {offsets = [0, 0, 0], sizes = [8, 24, 128], strides = [1, 1, 1]} : vector<8x48x128xbf16> to vector<8x24x128xbf16>
    %28 = vector.shape_cast %27 : vector<8x24x128xbf16> to vector<192x128xbf16>
    %29 = vector.extract_strided_slice %20 {offsets = [0, 0, 0], sizes = [16, 24, 128], strides = [1, 1, 1]} : vector<18x24x128xbf16> to vector<16x24x128xbf16>
    %30 = vector.shape_cast %29 : vector<16x24x128xbf16> to vector<8x48x128xbf16>
    %31 = vector.extract_strided_slice %30 {offsets = [0, 0, 0], sizes = [8, 24, 128], strides = [1, 1, 1]} : vector<8x48x128xbf16> to vector<8x24x128xbf16>
    %32 = vector.shape_cast %31 : vector<8x24x128xbf16> to vector<192x128xbf16>
    %33 = vector.extract_strided_slice %18 {offsets = [1, 0, 0], sizes = [16, 24, 128], strides = [1, 1, 1]} : vector<18x24x128xbf16> to vector<16x24x128xbf16>
    %34 = vector.shape_cast %33 : vector<16x24x128xbf16> to vector<8x48x128xbf16>
    %35 = vector.extract_strided_slice %34 {offsets = [0, 0, 0], sizes = [8, 24, 128], strides = [1, 1, 1]} : vector<8x48x128xbf16> to vector<8x24x128xbf16>
    %36 = vector.shape_cast %35 : vector<8x24x128xbf16> to vector<192x128xbf16>
    %37 = vector.extract_strided_slice %15 {offsets = [1, 0, 0], sizes = [16, 24, 128], strides = [1, 1, 1]} : vector<18x24x128xbf16> to vector<16x24x128xbf16>
    %38 = vector.shape_cast %37 : vector<16x24x128xbf16> to vector<8x48x128xbf16>
    %39 = vector.extract_strided_slice %38 {offsets = [0, 0, 0], sizes = [8, 24, 128], strides = [1, 1, 1]} : vector<8x48x128xbf16> to vector<8x24x128xbf16>
    %40 = vector.shape_cast %39 : vector<8x24x128xbf16> to vector<192x128xbf16>
    %41 = vector.extract_strided_slice %20 {offsets = [1, 0, 0], sizes = [16, 24, 128], strides = [1, 1, 1]} : vector<18x24x128xbf16> to vector<16x24x128xbf16>
    %42 = vector.shape_cast %41 : vector<16x24x128xbf16> to vector<8x48x128xbf16>
    %43 = vector.extract_strided_slice %42 {offsets = [0, 0, 0], sizes = [8, 24, 128], strides = [1, 1, 1]} : vector<8x48x128xbf16> to vector<8x24x128xbf16>
    %44 = vector.shape_cast %43 : vector<8x24x128xbf16> to vector<192x128xbf16>
    %45 = vector.extract_strided_slice %18 {offsets = [2, 0, 0], sizes = [16, 24, 128], strides = [1, 1, 1]} : vector<18x24x128xbf16> to vector<16x24x128xbf16>
    %46 = vector.shape_cast %45 : vector<16x24x128xbf16> to vector<8x48x128xbf16>
    %47 = vector.extract_strided_slice %46 {offsets = [0, 0, 0], sizes = [8, 24, 128], strides = [1, 1, 1]} : vector<8x48x128xbf16> to vector<8x24x128xbf16>
    %48 = vector.shape_cast %47 : vector<8x24x128xbf16> to vector<192x128xbf16>
    %49 = vector.extract_strided_slice %15 {offsets = [2, 0, 0], sizes = [16, 24, 128], strides = [1, 1, 1]} : vector<18x24x128xbf16> to vector<16x24x128xbf16>
    %50 = vector.shape_cast %49 : vector<16x24x128xbf16> to vector<8x48x128xbf16>
    %51 = vector.extract_strided_slice %50 {offsets = [0, 0, 0], sizes = [8, 24, 128], strides = [1, 1, 1]} : vector<8x48x128xbf16> to vector<8x24x128xbf16>
    %52 = vector.shape_cast %51 : vector<8x24x128xbf16> to vector<192x128xbf16>
    %53 = vector.extract_strided_slice %20 {offsets = [2, 0, 0], sizes = [16, 24, 128], strides = [1, 1, 1]} : vector<18x24x128xbf16> to vector<16x24x128xbf16>
    %54 = vector.shape_cast %53 : vector<16x24x128xbf16> to vector<8x48x128xbf16>
    %55 = vector.extract_strided_slice %54 {offsets = [0, 0, 0], sizes = [8, 24, 128], strides = [1, 1, 1]} : vector<8x48x128xbf16> to vector<8x24x128xbf16>
    %56 = vector.shape_cast %55 : vector<8x24x128xbf16> to vector<192x128xbf16>
    %57 = tpu.concatenate %24, %28, %32, %36, %40, %44, %48, %52, %56 in 1 : vector<192x128xbf16>, vector<192x128xbf16>, vector<192x128xbf16>, vector<192x128xbf16>, vector<192x128xbf16>, vector<192x128xbf16>, vector<192x128xbf16>, vector<192x128xbf16>, vector<192x128xbf16> -> vector<192x1152xbf16>
    %c0_11 = arith.constant 0 : index
    %c0_12 = arith.constant 0 : index
    %58 = vector.load %arg5[%c0_11, %c0_12] : memref<1152x128xbf16, #tpu.memory_space<vmem>>, vector<1152x128xbf16>
    %cst_13 = arith.constant dense<0.000000e+00> : vector<192x128xf32>
    %59 = tpu.matmul %57, %58, %cst_13 {dimension_numbers = #tpu.dot_dimension_numbers<[1], [0], [0], [1], [0, 0, 1, 1], [], []>} : vector<192x1152xbf16>, vector<1152x128xbf16>, vector<192x128xf32> -> vector<192x128xf32>
    %c0_14 = arith.constant 0 : index
    %c0_15 = arith.constant 0 : index
    %60 = vector.load %arg6[%c0_14, %c0_15] : memref<1x128xf32, #tpu.memory_space<vmem>>, vector<1x128xf32>
    %61 = vector.broadcast %60 : vector<1x128xf32> to vector<192x128xf32>
    %62 = arith.addf %59, %61 : vector<192x128xf32>
    %cst_16 = arith.constant 0.000000e+00 : f32
    %63 = vector.broadcast %cst_16 : f32 to vector<192x128xf32>
    %64 = arith.maximumf %62, %63 : vector<192x128xf32>
    %65 = arith.truncf %64 : vector<192x128xf32> to vector<192x128xbf16>
    %66 = vector.shape_cast %65 : vector<192x128xbf16> to vector<8x24x128xbf16>
    %67 = vector.extract_strided_slice %66 {offsets = [0, 0, 0], sizes = [8, 1, 128], strides = [1, 1, 1]} : vector<8x24x128xbf16> to vector<8x1x128xbf16>
    %68 = vector.extract_strided_slice %66 {offsets = [0, 2, 0], sizes = [8, 1, 128], strides = [1, 1, 1]} : vector<8x24x128xbf16> to vector<8x1x128xbf16>
    %69 = vector.extract_strided_slice %66 {offsets = [0, 4, 0], sizes = [8, 1, 128], strides = [1, 1, 1]} : vector<8x24x128xbf16> to vector<8x1x128xbf16>
    %70 = vector.extract_strided_slice %66 {offsets = [0, 6, 0], sizes = [8, 1, 128], strides = [1, 1, 1]} : vector<8x24x128xbf16> to vector<8x1x128xbf16>
    %71 = vector.extract_strided_slice %66 {offsets = [0, 8, 0], sizes = [8, 1, 128], strides = [1, 1, 1]} : vector<8x24x128xbf16> to vector<8x1x128xbf16>
    %72 = vector.extract_strided_slice %66 {offsets = [0, 10, 0], sizes = [8, 1, 128], strides = [1, 1, 1]} : vector<8x24x128xbf16> to vector<8x1x128xbf16>
    %73 = vector.extract_strided_slice %66 {offsets = [0, 12, 0], sizes = [8, 1, 128], strides = [1, 1, 1]} : vector<8x24x128xbf16> to vector<8x1x128xbf16>
    %74 = vector.extract_strided_slice %66 {offsets = [0, 14, 0], sizes = [8, 1, 128], strides = [1, 1, 1]} : vector<8x24x128xbf16> to vector<8x1x128xbf16>
    %75 = tpu.concatenate %67, %68, %69, %70, %71, %72, %73, %74 in 1 : vector<8x1x128xbf16>, vector<8x1x128xbf16>, vector<8x1x128xbf16>, vector<8x1x128xbf16>, vector<8x1x128xbf16>, vector<8x1x128xbf16>, vector<8x1x128xbf16>, vector<8x1x128xbf16> -> vector<8x8x128xbf16>
    %c0_17 = arith.constant 0 : index
    %c0_18 = arith.constant 0 : index
    %c0_19 = arith.constant 0 : index
    %c0_20 = arith.constant 0 : index
    %76 = vector.load %arg2[%c0_17, %c0_18, %c0_19, %c0_20] : memref<1x8x8x64xbf16, #tpu.memory_space<vmem>>, vector<1x8x8x64xbf16>
    %77 = vector.shape_cast %76 : vector<1x8x8x64xbf16> to vector<8x8x64xbf16>
    %78 = vector.shape_cast %77 : vector<8x8x64xbf16> to vector<64x64xbf16>
    %c0_21 = arith.constant 0 : index
    %c0_22 = arith.constant 0 : index
    %79 = vector.load %arg9[%c0_21, %c0_22] : memref<64x256xbf16, #tpu.memory_space<vmem>>, vector<64x256xbf16>
    %cst_23 = arith.constant dense<0.000000e+00> : vector<64x256xf32>
    %80 = tpu.matmul %78, %79, %cst_23 {dimension_numbers = #tpu.dot_dimension_numbers<[1], [0], [0], [1], [0, 0, 1, 1], [], []>} : vector<64x64xbf16>, vector<64x256xbf16>, vector<64x256xf32> -> vector<64x256xf32>
    %c0_24 = arith.constant 0 : index
    %c0_25 = arith.constant 0 : index
    %81 = vector.load %arg10[%c0_24, %c0_25] : memref<1x256xf32, #tpu.memory_space<vmem>>, vector<1x256xf32>
    %82 = vector.broadcast %81 : vector<1x256xf32> to vector<64x256xf32>
    %83 = arith.addf %80, %82 : vector<64x256xf32>
    %84 = arith.truncf %83 : vector<64x256xf32> to vector<64x256xbf16>
    %85 = arith.extf %84 : vector<64x256xbf16> to vector<64x256xf32>
    %86 = vector.shape_cast %75 : vector<8x8x128xbf16> to vector<64x128xbf16>
    %c0_26 = arith.constant 0 : index
    %c0_27 = arith.constant 0 : index
    %87 = vector.load %arg7[%c0_26, %c0_27] : memref<128x256xbf16, #tpu.memory_space<vmem>>, vector<128x256xbf16>
    %cst_28 = arith.constant dense<0.000000e+00> : vector<64x256xf32>
    %88 = tpu.matmul %86, %87, %cst_28 {dimension_numbers = #tpu.dot_dimension_numbers<[1], [0], [0], [1], [0, 0, 1, 1], [], []>} : vector<64x128xbf16>, vector<128x256xbf16>, vector<64x256xf32> -> vector<64x256xf32>
    %c0_29 = arith.constant 0 : index
    %c0_30 = arith.constant 0 : index
    %89 = vector.load %arg8[%c0_29, %c0_30] : memref<1x256xf32, #tpu.memory_space<vmem>>, vector<1x256xf32>
    %90 = vector.broadcast %89 : vector<1x256xf32> to vector<64x256xf32>
    %91 = arith.addf %88, %90 : vector<64x256xf32>
    %92 = arith.addf %91, %85 : vector<64x256xf32>
    %cst_31 = arith.constant 0.000000e+00 : f32
    %93 = vector.broadcast %cst_31 : f32 to vector<64x256xf32>
    %94 = arith.maximumf %92, %93 : vector<64x256xf32>
    %95 = arith.truncf %94 : vector<64x256xf32> to vector<64x256xbf16>
    %96 = vector.shape_cast %95 : vector<64x256xbf16> to vector<8x8x256xbf16>
    %97 = vector.shape_cast %96 : vector<8x8x256xbf16> to vector<64x256xbf16>
    %c0_32 = arith.constant 0 : index
    %c0_33 = arith.constant 0 : index
    %98 = vector.load %arg11[%c0_32, %c0_33] : memref<256x128xbf16, #tpu.memory_space<vmem>>, vector<256x128xbf16>
    %cst_34 = arith.constant dense<0.000000e+00> : vector<64x128xf32>
    %99 = tpu.matmul %97, %98, %cst_34 {dimension_numbers = #tpu.dot_dimension_numbers<[1], [0], [0], [1], [0, 0, 1, 1], [], []>} : vector<64x256xbf16>, vector<256x128xbf16>, vector<64x128xf32> -> vector<64x128xf32>
    %c0_35 = arith.constant 0 : index
    %c0_36 = arith.constant 0 : index
    %100 = vector.load %arg12[%c0_35, %c0_36] : memref<1x128xf32, #tpu.memory_space<vmem>>, vector<1x128xf32>
    %101 = vector.broadcast %100 : vector<1x128xf32> to vector<64x128xf32>
    %102 = arith.addf %99, %101 : vector<64x128xf32>
    %cst_37 = arith.constant 0.000000e+00 : f32
    %103 = vector.broadcast %cst_37 : f32 to vector<64x128xf32>
    %104 = arith.maximumf %102, %103 : vector<64x128xf32>
    %105 = arith.truncf %104 : vector<64x128xf32> to vector<64x128xbf16>
    %106 = vector.shape_cast %105 : vector<64x128xbf16> to vector<8x8x128xbf16>
    %cst_38 = arith.constant 0.000000e+00 : bf16
    %107 = vector.broadcast %cst_38 : bf16 to vector<8x8x128xbf16>
    %108 = tpu.concatenate %106, %107 in 1 : vector<8x8x128xbf16>, vector<8x8x128xbf16> -> vector<8x16x128xbf16>
    %cst_39 = arith.constant 0.000000e+00 : bf16
    %109 = vector.broadcast %cst_39 : bf16 to vector<1x16x128xbf16>
    %110 = tpu.concatenate %109, %108, %109 in 0 : vector<1x16x128xbf16>, vector<8x16x128xbf16>, vector<1x16x128xbf16> -> vector<10x16x128xbf16>
    %cst_40 = arith.constant 0.000000e+00 : bf16
    %111 = vector.broadcast %cst_40 : bf16 to vector<10x1x128xbf16>
    %112 = vector.extract_strided_slice %110 {offsets = [0, 0, 0], sizes = [10, 15, 128], strides = [1, 1, 1]} : vector<10x16x128xbf16> to vector<10x15x128xbf16>
    %113 = tpu.concatenate %111, %112 in 1 : vector<10x1x128xbf16>, vector<10x15x128xbf16> -> vector<10x16x128xbf16>
    %114 = vector.extract_strided_slice %110 {offsets = [0, 1, 0], sizes = [10, 15, 128], strides = [1, 1, 1]} : vector<10x16x128xbf16> to vector<10x15x128xbf16>
    %115 = tpu.concatenate %114, %111 in 1 : vector<10x15x128xbf16>, vector<10x1x128xbf16> -> vector<10x16x128xbf16>
    %116 = vector.extract_strided_slice %113 {offsets = [0, 0, 0], sizes = [8, 16, 128], strides = [1, 1, 1]} : vector<10x16x128xbf16> to vector<8x16x128xbf16>
    %117 = vector.shape_cast %116 : vector<8x16x128xbf16> to vector<128x128xbf16>
    %118 = vector.extract_strided_slice %110 {offsets = [0, 0, 0], sizes = [8, 16, 128], strides = [1, 1, 1]} : vector<10x16x128xbf16> to vector<8x16x128xbf16>
    %119 = vector.shape_cast %118 : vector<8x16x128xbf16> to vector<128x128xbf16>
    %120 = vector.extract_strided_slice %115 {offsets = [0, 0, 0], sizes = [8, 16, 128], strides = [1, 1, 1]} : vector<10x16x128xbf16> to vector<8x16x128xbf16>
    %121 = vector.shape_cast %120 : vector<8x16x128xbf16> to vector<128x128xbf16>
    %122 = vector.extract_strided_slice %113 {offsets = [1, 0, 0], sizes = [8, 16, 128], strides = [1, 1, 1]} : vector<10x16x128xbf16> to vector<8x16x128xbf16>
    %123 = vector.shape_cast %122 : vector<8x16x128xbf16> to vector<128x128xbf16>
    %124 = vector.extract_strided_slice %110 {offsets = [1, 0, 0], sizes = [8, 16, 128], strides = [1, 1, 1]} : vector<10x16x128xbf16> to vector<8x16x128xbf16>
    %125 = vector.shape_cast %124 : vector<8x16x128xbf16> to vector<128x128xbf16>
    %126 = vector.extract_strided_slice %115 {offsets = [1, 0, 0], sizes = [8, 16, 128], strides = [1, 1, 1]} : vector<10x16x128xbf16> to vector<8x16x128xbf16>
    %127 = vector.shape_cast %126 : vector<8x16x128xbf16> to vector<128x128xbf16>
    %128 = vector.extract_strided_slice %113 {offsets = [2, 0, 0], sizes = [8, 16, 128], strides = [1, 1, 1]} : vector<10x16x128xbf16> to vector<8x16x128xbf16>
    %129 = vector.shape_cast %128 : vector<8x16x128xbf16> to vector<128x128xbf16>
    %130 = vector.extract_strided_slice %110 {offsets = [2, 0, 0], sizes = [8, 16, 128], strides = [1, 1, 1]} : vector<10x16x128xbf16> to vector<8x16x128xbf16>
    %131 = vector.shape_cast %130 : vector<8x16x128xbf16> to vector<128x128xbf16>
    %132 = vector.extract_strided_slice %115 {offsets = [2, 0, 0], sizes = [8, 16, 128], strides = [1, 1, 1]} : vector<10x16x128xbf16> to vector<8x16x128xbf16>
    %133 = vector.shape_cast %132 : vector<8x16x128xbf16> to vector<128x128xbf16>
    %134 = tpu.concatenate %117, %119, %121, %123, %125, %127, %129, %131, %133 in 1 : vector<128x128xbf16>, vector<128x128xbf16>, vector<128x128xbf16>, vector<128x128xbf16>, vector<128x128xbf16>, vector<128x128xbf16>, vector<128x128xbf16>, vector<128x128xbf16>, vector<128x128xbf16> -> vector<128x1152xbf16>
    %c0_41 = arith.constant 0 : index
    %c0_42 = arith.constant 0 : index
    %135 = vector.load %arg13[%c0_41, %c0_42] : memref<1152x128xbf16, #tpu.memory_space<vmem>>, vector<1152x128xbf16>
    %cst_43 = arith.constant dense<0.000000e+00> : vector<128x128xf32>
    %136 = tpu.matmul %134, %135, %cst_43 {dimension_numbers = #tpu.dot_dimension_numbers<[1], [0], [0], [1], [0, 0, 1, 1], [], []>} : vector<128x1152xbf16>, vector<1152x128xbf16>, vector<128x128xf32> -> vector<128x128xf32>
    %c0_44 = arith.constant 0 : index
    %c0_45 = arith.constant 0 : index
    %137 = vector.load %arg14[%c0_44, %c0_45] : memref<1x128xf32, #tpu.memory_space<vmem>>, vector<1x128xf32>
    %138 = vector.broadcast %137 : vector<1x128xf32> to vector<128x128xf32>
    %139 = arith.addf %136, %138 : vector<128x128xf32>
    %cst_46 = arith.constant 0.000000e+00 : f32
    %140 = vector.broadcast %cst_46 : f32 to vector<128x128xf32>
    %141 = arith.maximumf %139, %140 : vector<128x128xf32>
    %142 = arith.truncf %141 : vector<128x128xf32> to vector<128x128xbf16>
    %143 = vector.shape_cast %142 : vector<128x128xbf16> to vector<8x16x128xbf16>
    %144 = vector.extract_strided_slice %143 {offsets = [0, 0, 0], sizes = [8, 8, 128], strides = [1, 1, 1]} : vector<8x16x128xbf16> to vector<8x8x128xbf16>
    %145 = vector.shape_cast %96 : vector<8x8x256xbf16> to vector<64x256xbf16>
    %146 = arith.extf %145 : vector<64x256xbf16> to vector<64x256xf32>
    %147 = vector.shape_cast %144 : vector<8x8x128xbf16> to vector<64x128xbf16>
    %c0_47 = arith.constant 0 : index
    %c0_48 = arith.constant 0 : index
    %148 = vector.load %arg15[%c0_47, %c0_48] : memref<128x256xbf16, #tpu.memory_space<vmem>>, vector<128x256xbf16>
    %cst_49 = arith.constant dense<0.000000e+00> : vector<64x256xf32>
    %149 = tpu.matmul %147, %148, %cst_49 {dimension_numbers = #tpu.dot_dimension_numbers<[1], [0], [0], [1], [0, 0, 1, 1], [], []>} : vector<64x128xbf16>, vector<128x256xbf16>, vector<64x256xf32> -> vector<64x256xf32>
    %c0_50 = arith.constant 0 : index
    %c0_51 = arith.constant 0 : index
    %150 = vector.load %arg16[%c0_50, %c0_51] : memref<1x256xf32, #tpu.memory_space<vmem>>, vector<1x256xf32>
    %151 = vector.broadcast %150 : vector<1x256xf32> to vector<64x256xf32>
    %152 = arith.addf %149, %151 : vector<64x256xf32>
    %153 = arith.addf %152, %146 : vector<64x256xf32>
    %cst_52 = arith.constant 0.000000e+00 : f32
    %154 = vector.broadcast %cst_52 : f32 to vector<64x256xf32>
    %155 = arith.maximumf %153, %154 : vector<64x256xf32>
    %156 = arith.truncf %155 : vector<64x256xf32> to vector<64x256xbf16>
    %157 = vector.shape_cast %156 : vector<64x256xbf16> to vector<8x8x256xbf16>
    %158 = vector.shape_cast %157 : vector<8x8x256xbf16> to vector<1x8x8x256xbf16>
    %c0_53 = arith.constant 0 : index
    %c0_54 = arith.constant 0 : index
    %c0_55 = arith.constant 0 : index
    %c0_56 = arith.constant 0 : index
    %159 = vector.load %arg17[%c0_53, %c0_54, %c0_55, %c0_56] : memref<1x8x8x256xbf16, #tpu.memory_space<vmem>>, vector<1x8x8x256xbf16>
    tpu.vector_store %arg17[%c0_53, %c0_54, %c0_55, %c0_56], %158 {strides = array<i32>} : memref<1x8x8x256xbf16, #tpu.memory_space<vmem>>, vector<1x8x8x256xbf16>,
    return
  }
  func.func @transform_0(%arg0: i32) -> (i32, i32, i32, i32) {
    %c0_i32 = arith.constant 0 : i32
    %c0_i32_0 = arith.constant 0 : i32
    %c0_i32_1 = arith.constant 0 : i32
    %c0_i32_2 = arith.constant 0 : i32
    return %arg0, %c0_i32, %c0_i32_0, %c0_i32_1 : i32, i32, i32, i32
  }
  func.func @transform_1(%arg0: i32) -> (i32, i32, i32, i32) {
    %c0_i32 = arith.constant 0 : i32
    %c0_i32_0 = arith.constant 0 : i32
    %c0_i32_1 = arith.constant 0 : i32
    %c0_i32_2 = arith.constant 0 : i32
    return %arg0, %c0_i32, %c0_i32_0, %c0_i32_1 : i32, i32, i32, i32
  }
  func.func @transform_2(%arg0: i32) -> (i32, i32) {
    %c0_i32 = arith.constant 0 : i32
    %c0_i32_0 = arith.constant 0 : i32
    %c0_i32_1 = arith.constant 0 : i32
    return %c0_i32, %c0_i32_0 : i32, i32
  }
  func.func @transform_3(%arg0: i32) -> (i32, i32) {
    %c0_i32 = arith.constant 0 : i32
    %c0_i32_0 = arith.constant 0 : i32
    %c0_i32_1 = arith.constant 0 : i32
    return %c0_i32, %c0_i32_0 : i32, i32
  }
  func.func @transform_4(%arg0: i32) -> (i32, i32) {
    %c0_i32 = arith.constant 0 : i32
    %c0_i32_0 = arith.constant 0 : i32
    %c0_i32_1 = arith.constant 0 : i32
    return %c0_i32, %c0_i32_0 : i32, i32
  }
  func.func @transform_5(%arg0: i32) -> (i32, i32) {
    %c0_i32 = arith.constant 0 : i32
    %c0_i32_0 = arith.constant 0 : i32
    %c0_i32_1 = arith.constant 0 : i32
    return %c0_i32, %c0_i32_0 : i32, i32
  }
  func.func @transform_6(%arg0: i32) -> (i32, i32) {
    %c0_i32 = arith.constant 0 : i32
    %c0_i32_0 = arith.constant 0 : i32
    %c0_i32_1 = arith.constant 0 : i32
    return %c0_i32, %c0_i32_0 : i32, i32
  }
  func.func @transform_7(%arg0: i32) -> (i32, i32) {
    %c0_i32 = arith.constant 0 : i32
    %c0_i32_0 = arith.constant 0 : i32
    %c0_i32_1 = arith.constant 0 : i32
    return %c0_i32, %c0_i32_0 : i32, i32
  }
  func.func @transform_8(%arg0: i32) -> (i32, i32) {
    %c0_i32 = arith.constant 0 : i32
    %c0_i32_0 = arith.constant 0 : i32
    %c0_i32_1 = arith.constant 0 : i32
    return %c0_i32, %c0_i32_0 : i32, i32
  }
  func.func @transform_9(%arg0: i32) -> (i32, i32) {
    %c0_i32 = arith.constant 0 : i32
    %c0_i32_0 = arith.constant 0 : i32
    %c0_i32_1 = arith.constant 0 : i32
    return %c0_i32, %c0_i32_0 : i32, i32
  }
  func.func @transform_10(%arg0: i32) -> (i32, i32) {
    %c0_i32 = arith.constant 0 : i32
    %c0_i32_0 = arith.constant 0 : i32
    %c0_i32_1 = arith.constant 0 : i32
    return %c0_i32, %c0_i32_0 : i32, i32
  }
  func.func @transform_11(%arg0: i32) -> (i32, i32) {
    %c0_i32 = arith.constant 0 : i32
    %c0_i32_0 = arith.constant 0 : i32
    %c0_i32_1 = arith.constant 0 : i32
    return %c0_i32, %c0_i32_0 : i32, i32
  }
  func.func @transform_12(%arg0: i32) -> (i32, i32) {
    %c0_i32 = arith.constant 0 : i32
    %c0_i32_0 = arith.constant 0 : i32
    %c0_i32_1 = arith.constant 0 : i32
    return %c0_i32, %c0_i32_0 : i32, i32
  }
  func.func @transform_13(%arg0: i32) -> (i32, i32) {
    %c0_i32 = arith.constant 0 : i32
    %c0_i32_0 = arith.constant 0 : i32
    %c0_i32_1 = arith.constant 0 : i32
    return %c0_i32, %c0_i32_0 : i32, i32
  }
  func.func @transform_14(%arg0: i32) -> (i32, i32) {
    %c0_i32 = arith.constant 0 : i32
    %c0_i32_0 = arith.constant 0 : i32
    %c0_i32_1 = arith.constant 0 : i32
    return %c0_i32, %c0_i32_0 : i32, i32
  }
  func.func @transform_15(%arg0: i32) -> (i32, i32) {
    %c0_i32 = arith.constant 0 : i32
    %c0_i32_0 = arith.constant 0 : i32
    %c0_i32_1 = arith.constant 0 : i32
    return %c0_i32, %c0_i32_0 : i32, i32
  }
  func.func @transform_16(%arg0: i32) -> (i32, i32, i32, i32) {
    %c0_i32 = arith.constant 0 : i32
    %c0_i32_0 = arith.constant 0 : i32
    %c0_i32_1 = arith.constant 0 : i32
    %c0_i32_2 = arith.constant 0 : i32
    return %arg0, %c0_i32, %c0_i32_0, %c0_i32_1 : i32, i32, i32, i32
  }
}

</mosaic_0001>

<bundles_post_ra>
// kernel: resnext_stage.1
= control target key start
LH: loop header
LB: loop body
LE: loop exit
PB: predicated region body
PF: predicated region fallthrough
CT: control target
= control target key end

     0   :  { %s6338_s21 = smov 0   ;;  %s8551_s0 = inlined_call_operand.vmem [shape: bf16[2,16,16,64], index: 0, kind: input, shape index: {}]   ;;  %s8552_s1 = inlined_call_operand.vmem [shape: bf16[2,8,8,64], index: 1, kind: input, shape index: {}]   ;;  %s8553_s2 = inlined_call_operand.vmem [shape: bf16[64,128], index: 2, kind: input, shape index: {}]   ;;  %s8554_s3 = inlined_call_operand.vmem [shape: f32[1,128], index: 3, kind: input, shape index: {}]   ;;  %s8555_s4 = inlined_call_operand.vmem [shape: bf16[1152,128], index: 4, kind: input, shape index: {}]   ;;  %s8556_s5 = inlined_call_operand.vmem [shape: f32[1,128], index: 5, kind: input, shape index: {}]   ;;  %s8557_s6 = inlined_call_operand.vmem [shape: bf16[128,256], index: 6, kind: input, shape index: {}]   ;;  %s8558_s7 = inlined_call_operand.vmem [shape: f32[1,256], index: 7, kind: input, shape index: {}]   ;;  %s8559_s8 = inlined_call_operand.vmem [shape: bf16[64,256], index: 8, kind: input, shape index: {}]   ;;  %s8560_s9 = inlined_call_operand.vmem [shape: f32[1,256], index: 9, kind: input, shape index: {}]   ;;  %s8561_s10 = inlined_call_operand.vmem [shape: bf16[256,128], index: 10, kind: input, shape index: {}]   ;;  %s8562_s11 = inlined_call_operand.vmem [shape: f32[1,128], index: 11, kind: input, shape index: {}]   ;;  %s8563_s12 = inlined_call_operand.vmem [shape: bf16[1152,128], index: 12, kind: input, shape index: {}]   ;;  %s8564_s13 = inlined_call_operand.vmem [shape: f32[1,128], index: 13, kind: input, shape index: {}]   ;;  %s8565_s14 = inlined_call_operand.vmem [shape: bf16[128,256], index: 14, kind: input, shape index: {}]   ;;  %s8566_s15 = inlined_call_operand.vmem [shape: f32[1,256], index: 15, kind: input, shape index: {}]   ;;  %s8567_s16 = inlined_call_operand.vmem [shape: bf16[2,8,8,256], index: 16, kind: output, shape index: {}]  }
   0x1   :  { %8632 = sst [smem:[#allocation36_spill]] %s8551_s0 }
   0x2 LB: > { %s5039_s22 = sadd.s32 4294967295, %s6250_s21   ;;  %p5043_p0 = scmp.ge.s32.totalorder %s6250_s21, 1  ;;  %s6250_s21 = sphi %s6338_s21, %s26_s21  }
   0x3   : > { %p472_p1 = scmp.lt.s32.totalorder %s6250_s21, 3 }
   0x5   : > { %p473_p2 = pnand %p5043_p0, %p472_p1 }
   0x7   : > { %476 = sbr.rel (%p473_p2) target bundleno = 1781 (0x6f5), region = 84 }
   0xc   : > { %v6016_v0 = vld [vmem:[%s8553_s2 + $0x18] sm:$0xff]  ;;  %p527_p3 = scmp.lt.s32.totalorder %s5039_s22, 1  ;;  %v6015_v1 = vld [vmem:[%s8553_s2 + $0x10] sm:$0xff]  ;;  %v6014_v2 = vld [vmem:[%s8553_s2 + $0x8] sm:$0xff]  ;;  %s8633_s19 = sld [smem:[#allocation36_spill]]  ;;  %vm691_vm0 = vcmask 523264  }
   0xd   : > { %744 = vmatpush.bf16.msra.mxu0 %v6016_v0  ;;  %v6013_v3 = vld [vmem:[%s8553_s2] sm:$0xff]  ;;  %v6032_v9 = vld [vmem:[%s8555_s4 + $0x78] sm:$0xff]  ;;  %v6031_v10 = vld [vmem:[%s8555_s4 + $0x70] sm:$0xff]  ;;  %v8568_v23 = vmov 0   ;;  %vm1199_vm1 = vcmask 1043456   ;;  %v8634_v0 = vmov 0 }
   0xe   : > { %s8747_s22 = smov (!%p527_p3, %s5039_s22), 1  ;;  %2156 = vmatpush.bf16.msra.mxu2 %v6032_v9  ;;  %v6030_v12 = vld [vmem:[%s8555_s4 + $0x68] sm:$0xff]  ;;  %v6040_v13 = vld [vmem:[%s8555_s4 + $0xb8] sm:$0xff]  ;;  %v6029_v14 = vld [vmem:[%s8555_s4 + $0x60] sm:$0xff]  ;;  %v6432_v29 = vrot.slane %v8568_v23, 1  ;;  %v6459_v50 = vunpack.c.l.b16 %v8568_v23  ;;  %vm1127_vm5 = vcmask 1040384  }
   0xf   : > { %s5994_s29 = sshll.u32 %s8747_s22, 7  ;;  %2217 = vmatpush.bf16.msra.mxu3 %v6040_v13  ;;  %v6028_v15 = vld [vmem:[%s8555_s4 + $0x58] sm:$0xff]  ;;  %v6027_v16 = vld [vmem:[%s8555_s4 + $0x50] sm:$0xff]  ;;  %v6026_v19 = vld [vmem:[%s8555_s4 + $0x48] sm:$0xff]  ;;  %vm1200_vm2 = vsmask.f32 3328 }
  0x10   : > { %v6039_v18 = vld [vmem:[%s8555_s4 + $0xb0] sm:$0xff]  ;;  %v6038_v20 = vld [vmem:[%s8555_s4 + $0xa8] sm:$0xff]  ;;  %v6025_v21 = vld [vmem:[%s8555_s4 + $0x40] sm:$0xff]  ;;  %vm973_vm4 = vsmask.f32 256  ;;  %vm2893_vm9 = vcmask 1041408  }
  0x11   : > { %745 = vmatpush.bf16.msra.mxu0 %v6015_v1  ;;  %v6037_v22 = vld [vmem:[%s8555_s4 + $0xa0] sm:$0xff]  ;;  %v6036_v24 = vld [vmem:[%s8555_s4 + $0x98] sm:$0xff]  ;;  %v6035_v26 = vld [vmem:[%s8555_s4 + $0x90] sm:$0xff]  ;;  %vm1146_vm6 = vsmask.f32 7424  ;;  %vm2937_vm11 = vcmask 1042432  }
  0x12   : > { %s6364_s20 = scalar_lea.vmem %s8633_s19, %s5994_s29  ;;  %2157 = vmatpush.bf16.msra.mxu2 %v6031_v10  ;;  %v6034_v27 = vld [vmem:[%s8555_s4 + $0x88] sm:$0xff]  ;;  %v6033_v28 = vld [vmem:[%s8555_s4 + $0x80] sm:$0xff]  ;;  %v6024_v37 = vld [vmem:[%s8555_s4 + $0x38] sm:$0xff]  ;;  %s5995_s19 = sshll.u32 %s8747_s22, 5  ;;  %vm2894_vm8 = vsmask.f32 1280 }
  0x13   : > { %v5997_v4 = vld [vmem:[%s6364_s20] sm:$0xff]  ;;  %v5998_v5 = vld [vmem:[%s6364_s20 + $0x8] sm:$0xff]  ;;  %v5999_v6 = vld [vmem:[%s6364_s20 + $0x10] sm:$0xff]  ;;  %2218 = vmatpush.bf16.msra.mxu3 %v6039_v18  ;;  %6221 = vmatpush.bf16.msra.mxu1 %v6024_v37  ;;  %s7448_s17 = scalar_lea.vmem %s8552_s1, %s5995_s19  ;;  %vm2938_vm12 = vsmask.f32 2304  ;;  %vm3748_vm14 = vcmask 1047552  }
  0x14   : > { %v6000_v7 = vld [vmem:[%s6364_s20 + $0x18] sm:$0xff]  ;;  %v6001_v8 = vld [vmem:[%s6364_s20 + $0x20] sm:$0xff]  ;;  %v6002_v11 = vld [vmem:[%s6364_s20 + $0x28] sm:$0xff]  ;;  %s5996_s24 = sshll.u32 %s8747_s22, 6 }
  0x15   : > { %746 = vmatpush.bf16.msra.mxu0 %v6014_v2  ;;  %v6003_v17 = vld [vmem:[%s6364_s20 + $0x30] sm:$0xff]  ;;  %v6004_v25 = vld [vmem:[%s6364_s20 + $0x38] sm:$0xff]  ;;  %v6437_v30 = vld [vmem:[%s8554_s3] ss:$0 sm:$0xff]  ;;  %s8510_s27 = scalar_lea.vmem %s8567_s16, %s5996_s24 }
  0x16   : > { %2158 = vmatpush.bf16.msra.mxu2 %v6030_v12  ;;  %v6005_v31 = vld [vmem:[%s6364_s20 + $0x40] sm:$0xff]  ;;  %v6023_v41 = vld [vmem:[%s8555_s4 + $0x30] sm:$0xff]  ;;  %v6006_v44 = vld [vmem:[%s6364_s20 + $0x48] sm:$0xff] }
  0x17   : > { %2219 = vmatpush.bf16.msra.mxu3 %v6038_v20  ;;  %6222 = vmatpush.bf16.msra.mxu1 %v6023_v41  ;;  %v6022_v48 = vld [vmem:[%s8555_s4 + $0x28] sm:$0xff]  ;;  %v6021_v52 = vld [vmem:[%s8555_s4 + $0x20] sm:$0xff]  ;;  %v6020_v57 = vld [vmem:[%s8555_s4 + $0x18] sm:$0xff] }
  0x18   : > { %v6019_v60 = vld [vmem:[%s8555_s4 + $0x10] sm:$0xff]  ;;  %vm6474_vm3 = vmand %vm1199_vm1, %vm1200_vm2  ;;  %v6018_v2 = vld [vmem:[%s8555_s4 + $0x8] sm:$0xff] }
  0x19   : > { %747 = vmatpush.bf16.msra.mxu0 %v6013_v3  ;;  %v6007_v62 = vld [vmem:[%s6364_s20 + $0x50] sm:$0xff]  ;;  %v8635_v0 = vsel %vm6474_vm3, 4294967295, %v8634_v0  ;;  %v6017_v10 = vld [vmem:[%s8555_s4] sm:$0xff]  ;;  %vm6504_vm7 = vmand %vm1127_vm5, %vm973_vm4 }
  0x1a   : > { %2159 = vmatpush.bf16.msra.mxu2 %v6029_v14  ;;  %8636 = vst [vmem:[#allocation2_spill] sm:$0xff] %v8635_v0  ;;  %vm7590_vm10 = vmand %vm2893_vm9, %vm2894_vm8 }
  0x1b   : > { %2220 = vmatpush.bf16.msra.mxu3 %v6037_v22  ;;  %6223 = vmatpush.bf16.msra.mxu1 %v6022_v48  ;;  %vm7614_vm13 = vmand %vm2937_vm11, %vm2938_vm12 }
  0x1c   : > { %5130 = vmatmul.msk.bf16.vlgmr.msra.gmra.mxu0 %vm691_vm0, %v5997_v4  ;;  %vm8029_vm15 = vmand %vm3748_vm14, %vm1146_vm6 }
  0x1d   : > { %2095 = vmatpush.bf16.msrb.mxu0 %v6024_v37 }
  0x1e   : > { %2160 = vmatpush.bf16.msra.mxu2 %v6028_v15 }
  0x1f   : > { %2221 = vmatpush.bf16.msra.mxu3 %v6036_v24  ;;  %6224 = vmatpush.bf16.msra.mxu1 %v6021_v52 }
  0x21   : > { %2096 = vmatpush.bf16.msrb.mxu0 %v6023_v41 }
  0x22   : > { %2161 = vmatpush.bf16.msra.mxu2 %v6027_v16 }
  0x23   : > { %2222 = vmatpush.bf16.msra.mxu3 %v6035_v26  ;;  %6225 = vmatpush.bf16.msra.mxu1 %v6020_v57 }
  0x25   : > { %2097 = vmatpush.bf16.msrb.mxu0 %v6022_v48 }
  0x26   : > { %2162 = vmatpush.bf16.msra.mxu2 %v6026_v19 }
  0x27   : > { %2223 = vmatpush.bf16.msra.mxu3 %v6034_v27  ;;  %6226 = vmatpush.bf16.msra.mxu1 %v6019_v60 }
  0x29   : > { %2098 = vmatpush.bf16.msrb.mxu0 %v6021_v52 }
  0x2a   : > { %2163 = vmatpush.bf16.msra.mxu2 %v6025_v21 }
  0x2b   : > { %2224 = vmatpush.bf16.msra.mxu3 %v6033_v28  ;;  %6227 = vmatpush.bf16.msra.mxu1 %v6018_v2 }
  0x2c   : > { %5131 = vmatmul.msk.bf16.gmra.mxu0 %vm691_vm0, %v5998_v5 }
  0x2d   : > { %2164 = vmatmul.bf16.vlgmr.msra.gmra.mxu2 %v8568_v23  ;;  %2099 = vmatpush.bf16.msrb.mxu0 %v6020_v57 }
  0x2e   : > { %2225 = vmatmul.bf16.vlgmr.msra.gmra.mxu3 %v6432_v29 }
  0x2f   : > { %6228 = vmatpush.bf16.msra.mxu1 %v6017_v10 }
  0x31   : > { %2100 = vmatpush.bf16.msrb.mxu0 %v6019_v60 }
  0x35   : > { %2101 = vmatpush.bf16.msrb.mxu0 %v6018_v2 }
  0x39   : > { %2102 = vmatpush.bf16.msrb.mxu0 %v6017_v10 }
  0x3c   : > { %5132 = vmatmul.msk.bf16.gmra.mxu0 %vm691_vm0, %v5999_v6  ;;  %v6488_v6 = vrot.slane %v8568_v23, 7 }
  0x4c   : > { %5133 = vmatmul.msk.bf16.gmra.mxu0 %vm691_vm0, %v6000_v7  ;;  %v1202_v7 = vsel %vm6474_vm3, %v6432_v29, 0 }
  0x4d   : > { %v6500_v15 = vunpack.c.l.b16 %v1202_v7 }
  0x5c   : > { %5134 = vmatmul.msk.bf16.gmra.mxu0 %vm691_vm0, %v6001_v8 }
  0x6c   : > { %5135 = vmatmul.msk.bf16.gmra.mxu0 %vm691_vm0, %v6002_v11 }
  0x7c   : > { %5136 = vmatmul.msk.bf16.gmra.mxu0 %vm691_vm0, %v6003_v17 }
  0x8c   : > { %5137 = vmatmul.msk.bf16.gmra.mxu0 %vm691_vm0, %v6004_v25 }
  0x99   : > { %v749_v32 = vpop.f32.mrf.mxu0 }
  0x9a   : > { %v750_v33 = vadd.f32 %v6437_v30, %v749_v32 }
  0x9c   : > { %5138 = vmatmul.msk.bf16.gmra.mxu0 %vm691_vm0, %v6005_v31  ;;  %v829_v34 = vmax.f32 %v750_v33, 0.0 }
  0x9e   : > { %v861_v38 = vpack.c.bf16 %v829_v34, %v829_v34 }
  0xa0   : > { %v925_v42 = vunpack.c.l.b16 %v861_v38 }
  0xa1   : > { %v751_v35 = vpop.f32.mrf.mxu0 }
  0xa2   : > { %v752_v36 = vadd.f32 %v6437_v30, %v751_v35  ;;  %v6008_v35 = vld [vmem:[%s6364_s20 + $0x58] sm:$0xff] }
  0xa4   : > { %v830_v39 = vmax.f32 %v752_v36, 0.0  ;;  %v6056_v36 = vld [vmem:[%s8555_s4 + $0x138] sm:$0xff] }
  0xa5   : > { %2339 = vmatpush.bf16.msrb.mxu2 %v6056_v36 }
  0xa6   : > { %v862_v40 = vpack.c.bf16 %v830_v39, %v830_v39 }
  0xa8   : > { %v926_v43 = vunpack.c.l.b16 %v862_v40 }
  0xa9   : > { %v754_v45 = vpop.f32.mrf.mxu0 }
  0xaa   : > { %v6451_v46 = vpack.c.b16 %v926_v43, %v925_v42  ;;  %v755_v47 = vadd.f32 %v6437_v30, %v754_v45 }
  0xac   : > { %v831_v49 = vmax.f32 %v755_v47, 0.0  ;;  %5139 = vmatmul.msk.bf16.gmra.mxu0 %vm691_vm0, %v6006_v44  ;;  %v8582_v37 = vshrl.u32 %v6451_v46, 16 }
  0xae   : > { %v863_v51 = vpack.c.bf16 %v831_v49, %v831_v49  ;;  %v6548_v42 = vrot.slane %v8582_v37, 7 }
  0xb0   : > { %v927_v53 = vunpack.c.l.b16 %v863_v51  ;;  %v989_v47 = vsel %vm973_vm4, %v6548_v42, %v6488_v6 }
  0xb1   : > { %v756_v54 = vpop.f32.mrf.mxu0 }
  0xb2   : > { %v757_v55 = vadd.f32 %v6437_v30, %v756_v54  ;;  %v1335_v56 = vpack.c.b16 %v927_v53, %v6459_v50  ;;  %v1266_v54 = vunpack.c.l.b16 %v989_v47 }
  0xb4   : > { %v832_v58 = vmax.f32 %v757_v55, 0.0  ;;  %2169 = vmatmul.bf16.gmra.mxu2 %v1335_v56 }
  0xb6   : > { %v864_v59 = vpack.c.bf16 %v832_v58, %v832_v58 }
  0xb8   : > { %v928_v61 = vunpack.c.l.b16 %v864_v59 }
  0xb9   : > { %v759_v63 = vpop.f32.mrf.mxu0 }
  0xba   : > { %v6478_v1 = vpack.c.b16 %v928_v61, %v927_v53  ;;  %v760_v5 = vadd.f32 %v6437_v30, %v759_v63  ;;  %v1336_v19 = vpack.c.b16 %v6459_v50, %v928_v61  ;;  %v6009_v63 = vld [vmem:[%s6364_s20 + $0x60] sm:$0xff] }
  0xbc   : > { %8637 = vst [vmem:[#allocation3_spill] sm:$0xff] %v6478_v1  ;;  %v991_v3 = vshrl.u32 %v6478_v1, 16  ;;  %v994_v4 = vshll.u32 %v6478_v1, 16  ;;  %5140 = vmatmul.msk.bf16.gmra.mxu0 %vm691_vm0, %v6007_v62  ;;  %v833_v11 = vmax.f32 %v760_v5, 0.0 }
  0xbe   : > { %v993_v8 = vrot.slane %v991_v3, 7  ;;  %v1153_v9 = vrot.slane %v994_v4, 1  ;;  %v6521_v26 = vpack.c.bf16 %v833_v11, %v833_v11 }
  0xc0   : > { %v1154_v12 = vor.u32 %v1153_v9, %v991_v3  ;;  %v996_v13 = vor.u32 %v994_v4, %v993_v8  ;;  %v6498_v14 = vsel %vm973_vm4, %v993_v8, %v6488_v6  ;;  %v8583_v33 = vunpack.c.l.b16 %v6521_v26 }
  0xc1   : > { %v761_v16 = vpop.f32.mrf.mxu0  ;;  %v1216_v25 = vunpack.c.l.b16 %v6498_v14 }
  0xc2   : > { %v762_v18 = vadd.f32 %v6437_v30, %v761_v16  ;;  %v6512_v20 = vsel %vm1146_vm6, %v1154_v12, %v6432_v29  ;;  %v6516_v21 = vsel %vm6504_vm7, 0, %v996_v13  ;;  %v6055_v12 = vld [vmem:[%s8555_s4 + $0x130] sm:$0xff] }
  0xc3   : > { %8640 = vst [vmem:[#allocation4_spill] sm:$0xff] %v6512_v20  ;;  %v1242_v22 = vunpack.c.l.b16 %v6512_v20  ;;  %v1215_v24 = vunpack.c.h.b16 %v6516_v21  ;;  %v1243_v51 = vunpack.c.h.b16 %v6512_v20  ;;  %2340 = vmatpush.bf16.msrb.mxu2 %v6055_v12 }
  0xc4   : > { %v834_v27 = vmax.f32 %v762_v18, 0.0  ;;  %2173 = vmatmul.bf16.gmra.mxu2 %v1336_v19 }
  0xc5   : > { %v1356_v28 = vpack.c.b16 %v1242_v22, %v6500_v15  ;;  %v6526_v31 = vpack.c.b16 %v1216_v25, %v1215_v24  ;;  %v1357_v58 = vpack.c.b16 %v6500_v15, %v1243_v51  ;;  %v6010_v51 = vld [vmem:[%s6364_s20 + $0x68] sm:$0xff] }
  0xc6   : > { %v6528_v32 = vpack.c.bf16 %v834_v27, %v834_v27 }
  0xc7   : > { %2230 = vmatmul.bf16.gmra.mxu3 %v1356_v28 }
  0xc8   : > { %v8579_v34 = vunpack.c.l.b16 %v6528_v32 }
  0xc9   : > { %v764_v38 = vpop.f32.mrf.mxu0 }
  0xca   : > { %v6541_v39 = vpack.c.b16 %v8579_v34, %v8583_v33  ;;  %v765_v41 = vadd.f32 %v6437_v30, %v764_v38  ;;  %v6052_v34 = vld [vmem:[%s8555_s4 + $0x118] sm:$0xff] }
  0xcc   : > { %v8580_v40 = vshrl.u32 %v6541_v39, 16  ;;  %5141 = vmatmul.msk.bf16.gmra.mxu0 %vm691_vm0, %v6008_v35  ;;  %v8581_v43 = vshll.u32 %v6541_v39, 16  ;;  %v835_v45 = vmax.f32 %v765_v41, 0.0 }
  0xce   : > { %v6553_v44 = vrot.slane %v8580_v40, 7  ;;  %v6568_v56 = vpack.c.bf16 %v835_v45, %v835_v45 }
  0xd0   : > { %v1004_v48 = vor.u32 %v8581_v43, %v6553_v44  ;;  %8641 = vst [vmem:[#allocation5_spill] sm:$0xff] %v6568_v56  ;;  %v8573_v61 = vunpack.c.l.b16 %v6568_v56 }
  0xd1   : > { %v766_v49 = vpop.f32.mrf.mxu0 }
  0xd2   : > { %v767_v52 = vadd.f32 %v6437_v30, %v766_v49  ;;  %v6565_v53 = vsel %vm6504_vm7, 0, %v1004_v48 }
  0xd3   : > { %v1267_v55 = vunpack.c.l.b16 %v6565_v53 }
  0xd4   : > { %v836_v57 = vmax.f32 %v767_v52, 0.0 }
  0xd5   : > { %v6571_v59 = vpack.c.b16 %v1267_v55, %v1266_v54 }
  0xd6   : > { %v6573_v60 = vpack.c.bf16 %v836_v57, %v836_v57 }
  0xd7   : > { %2234 = vmatmul.bf16.gmra.mxu3 %v1357_v58 }
  0xd8   : > { %8642 = vst [vmem:[#allocation6_spill] sm:$0xff] %v6573_v60  ;;  %v8572_v62 = vunpack.c.l.b16 %v6573_v60 }
  0xd9   : > { %v769_v2 = vpop.f32.mrf.mxu0 }
  0xda   : > { %v960_v3 = vpack.c.b16 %v8572_v62, %v8573_v61  ;;  %v770_v4 = vadd.f32 %v6437_v30, %v769_v2 }
  0xdc   : > { %5142 = vmatmul.msk.bf16.gmra.mxu0 %vm691_vm0, %v6009_v63  ;;  %2177 = vmatmul.bf16.gmra.mxu2 %v960_v3  ;;  %v1007_v5 = vshrl.u32 %v960_v3, 16  ;;  %v1010_v7 = vshll.u32 %v960_v3, 16  ;;  %v837_v10 = vmax.f32 %v770_v4, 0.0 }
  0xde   : > { %v1009_v8 = vrot.slane %v1007_v5, 7  ;;  %v1159_v9 = vrot.slane %v1010_v7, 1  ;;  %v869_v35 = vpack.c.bf16 %v837_v10, %v837_v10 }
  0xe0   : > { %v1012_v11 = vor.u32 %v1010_v7, %v1009_v8  ;;  %v1013_v13 = vsel %vm973_vm4, %v1009_v8, %v6488_v6  ;;  %v1160_v22 = vor.u32 %v1159_v9, %v1007_v5  ;;  %v933_v48 = vunpack.c.l.b16 %v869_v35  ;;  %v6011_v7 = vld [vmem:[%s6364_s20 + $0x70] sm:$0xff]  ;;  %v6054_v8 = vld [vmem:[%s8555_s4 + $0x128] sm:$0xff]  ;;  %v6048_v9 = vld [vmem:[%s8555_s4 + $0xf8] sm:$0xff] }
  0xe1   : > { %v771_v16 = vpop.f32.mrf.mxu0  ;;  %v1219_v28 = vunpack.c.l.b16 %v1013_v13  ;;  %2341 = vmatpush.bf16.msrb.mxu2 %v6054_v8  ;;  %2278 = vmatpush.bf16.msrb.mxu1 %v6048_v9 }
  0xe2   : > { %v772_v18 = vadd.f32 %v6437_v30, %v771_v16  ;;  %v1133_v19 = vsel %vm6504_vm7, 0, %v1012_v11  ;;  %v6600_v47 = vsel %vm1146_vm6, %v1160_v22, %v6432_v29 }
  0xe3   : > { %v1217_v24 = vunpack.c.l.b16 %v1133_v19  ;;  %v1218_v27 = vunpack.c.h.b16 %v1133_v19  ;;  %2116 = vmatmul.bf16.vlgmr.msra.gmra.mxu1 %v1133_v19  ;;  %8643 = vst [vmem:[#allocation7_spill] sm:$0xff] %v6600_v47 }
  0xe4   : > { %v838_v36 = vmax.f32 %v772_v18, 0.0 }
  0xe5   : > { %v6594_v38 = vpack.c.b16 %v1217_v24, %v1216_v25  ;;  %v6596_v41 = vpack.c.b16 %v1219_v28, %v1218_v27 }
  0xe6   : > { %v870_v45 = vpack.c.bf16 %v838_v36, %v838_v36 }
  0xe7   : > { %2238 = vmatmul.bf16.gmra.mxu3 %v6600_v47 }
  0xe8   : > { %v934_v49 = vunpack.c.l.b16 %v870_v45 }
  0xe9   : > { %v774_v52 = vpop.f32.mrf.mxu0 }
  0xea   : > { %v775_v54 = vadd.f32 %v6437_v30, %v774_v52  ;;  %v6605_v55 = vpack.c.b16 %v934_v49, %v933_v48 }
  0xec   : > { %v839_v14 = vmax.f32 %v775_v54, 0.0  ;;  %5143 = vmatmul.msk.bf16.gmra.mxu0 %vm691_vm0, %v6010_v51 }
  0xee   : > { %v871_v25 = vpack.c.bf16 %v839_v14, %v839_v14 }
  0xf0   : > { %v935_v57 = vunpack.c.l.b16 %v871_v25 }
  0xf1   : > { %v776_v58 = vpop.f32.mrf.mxu0 }
  0xf2   : > { %v777_v63 = vadd.f32 %v6437_v30, %v776_v58  ;;  %v1337_v2 = vpack.c.b16 %v935_v57, %v6459_v50 }
  0xf4   : > { %v840_v3 = vmax.f32 %v777_v63, 0.0  ;;  %2182 = vmatmul.bf16.gmra.mxu2 %v1337_v2 }
  0xf6   : > { %v872_v4 = vpack.c.bf16 %v840_v3, %v840_v3  ;;  %v6012_v3 = vld [vmem:[%s6364_s20 + $0x78] sm:$0xff] }
  0xf8   : > { %v936_v5 = vunpack.c.l.b16 %v872_v4  ;;  %v8577_v4 = vshrl.u32 %v6605_v55, 16 }
  0xf9   : > { %v779_v10 = vpop.f32.mrf.mxu0 }
  0xfa   : > { %v6617_v11 = vpack.c.b16 %v936_v5, %v935_v57  ;;  %v780_v13 = vadd.f32 %v6437_v30, %v779_v10  ;;  %v1338_v45 = vpack.c.b16 %v6459_v50, %v936_v5  ;;  %v6658_v10 = vrot.slane %v8577_v4, 7 }
  0xfc   : > { %8644 = vst [vmem:[#allocation8_spill] sm:$0xff] %v6617_v11  ;;  %v1023_v12 = vshrl.u32 %v6617_v11, 16  ;;  %5144 = vmatmul.msk.bf16.gmra.mxu0 %vm691_vm0, %v6011_v7  ;;  %v1026_v16 = vshll.u32 %v6617_v11, 16  ;;  %v841_v22 = vmax.f32 %v780_v13, 0.0 }
  0xfe   : > { %v1025_v18 = vrot.slane %v1023_v12, 7  ;;  %v1165_v19 = vrot.slane %v1026_v16, 1  ;;  %v6635_v54 = vpack.c.bf16 %v841_v22, %v841_v22 }
 0x100   : > { %v1028_v24 = vor.u32 %v1026_v16, %v1025_v18  ;;  %v1166_v27 = vor.u32 %v1165_v19, %v1023_v12  ;;  %v8578_v63 = vunpack.c.l.b16 %v6635_v54  ;;  %v6071_v16 = vld [vmem:[%s8555_s4 + $0x1b0] sm:$0xff]  ;;  %v1029_v22 = vsel %vm973_vm4, %v1025_v18, %v6488_v6 }
 0x101   : > { %v781_v35 = vpop.f32.mrf.mxu0 }
 0x102   : > { %v782_v36 = vadd.f32 %v6437_v30, %v781_v35  ;;  %v6627_v48 = vsel %vm6504_vm7, 0, %v1028_v24  ;;  %v6631_v49 = vsel %vm1146_vm6, %v1166_v27, %v6432_v29  ;;  %v6047_v24 = vld [vmem:[%s8555_s4 + $0xf0] sm:$0xff]  ;;  %v6053_v27 = vld [vmem:[%s8555_s4 + $0x120] sm:$0xff]  ;;  %v1021_v35 = vsel %vm973_vm4, %v6658_v10, %v6488_v6 }
 0x103   : > { %8645 = vst [vmem:[#allocation9_spill] sm:$0xff] %v6631_v49  ;;  %v1220_v51 = vunpack.c.l.b16 %v6627_v48  ;;  %v1246_v52 = vunpack.c.l.b16 %v6631_v49  ;;  %v1247_v18 = vunpack.c.h.b16 %v6631_v49  ;;  %2279 = vmatpush.bf16.msrb.mxu1 %v6047_v24  ;;  %2342 = vmatpush.bf16.msrb.mxu2 %v6053_v27 }
 0x104   : > { %v842_v14 = vmax.f32 %v782_v36, 0.0  ;;  %2186 = vmatmul.bf16.gmra.mxu2 %v1338_v45 }
 0x105   : > { %v1314_v25 = vpack.c.b16 %v1220_v51, %v1219_v28  ;;  %v1359_v57 = vpack.c.b16 %v1246_v52, %v6500_v15  ;;  %v6072_v28 = vld [vmem:[%s8555_s4 + $0x1b8] sm:$0xff]  ;;  %v1221_v51 = vunpack.c.h.b16 %v6627_v48 }
 0x106   : > { %v6638_v58 = vpack.c.bf16 %v842_v14, %v842_v14  ;;  %2461 = vmatpush.bf16.msra.mxu0 %v6072_v28 }
 0x107   : > { %2121 = vmatmul.bf16.gmra.mxu1 %v1314_v25  ;;  %2243 = vmatmul.bf16.gmra.mxu3 %v1359_v57  ;;  %v1222_v25 = vunpack.c.l.b16 %v1029_v22  ;;  %v6070_v57 = vld [vmem:[%s8555_s4 + $0x1a8] sm:$0xff]  ;;  %v6069_v22 = vld [vmem:[%s8555_s4 + $0x1a0] sm:$0xff] }
 0x108   : > { %v8574_v2 = vunpack.c.l.b16 %v6638_v58  ;;  %2343 = vmatpush.bf16.msrb.mxu2 %v6052_v34 }
 0x109   : > { %v784_v5 = vpop.f32.mrf.mxu0 }
 0x10a   : > { %v6648_v7 = vpack.c.b16 %v8574_v2, %v8578_v63  ;;  %v785_v9 = vadd.f32 %v6437_v30, %v784_v5  ;;  %2462 = vmatpush.bf16.msra.mxu0 %v6071_v16  ;;  %v1315_v16 = vpack.c.b16 %v1222_v25, %v1221_v51  ;;  %v6708_v51 = vsel %vm6504_vm7, 0, %v6488_v6  ;;  %v6066_v2 = vld [vmem:[%s8555_s4 + $0x188] sm:$0xff] }
 0x10b   : > { %8648 = vst [vmem:[#allocation12_spill] sm:$0xff] %v6708_v51 }
 0x10c   : > { %v8575_v8 = vshrl.u32 %v6648_v7, 16  ;;  %5145 = vmatmul.msk.bf16.gmra.mxu0 %vm691_vm0, %v6012_v3  ;;  %v8576_v13 = vshll.u32 %v6648_v7, 16  ;;  %v843_v19 = vmax.f32 %v785_v9, 0.0  ;;  %v1272_v3 = vunpack.c.l.b16 %v1021_v35 }
 0x10e   : > { %v6662_v12 = vrot.slane %v8575_v8, 7  ;;  %v6693_v28 = vpack.c.bf16 %v843_v19, %v843_v19  ;;  %2463 = vmatpush.bf16.msra.mxu0 %v6070_v57 }
 0x110   : > { %v1036_v36 = vor.u32 %v8576_v13, %v6662_v12  ;;  %8646 = vst [vmem:[#allocation10_spill] sm:$0xff] %v6693_v28  ;;  %v8571_v35 = vunpack.c.l.b16 %v6693_v28 }
 0x111   : > { %v786_v45 = vpop.f32.mrf.mxu0 }
 0x112   : > { %v787_v52 = vadd.f32 %v6437_v30, %v786_v45  ;;  %v6687_v14 = vsel %vm6504_vm7, 0, %v1036_v36  ;;  %v1360_v45 = vpack.c.b16 %v6500_v15, %v1247_v18  ;;  %2464 = vmatpush.bf16.msra.mxu0 %v6069_v22 }
 0x113   : > { %v1273_v5 = vunpack.c.l.b16 %v6687_v14 }
 0x114   : > { %v844_v9 = vmax.f32 %v787_v52, 0.0  ;;  %v6068_v52 = vld [vmem:[%s8555_s4 + $0x198] sm:$0xff] }
 0x115   : > { %v6696_v24 = vpack.c.b16 %v1273_v5, %v1272_v3 }
 0x116   : > { %v6698_v27 = vpack.c.bf16 %v844_v9, %v844_v9  ;;  %2465 = vmatpush.bf16.msra.mxu0 %v6068_v52 }
 0x117   : > { %2125 = vmatmul.bf16.gmra.mxu1 %v1315_v16  ;;  %2247 = vmatmul.bf16.gmra.mxu3 %v1360_v45  ;;  %v6067_v45 = vld [vmem:[%s8555_s4 + $0x190] sm:$0xff] }
 0x118   : > { %8647 = vst [vmem:[#allocation11_spill] sm:$0xff] %v6698_v27  ;;  %v8570_v19 = vunpack.c.l.b16 %v6698_v27 }
 0x119   : > { %v789_v36 = vpop.f32.mrf.mxu0 }
 0x11a   : > { %v964_v18 = vpack.c.b16 %v8570_v19, %v8571_v35  ;;  %v790_v57 = vadd.f32 %v6437_v30, %v789_v36  ;;  %v6046_v19 = vld [vmem:[%s8555_s4 + $0xe8] sm:$0xff]  ;;  %2466 = vmatpush.bf16.msra.mxu0 %v6067_v45 }
 0x11b   : > { %2280 = vmatpush.bf16.msrb.mxu1 %v6046_v19 }
 0x11c   : > { %2103 = vmatmul.bf16.vlgmr.msrb.gmra.mxu0 %v6708_v51  ;;  %2190 = vmatmul.bf16.gmra.mxu2 %v964_v18  ;;  %v1039_v3 = vshrl.u32 %v964_v18, 16  ;;  %v1042_v5 = vshll.u32 %v964_v18, 16  ;;  %v845_v22 = vmax.f32 %v790_v57, 0.0 }
 0x11e   : > { %v1041_v9 = vrot.slane %v1039_v3, 7  ;;  %v1171_v16 = vrot.slane %v1042_v5, 1  ;;  %v877_v8 = vpack.c.bf16 %v845_v22, %v845_v22  ;;  %2467 = vmatpush.bf16.msra.mxu0 %v6066_v2 }
 0x120   : > { %v1044_v23 = vor.u32 %v1042_v5, %v1041_v9  ;;  %v6727_v36 = vsel %vm973_vm4, %v1041_v9, %v6488_v6  ;;  %v1172_v62 = vor.u32 %v1171_v16, %v1039_v3  ;;  %v6732_v5 = vpop.f32.mrf.mxu2  ;;  %v1213_v3 = vunpack.c.l.b16 %v6488_v6 }
 0x121   : > { %v791_v35 = vpop.f32.mrf.mxu0  ;;  %v8584_v9 = vunpack.c.l.b16 %v6727_v36  ;;  %v1214_v16 = vunpack.c.l.b16 %v6516_v21  ;;  %v941_v2 = vunpack.c.l.b16 %v877_v8  ;;  %v6045_v8 = vld [vmem:[%s8555_s4 + $0xe0] sm:$0xff] }
 0x122   : > { %v792_v18 = vadd.f32 %v6437_v30, %v791_v35  ;;  %v1137_v52 = vsel %vm6504_vm7, 0, %v1044_v23  ;;  %v6746_v19 = vsel %vm1146_vm6, %v1172_v62, %v6432_v29  ;;  %2281 = vmatpush.bf16.msrb.mxu1 %v6045_v8 }
 0x123   : > { %v1223_v61 = vunpack.c.l.b16 %v1137_v52  ;;  %v1224_v57 = vunpack.c.h.b16 %v1137_v52  ;;  %8649 = vst [vmem:[#allocation13_spill] sm:$0xff] %v6746_v19 }
 0x124   : > { %v846_v13 = vmax.f32 %v792_v18, 0.0  ;;  %v1311_v18 = vpack.c.b16 %v1214_v16, %v1213_v3 }
 0x125   : > { %v6738_v45 = vpack.c.b16 %v1223_v61, %v1222_v25  ;;  %v6742_v23 = vpack.c.b16 %v8584_v9, %v1224_v57  ;;  %v6065_v61 = vld [vmem:[%s8555_s4 + $0x180] sm:$0xff] }
 0x126   : > { %v878_v35 = vpack.c.bf16 %v846_v13, %v846_v13  ;;  %2468 = vmatpush.bf16.msra.mxu0 %v6065_v61 }
 0x127   : > { %2129 = vmatmul.bf16.gmra.mxu1 %v1137_v52  ;;  %2251 = vmatmul.bf16.gmra.mxu3 %v6746_v19 }
 0x128   : > { %v942_v25 = vunpack.c.l.b16 %v878_v35  ;;  %v6757_v4 = vpop.f32.mrf.mxu2 }
 0x129   : > { %v794_v22 = vpop.f32.mrf.mxu0 }
 0x12a   : > { %v795_v13 = vadd.f32 %v6437_v30, %v794_v22  ;;  %v6755_v62 = vpack.c.b16 %v942_v25, %v941_v2  ;;  %v6767_v25 = vpop.f32.mrf.mxu3 }
 0x12c   : > { %v847_v57 = vmax.f32 %v795_v13, 0.0  ;;  %2108 = vmatmul.bf16.gmra.mxu0 %v1311_v18 }
 0x12e   : > { %v879_v52 = vpack.c.bf16 %v847_v57, %v847_v57 }
 0x130   : > { %v943_v63 = vunpack.c.l.b16 %v879_v52 }
 0x131   : > { %v796_v35 = vpop.f32.mrf.mxu0 }
 0x132   : > { %v797_v61 = vadd.f32 %v6437_v30, %v796_v35  ;;  %v1339_v3 = vpack.c.b16 %v943_v63, %v6459_v50 }
 0x134   : > { %v848_v16 = vmax.f32 %v797_v61, 0.0  ;;  %2195 = vmatmul.bf16.gmra.mxu2 %v1339_v3 }
 0x136   : > { %v880_v2 = vpack.c.bf16 %v848_v16, %v848_v16  ;;  %v6777_v16 = vpop.f32.mrf.mxu3 }
 0x137   : > { %v2170_v22 = vpop.f32.mrf.mxu2 }
 0x138   : > { %v944_v13 = vunpack.c.l.b16 %v880_v2 }
 0x139   : > { %v799_v18 = vpop.f32.mrf.mxu0 }
 0x13a   : > { %v6769_v57 = vpack.c.b16 %v944_v13, %v943_v63  ;;  %v800_v40 = vadd.f32 %v6437_v30, %v799_v18  ;;  %v6051_v63 = vld [vmem:[%s8555_s4 + $0x110] sm:$0xff]  ;;  %v6044_v18 = vld [vmem:[%s8555_s4 + $0xd8] sm:$0xff]  ;;  %v1340_v37 = vpack.c.b16 %v6459_v50, %v944_v13  ;;  %v8652_v13 = vunpack.c.l.b16 %v6727_v36 }
 0x13b   : > { %2344 = vmatpush.bf16.msrb.mxu2 %v6051_v63  ;;  %2282 = vmatpush.bf16.msrb.mxu1 %v6044_v18 }
 0x13c   : > { %8650 = vst [vmem:[#allocation14_spill] sm:$0xff] %v6769_v57  ;;  %v1055_v52 = vshrl.u32 %v6769_v57, 16  ;;  %2112 = vmatmul.bf16.gmra.mxu0 %v6526_v31  ;;  %v1058_v35 = vshll.u32 %v6769_v57, 16  ;;  %v849_v3 = vmax.f32 %v800_v40, 0.0 }
 0x13e   : > { %v1057_v34 = vrot.slane %v1055_v52, 7  ;;  %v1177_v8 = vrot.slane %v1058_v35, 1  ;;  %v6797_v33 = vpack.c.bf16 %v849_v3, %v849_v3  ;;  %v8590_v3 = vshrl.u32 %v6755_v62, 16 }
 0x13f   : > { %v6775_v61 = vpop.f32.mrf.mxu2 }
 0x140   : > { %v1060_v22 = vor.u32 %v1058_v35, %v1057_v34  ;;  %v1178_v2 = vor.u32 %v1177_v8, %v1055_v52  ;;  %v8592_v63 = vunpack.c.l.b16 %v6797_v33 }
 0x141   : > { %v801_v31 = vpop.f32.mrf.mxu0 }
 0x142   : > { %v802_v43 = vadd.f32 %v6437_v30, %v801_v31  ;;  %v6789_v40 = vsel %vm6504_vm7, 0, %v1060_v22  ;;  %v6793_v52 = vsel %vm1146_vm6, %v1178_v2, %v6432_v29 }
 0x143   : > { %8651 = vst [vmem:[#allocation15_spill] sm:$0xff] %v6793_v52  ;;  %v1226_v35 = vunpack.c.l.b16 %v6789_v40  ;;  %v1250_v8 = vunpack.c.l.b16 %v6793_v52 }
 0x144   : > { %v850_v9 = vmax.f32 %v802_v43, 0.0  ;;  %2199 = vmatmul.bf16.gmra.mxu2 %v1340_v37 }
 0x145   : > { %v1317_v31 = vpack.c.b16 %v1226_v35, %v8652_v13  ;;  %v1362_v22 = vpack.c.b16 %v1250_v8, %v6500_v15  ;;  %v6820_v35 = vrot.slane %v8590_v3, 7  ;;  %v1227_v3 = vunpack.c.h.b16 %v6789_v40 }
 0x146   : > { %v6802_v51 = vpack.c.bf16 %v850_v9, %v850_v9 }
 0x147   : > { %2134 = vmatmul.bf16.gmra.mxu1 %v1317_v31  ;;  %v6804_v2 = vpop.f32.mrf.mxu2  ;;  %2256 = vmatmul.bf16.gmra.mxu3 %v1362_v22 }
 0x148   : > { %8653 = vst [vmem:[#allocation16_spill] sm:$0xff] %v6804_v2  ;;  %v8589_v18 = vunpack.c.l.b16 %v6802_v51 }
 0x149   : > { %v804_v0 = vpop.f32.mrf.mxu0 }
 0x14a   : > { %v6813_v37 = vpack.c.b16 %v8589_v18, %v8592_v63  ;;  %v2231_v43 = vpop.f32.mrf.mxu3  ;;  %v805_v9 = vadd.f32 %v6437_v30, %v804_v0  ;;  %v1053_v0 = vsel %vm973_vm4, %v6820_v35, %v6488_v6 }
 0x14b   : > { %v1061_v43 = vsel %vm973_vm4, %v1057_v34, %v6488_v6  ;;  %v1278_v57 = vunpack.c.l.b16 %v1053_v0 }
 0x14c   : > { %v8591_v36 = vshrl.u32 %v6813_v37, 16  ;;  %2469 = vmatmul.bf16.vlgmr.msra.gmra.mxu0 %v6516_v21  ;;  %v8596_v13 = vshll.u32 %v6813_v37, 16  ;;  %v851_v22 = vmax.f32 %v805_v9, 0.0  ;;  %v1228_v9 = vunpack.c.l.b16 %v1061_v43 }
 0x14e   : > { %v6824_v8 = vrot.slane %v8591_v36, 7  ;;  %v1251_v36 = vunpack.c.h.b16 %v6793_v52  ;;  %v6845_v28 = vpack.c.bf16 %v851_v22, %v851_v22  ;;  %v1318_v11 = vpack.c.b16 %v1228_v9, %v1227_v3 }
 0x14f   : > { %v2176_v31 = vpop.f32.mrf.mxu2 }
 0x150   : > { %v1068_v21 = vor.u32 %v8596_v13, %v6824_v8  ;;  %8654 = vst [vmem:[#allocation17_spill] sm:$0xff] %v6845_v28  ;;  %v1363_v19 = vpack.c.b16 %v6500_v15, %v1251_v36  ;;  %v6871_v36 = vld [vmem:[%s8556_s5] ss:$0 sm:$0xff] }
 0x151   : > { %v806_v18 = vpop.f32.mrf.mxu0 }
 0x152   : > { %v807_v63 = vadd.f32 %v6437_v30, %v806_v18  ;;  %v6838_v31 = vpop.f32.mrf.mxu3  ;;  %v6842_v34 = vsel %vm6504_vm7, 0, %v1068_v21  ;;  %v8603_v18 = vunpack.c.l.b16 %v6845_v28 }
 0x153   : > { %v1279_v27 = vunpack.c.l.b16 %v6842_v34 }
 0x154   : > { %v852_v13 = vmax.f32 %v807_v63, 0.0 }
 0x155   : > { %v6848_v60 = vpack.c.b16 %v1279_v27, %v1278_v57  ;;  %v6050_v57 = vld [vmem:[%s8555_s4 + $0x108] sm:$0xff] }
 0x156   : > { %v6850_v52 = vpack.c.bf16 %v852_v13, %v852_v13  ;;  %2345 = vmatpush.bf16.msrb.mxu2 %v6050_v57 }
 0x157   : > { %2138 = vmatmul.bf16.gmra.mxu1 %v1318_v11  ;;  %2260 = vmatmul.bf16.gmra.mxu3 %v1363_v19  ;;  %v6043_v19 = vld [vmem:[%s8555_s4 + $0xd0] sm:$0xff] }
 0x158   : > { %8655 = vst [vmem:[#allocation18_spill] sm:$0xff] %v6850_v52  ;;  %v8602_v21 = vunpack.c.l.b16 %v6850_v52  ;;  %2283 = vmatpush.bf16.msrb.mxu1 %v6043_v19 }
 0x159   : > { %v809_v43 = vpop.f32.mrf.mxu0 }
 0x15a   : > { %v6854_v0 = vpop.f32.mrf.mxu3  ;;  %v968_v63 = vpack.c.b16 %v8602_v21, %v8603_v18  ;;  %v810_v3 = vadd.f32 %v6437_v30, %v809_v43 }
 0x15b   : > { %8656 = vst [vmem:[#allocation19_spill] sm:$0xff] %v6854_v0 }
 0x15c   : > { %2203 = vmatmul.bf16.gmra.mxu2 %v968_v63  ;;  %2474 = vmatmul.bf16.gmra.mxu0 %v6594_v38  ;;  %v1071_v27 = vshrl.u32 %v968_v63, 16  ;;  %v1074_v11 = vshll.u32 %v968_v63, 16  ;;  %v853_v38 = vmax.f32 %v810_v3, 0.0 }
 0x15e   : > { %v1073_v13 = vrot.slane %v1071_v27, 7  ;;  %v1183_v22 = vrot.slane %v1074_v11, 1 }
 0x15f   : > { %v2178_v47 = vpop.f32.mrf.mxu2 }
 0x160   : > { %v2117_v43 = vpop.f32.mrf.mxu1  ;;  %v1076_v63 = vor.u32 %v1074_v11, %v1073_v13  ;;  %v6875_v21 = vsel %vm973_vm4, %v1073_v13, %v6488_v6  ;;  %v1184_v1 = vor.u32 %v1183_v22, %v1071_v27  ;;  %v885_v11 = vpack.c.bf16 %v853_v38, %v853_v38  ;;  %v6064_v27 = vld [vmem:[%s8555_s4 + $0x178] sm:$0xff] }
 0x161   : > { %v2118_v18 = vadd.f32 %v6871_v36, %v2117_v43  ;;  %v811_v52 = vpop.f32.mrf.mxu0  ;;  %v8612_v3 = vunpack.c.l.b16 %v6875_v21  ;;  %2400 = vmatpush.bf16.msrb.mxu3 %v6064_v27 }
 0x162   : > { %v812_v28 = vadd.f32 %v6437_v30, %v811_v52  ;;  %v2237_v49 = vpop.f32.mrf.mxu3  ;;  %v1141_v56 = vsel %vm6504_vm7, 0, %v1076_v63 }
 0x163   : > { %v1229_v19 = vunpack.c.l.b16 %v1141_v56  ;;  %v1230_v57 = vunpack.c.h.b16 %v1141_v56  ;;  %v2179_v0 = vadd.f32 %v2178_v47, %v2118_v18  ;;  %v6890_v49 = vsel %vm1146_vm6, %v1184_v1, %v6432_v29  ;;  %v6063_v1 = vld [vmem:[%s8555_s4 + $0x170] sm:$0xff] }
 0x164   : > { %v854_v20 = vmax.f32 %v812_v28, 0.0  ;;  %8657 = vst [vmem:[#allocation20_spill] sm:$0xff] %v6890_v49  ;;  %v949_v28 = vunpack.c.l.b16 %v885_v11 }
 0x165   : > { %v6882_v13 = vpack.c.b16 %v1229_v19, %v1228_v9  ;;  %v6886_v43 = vpack.c.b16 %v8612_v3, %v1230_v57  ;;  %2401 = vmatpush.bf16.msrb.mxu3 %v6063_v1  ;;  %v6062_v57 = vld [vmem:[%s8555_s4 + $0x168] sm:$0xff]  ;;  %v6060_v1 = vld [vmem:[%s8555_s4 + $0x158] sm:$0xff]  ;;  %v6041_v3 = vld [vmem:[%s8555_s4 + $0xc0] sm:$0xff] }
 0x166   : > { %v886_v52 = vpack.c.bf16 %v854_v20, %v854_v20 }
 0x167   : > { %2142 = vmatmul.bf16.gmra.mxu1 %v1141_v56  ;;  %2264 = vmatmul.bf16.gmra.mxu3 %v6890_v49  ;;  %v6905_v19 = vpop.f32.mrf.mxu2 }
 0x168   : > { %v950_v47 = vunpack.c.l.b16 %v886_v52  ;;  %8659 = vst [vmem:[#allocation22_spill] sm:$0xff] %v6905_v19  ;;  %v6049_v52 = vld [vmem:[%s8555_s4 + $0x100] sm:$0xff] }
 0x169   : > { %v814_v9 = vpop.f32.mrf.mxu0  ;;  %2402 = vmatpush.bf16.msrb.mxu3 %v6062_v57  ;;  %2346 = vmatpush.bf16.msrb.mxu2 %v6049_v52  ;;  %v6059_v52 = vld [vmem:[%s8555_s4 + $0x150] sm:$0xff] }
 0x16a   : > { %v815_v18 = vadd.f32 %v6437_v30, %v814_v9  ;;  %v2239_v22 = vpop.f32.mrf.mxu3  ;;  %v6897_v38 = vpack.c.b16 %v950_v47, %v949_v28  ;;  %v6061_v47 = vld [vmem:[%s8555_s4 + $0x160] sm:$0xff] }
 0x16b   : > { %v6899_v20 = vadd.f32 %v2239_v22, %v2179_v0  ;;  %v6042_v0 = vld [vmem:[%s8555_s4 + $0xc8] sm:$0xff] }
 0x16c   : > { %v855_v56 = vmax.f32 %v815_v18, 0.0  ;;  %2478 = vmatmul.bf16.gmra.mxu0 %v6596_v41  ;;  %2284 = vmatpush.bf16.msrb.mxu1 %v6042_v0 }
 0x16d   : > { %8658 = vst [vmem:[#allocation21_spill] sm:$0xff] %v6899_v20  ;;  %2403 = vmatpush.bf16.msrb.mxu3 %v6061_v47 }
 0x16e   : > { %v887_v63 = vpack.c.bf16 %v855_v56, %v855_v56 }
 0x170   : > { %v951_v11 = vunpack.c.l.b16 %v887_v63  ;;  %2285 = vmatpush.bf16.msrb.mxu1 %v6041_v3 }
 0x171   : > { %v816_v27 = vpop.f32.mrf.mxu0  ;;  %2404 = vmatpush.bf16.msrb.mxu3 %v6060_v1 }
 0x172   : > { %v817_v41 = vadd.f32 %v6437_v30, %v816_v27  ;;  %v1341_v28 = vpack.c.b16 %v951_v11, %v6459_v50  ;;  %v6930_v27 = vpop.f32.mrf.mxu1 }
 0x173   : > { %8661 = vst [vmem:[#allocation24_spill] sm:$0xff] %v6930_v27 }
 0x174   : > { %v856_v9 = vmax.f32 %v817_v41, 0.0  ;;  %2208 = vmatmul.bf16.gmra.mxu2 %v1341_v28 }
 0x175   : > { %2405 = vmatpush.bf16.msrb.mxu3 %v6059_v52  ;;  %v6944_v52 = vpop.f32.mrf.mxu3 }
 0x176   : > { %v888_v18 = vpack.c.bf16 %v856_v9, %v856_v9  ;;  %8663 = vst [vmem:[#allocation26_spill] sm:$0xff] %v6944_v52 }
 0x177   : > { %v2183_v22 = vpop.f32.mrf.mxu2 }
 0x178   : > { %v952_v56 = vunpack.c.l.b16 %v888_v18  ;;  %v6058_v22 = vld [vmem:[%s8555_s4 + $0x148] sm:$0xff] }
 0x179   : > { %v819_v63 = vpop.f32.mrf.mxu0  ;;  %2406 = vmatpush.bf16.msrb.mxu3 %v6058_v22 }
 0x17a   : > { %v6924_v57 = vpack.c.b16 %v952_v56, %v951_v11  ;;  %v820_v0 = vadd.f32 %v6437_v30, %v819_v63 }
 0x17c   : > { %8660 = vst [vmem:[#allocation23_spill] sm:$0xff] %v6924_v57  ;;  %v1087_v41 = vshrl.u32 %v6924_v57, 16  ;;  %2482 = vmatmul.bf16.gmra.mxu0 %v6627_v48  ;;  %v1090_v28 = vshll.u32 %v6924_v57, 16  ;;  %v857_v47 = vmax.f32 %v820_v0, 0.0  ;;  %v1342_v48 = vpack.c.b16 %v6459_v50, %v952_v56 }
 0x17e   : > { %v1089_v9 = vrot.slane %v1087_v41, 7  ;;  %v1189_v18 = vrot.slane %v1090_v28, 1  ;;  %v6946_v0 = vpack.c.bf16 %v857_v47, %v857_v47  ;;  %v6057_v47 = vld [vmem:[%s8555_s4 + $0x140] sm:$0xff] }
 0x17f   : > { %v6935_v11 = vpop.f32.mrf.mxu2  ;;  %2407 = vmatpush.bf16.msrb.mxu3 %v6057_v47 }
 0x180   : > { %8662 = vst [vmem:[#allocation25_spill] sm:$0xff] %v6935_v11  ;;  %v1092_v1 = vor.u32 %v1090_v28, %v1089_v9  ;;  %v1190_v63 = vor.u32 %v1189_v18, %v1087_v41  ;;  %v8619_v52 = vunpack.c.l.b16 %v6946_v0 }
 0x181   : > { %v821_v49 = vpop.f32.mrf.mxu0 }
 0x182   : > { %v822_v57 = vadd.f32 %v6437_v30, %v821_v49  ;;  %v6951_v11 = vsel %vm6504_vm7, 0, %v1092_v1  ;;  %v6955_v41 = vsel %vm1146_vm6, %v1190_v63, %v6432_v29  ;;  %v6088_v49 = vld [vmem:[%s8555_s4 + $0x238] sm:$0xff]  ;;  %v8665_v1 = vunpack.c.l.b16 %v6875_v21 }
 0x183   : > { %8664 = vst [vmem:[#allocation27_spill] sm:$0xff] %v6955_v41  ;;  %v1232_v28 = vunpack.c.l.b16 %v6951_v11  ;;  %v1254_v56 = vunpack.c.l.b16 %v6955_v41  ;;  %2583 = vmatpush.bf16.msra.mxu2 %v6088_v49  ;;  %v8617_v21 = vshrl.u32 %v6897_v38, 16 }
 0x184   : > { %v858_v18 = vmax.f32 %v822_v57, 0.0  ;;  %v2122_v22 = vpop.f32.mrf.mxu1  ;;  %2212 = vmatmul.bf16.gmra.mxu2 %v1342_v48  ;;  %v6080_v57 = vld [vmem:[%s8555_s4 + $0x1f8] sm:$0xff] }
 0x185   : > { %v1320_v63 = vpack.c.b16 %v1232_v28, %v8665_v1  ;;  %v1365_v3 = vpack.c.b16 %v1254_v56, %v6500_v15  ;;  %2522 = vmatpush.bf16.msra.mxu1 %v6080_v57 }
 0x186   : > { %v6969_v19 = vpack.c.bf16 %v858_v18, %v858_v18 }
 0x187   : > { %2147 = vmatmul.bf16.gmra.mxu1 %v1320_v63  ;;  %v2187_v20 = vpop.f32.mrf.mxu2  ;;  %2269 = vmatmul.bf16.gmra.mxu3 %v1365_v3  ;;  %v6990_v63 = vrot.slane %v8617_v21, 7  ;;  %v1233_v21 = vunpack.c.h.b16 %v6951_v11 }
 0x188   : > { %8666 = vst [vmem:[#allocation28_spill] sm:$0xff] %v6969_v19  ;;  %v8616_v48 = vunpack.c.l.b16 %v6969_v19 }
 0x189   : > { %v824_v28 = vpop.f32.mrf.mxu0 }
 0x18a   : > { %v6980_v56 = vpack.c.b16 %v8616_v48, %v8619_v52  ;;  %v825_v47 = vadd.f32 %v6437_v30, %v824_v28  ;;  %v2244_v18 = vpop.f32.mrf.mxu3  ;;  %v6998_v30 = vsel %vm973_vm4, %v1089_v9, %v6488_v6  ;;  %v1085_v28 = vsel %vm973_vm4, %v6990_v63, %v6488_v6  ;;  %v6242_v9 = vld [vmem:[%s8554_s3] ss:$0 sm:$0xff] }
 0x18b   : > { %v1284_v27 = vunpack.c.l.b16 %v1085_v28 }
 0x18c   : > { %v8618_v22 = vshrl.u32 %v6980_v56, 16  ;;  %v8620_v49 = vshll.u32 %v6980_v56, 16  ;;  %v6985_v1 = vpop.f32.mrf.mxu1  ;;  %2487 = vmatmul.bf16.gmra.mxu0 %v6738_v45  ;;  %v859_v57 = vmax.f32 %v825_v47, 0.0 }
 0x18d   : > { %8667 = vst [vmem:[#allocation29_spill] sm:$0xff] %v6985_v1 }
 0x18e   : > { %v6994_v3 = vrot.slane %v8618_v22, 7  ;;  %v1255_v22 = vunpack.c.h.b16 %v6955_v41  ;;  %v7008_v52 = vpack.c.bf16 %v859_v57, %v859_v57 }
 0x18f   : > { %v2189_v48 = vpop.f32.mrf.mxu2 }
 0x190   : > { %8668 = vst [vmem:[#allocation30_spill] sm:$0xff] %v6994_v3  ;;  %v1100_v45 = vor.u32 %v8620_v49, %v6994_v3  ;;  %v8627_v49 = vunpack.c.l.b16 %v6998_v30 }
 0x191   : > { %v826_v18 = vpop.f32.mrf.mxu0  ;;  %8669 = vst [vmem:[#allocation31_spill] sm:$0xff] %v7008_v52 }
 0x192   : > { %v827_v48 = vadd.f32 %v6242_v9, %v826_v18  ;;  %v7013_v47 = vpop.f32.mrf.mxu3  ;;  %v7017_v1 = vsel %vm6504_vm7, 0, %v1100_v45  ;;  %v1321_v18 = vpack.c.b16 %v8627_v49, %v1233_v21  ;;  %v1366_v9 = vpack.c.b16 %v6500_v15, %v1255_v22 }
 0x193   : > { %8670 = vst [vmem:[#allocation32_spill] sm:$0xff] %v7013_v47  ;;  %v1285_v3 = vunpack.c.l.b16 %v7017_v1  ;;  %v8626_v45 = vunpack.c.l.b16 %v7008_v52 }
 0x194   : > { %8671 = vst [vmem:[#allocation33_spill] sm:$0xff] %v7017_v1  ;;  %v860_v19 = vmax.f32 %v827_v48, 0.0  ;;  %v2126_v41 = vpop.f32.mrf.mxu1  ;;  %2347 = vmatmul.bf16.vlgmr.msrb.gmra.mxu2 %v6451_v46 }
 0x195   : > { %v2127_v57 = vadd.f32 %v6871_v36, %v2126_v41  ;;  %v7026_v47 = vpack.c.b16 %v1285_v3, %v1284_v27  ;;  %v986_v27 = vshll.u32 %v6451_v46, 16 }
 0x196   : > { %v7029_v2 = vpack.c.bf16 %v860_v19, %v860_v19 }
 0x197   : > { %2151 = vmatmul.bf16.gmra.mxu1 %v1321_v18  ;;  %2273 = vmatmul.bf16.gmra.mxu3 %v1366_v9  ;;  %v2188_v28 = vadd.f32 %v2187_v20, %v2127_v57  ;;  %v6087_v20 = vld [vmem:[%s8555_s4 + $0x230] sm:$0xff]  ;;  %v1150_v9 = vrot.slane %v986_v27, 1  ;;  %v988_v49 = vor.u32 %v986_v27, %v6548_v42 }
 0x198   : > { %8672 = vst [vmem:[#allocation34_spill] sm:$0xff] %v7029_v2  ;;  %v8625_v48 = vunpack.c.l.b16 %v7029_v2  ;;  %2584 = vmatpush.bf16.msra.mxu2 %v6087_v20  ;;  %v8675_v20 = vshrl.u32 %v6451_v46, 16  ;;  %v8677_v46 = vshrl.u32 %v6541_v39, 16 }
 0x199   : > { %v7032_v1 = vpop.f32.mrf.mxu0 }
 0x19a   : > { %v7038_v41 = vpack.c.b16 %v8625_v48, %v8626_v45  ;;  %v2248_v21 = vpop.f32.mrf.mxu3  ;;  %v8674_v48 = vunpack.c.l.b16 %v6521_v26 }
 0x19b   : > { %v7041_v22 = vadd.f32 %v2248_v21, %v2188_v28  ;;  %v6079_v28 = vld [vmem:[%s8555_s4 + $0x1f0] sm:$0xff] }
 0x19c   : > { %v8628_v19 = vshll.u32 %v7038_v41, 16  ;;  %v2128_v3 = vpop.f32.mrf.mxu1  ;;  %2491 = vmatmul.bf16.gmra.mxu0 %v6742_v23  ;;  %v8631_v57 = vshrl.u32 %v7038_v41, 16  ;;  %2523 = vmatpush.bf16.msra.mxu1 %v6079_v28  ;;  %v1403_v45 = vpack.c.b16 %v8674_v48, %v6459_v50  ;;  %v1130_v28 = vsel %vm6504_vm7, 0, %v988_v49 }
 0x19d   : > { %8673 = vst [vmem:[#allocation35_spill] sm:$0xff] %v7041_v22 }
 0x19e   : > { %v1195_v18 = vrot.slane %v8628_v19, 1  ;;  %v1151_v19 = vor.u32 %v1150_v9, %v8675_v20  ;;  %v8678_v20 = vunpack.c.l.b16 %v6528_v32 }
 0x19f   : > { %v2191_v52 = vpop.f32.mrf.mxu2 }
 0x1a0   : > { %v7056_v21 = vor.u32 %v1195_v18, %v8631_v57  ;;  %v8676_v18 = vshll.u32 %v6541_v39, 16  ;;  %v1152_v26 = vsel %vm1146_vm6, %v1151_v19, %v6432_v29  ;;  %v6086_v39 = vld [vmem:[%s8555_s4 + $0x228] sm:$0xff] }
 0x1a1   : > { %v7058_v23 = vpop.f32.mrf.mxu0  ;;  %2585 = vmatpush.bf16.msra.mxu2 %v6086_v39 }
 0x1a2   : > { %v2250_v3 = vpop.f32.mrf.mxu3  ;;  %v1156_v57 = vrot.slane %v8676_v18, 1 }
 0x1a4   : > { %v2130_v2 = vpop.f32.mrf.mxu1  ;;  %2352 = vmatmul.bf16.gmra.mxu2 %v1403_v45  ;;  %v1157_v27 = vor.u32 %v1156_v57, %v8677_v46  ;;  %v6078_v57 = vld [vmem:[%s8555_s4 + $0x1e8] sm:$0xff] }
 0x1a5   : > { %v2131_v22 = vadd.f32 %v6871_v36, %v2130_v2  ;;  %2524 = vmatpush.bf16.msra.mxu1 %v6078_v57 }
 0x1a6   : > { %v1158_v2 = vsel %vm1146_vm6, %v1157_v27, %v6432_v29 }
 0x1a7   : > { %2286 = vmatmul.bf16.vlgmr.msrb.gmra.mxu1 %v1130_v28  ;;  %2408 = vmatmul.bf16.vlgmr.msrb.gmra.mxu3 %v1152_v26  ;;  %v2192_v42 = vadd.f32 %v2191_v52, %v2131_v22  ;;  %v7080_v3 = vpop.f32.mrf.mxu2  ;;  %v1290_v19 = vunpack.c.l.b16 %v1158_v2  ;;  %v1404_v52 = vpack.c.b16 %v6459_v50, %v8678_v20  ;;  %v1005_v26 = vsel %vm973_vm4, %v6553_v44, %v6488_v6 }
 0x1a8   : > { %v1269_v27 = vunpack.c.l.b16 %v1005_v26  ;;  %v1018_v44 = vshll.u32 %v6605_v55, 16 }
 0x1a9   : > { %v2109_v48 = vpop.f32.mrf.mxu0  ;;  %v1424_v22 = vpack.c.b16 %v1290_v19, %v6500_v15 }
 0x1aa   : > { %v2252_v45 = vpop.f32.mrf.mxu3  ;;  %v1291_v48 = vunpack.c.h.b16 %v1158_v2 }
 0x1ab   : > { %v7075_v9 = vadd.f32 %v2252_v45, %v2192_v42 }
 0x1ac   : > { %2495 = vmatmul.bf16.gmra.mxu0 %v6789_v40  ;;  %v7097_v32 = vpop.f32.mrf.mxu1  ;;  %v1425_v20 = vpack.c.b16 %v6500_v15, %v1291_v48 }
 0x1b1   : > { %v7082_v49 = vpop.f32.mrf.mxu0 }
 0x1b2   : > { %v7106_v46 = vpop.f32.mrf.mxu3 }
 0x1b4   : > { %2356 = vmatmul.bf16.gmra.mxu2 %v1404_v52 }
 0x1b7   : > { %v2196_v40 = vpop.f32.mrf.mxu2  ;;  %2291 = vmatmul.bf16.gmra.mxu1 %v6571_v59  ;;  %2413 = vmatmul.bf16.gmra.mxu3 %v1424_v22  ;;  %v1268_v59 = vunpack.c.h.b16 %v6565_v53  ;;  %v6085_v53 = vld [vmem:[%s8555_s4 + $0x220] sm:$0xff] }
 0x1b8   : > { %2586 = vmatpush.bf16.msra.mxu2 %v6085_v53  ;;  %v6077_v22 = vld [vmem:[%s8555_s4 + $0x1e0] sm:$0xff]  ;;  %v1162_v40 = vrot.slane %v1018_v44, 1 }
 0x1b9   : > { %v7095_v18 = vpop.f32.mrf.mxu0  ;;  %v1381_v19 = vpack.c.b16 %v1269_v27, %v1268_v59  ;;  %2525 = vmatpush.bf16.msra.mxu1 %v6077_v22  ;;  %v8679_v59 = vunpack.c.l.b16 %v6635_v54  ;;  %v1020_v27 = vor.u32 %v1018_v44, %v6658_v10 }
 0x1bb   : > { %v1405_v48 = vpack.c.b16 %v8679_v59, %v6459_v50  ;;  %v1134_v22 = vsel %vm6504_vm7, 0, %v1020_v27  ;;  %v8683_v59 = vshrl.u32 %v7038_v41, 16 }
 0x1bc   : > { %2500 = vmatmul.bf16.gmra.mxu0 %v6882_v13 }
 0x1bf   : > { %v7100_v28 = vpop.f32.mrf.mxu2 }
 0x1c1   : > { %v2115_v42 = vpop.f32.mrf.mxu0 }
 0x1c4   : > { %v2135_v45 = vpop.f32.mrf.mxu1  ;;  %2360 = vmatmul.bf16.gmra.mxu2 %v6605_v55 }
 0x1c7   : > { %v2200_v13 = vpop.f32.mrf.mxu2  ;;  %2295 = vmatmul.bf16.gmra.mxu1 %v1381_v19  ;;  %2417 = vmatmul.bf16.gmra.mxu3 %v1425_v20 }
 0x1c9   : > { %v7110_v52 = vpop.f32.mrf.mxu0 }
 0x1ca   : > { %v2257_v39 = vpop.f32.mrf.mxu3 }
 0x1cb   : > { %v8681_v39 = vshll.u32 %v6648_v7, 16 }
 0x1cc   : > { %v7116_v2 = vpop.f32.mrf.mxu1  ;;  %2504 = vmatmul.bf16.gmra.mxu0 %v6886_v43  ;;  %v8680_v43 = vshrl.u32 %v6605_v55, 16  ;;  %v8682_v55 = vshrl.u32 %v6648_v7, 16 }
 0x1cd   : > { %v1168_v53 = vrot.slane %v8681_v39, 1  ;;  %v6084_v39 = vld [vmem:[%s8555_s4 + $0x218] sm:$0xff] }
 0x1ce   : > { %v1163_v45 = vor.u32 %v1162_v40, %v8680_v43  ;;  %2587 = vmatpush.bf16.msra.mxu2 %v6084_v39 }
 0x1cf   : > { %v2202_v57 = vpop.f32.mrf.mxu2  ;;  %v1169_v44 = vor.u32 %v1168_v53, %v8682_v55 }
 0x1d0   : > { %v1164_v57 = vsel %vm1146_vm6, %v1163_v45, %v6432_v29 }
 0x1d1   : > { %v7122_v26 = vpop.f32.mrf.mxu0  ;;  %v1170_v27 = vsel %vm1146_vm6, %v1169_v44, %v6432_v29 }
 0x1d2   : > { %v7124_v42 = vpop.f32.mrf.mxu3  ;;  %v1294_v7 = vunpack.c.l.b16 %v1170_v27 }
 0x1d4   : > { %v2139_v19 = vpop.f32.mrf.mxu1  ;;  %2365 = vmatmul.bf16.gmra.mxu2 %v1405_v48  ;;  %v7143_v48 = vrot.slane %v8683_v59, 7  ;;  %v1427_v55 = vpack.c.b16 %v1294_v7, %v6500_v15 }
 0x1d5   : > { %v2140_v20 = vadd.f32 %v6871_v36, %v2139_v19 }
 0x1d7   : > { %2299 = vmatmul.bf16.gmra.mxu1 %v1134_v22  ;;  %2421 = vmatmul.bf16.gmra.mxu3 %v1164_v57  ;;  %v2201_v54 = vadd.f32 %v2200_v13, %v2140_v20  ;;  %v8684_v13 = vshll.u32 %v7038_v41, 16  ;;  %v8685_v22 = vunpack.c.l.b16 %v6638_v58 }
 0x1d9   : > { %v2475_v10 = vpop.f32.mrf.mxu0  ;;  %v1108_v45 = vor.u32 %v8684_v13, %v7143_v48  ;;  %v1406_v57 = vpack.c.b16 %v6459_v50, %v8685_v22  ;;  %v8686_v13 = vunpack.c.l.b16 %v6998_v30  ;;  %v1274_v22 = vunpack.c.h.b16 %v6687_v14 }
 0x1da   : > { %v2261_v40 = vpop.f32.mrf.mxu3 }
 0x1db   : > { %v7145_v43 = vadd.f32 %v2261_v40, %v2201_v54  ;;  %v6076_v40 = vld [vmem:[%s8555_s4 + $0x1d8] sm:$0xff] }
 0x1dc   : > { %v2141_v19 = vpop.f32.mrf.mxu1  ;;  %2508 = vmatmul.bf16.gmra.mxu0 %v6951_v11  ;;  %v7163_v11 = vsel %vm6504_vm7, 0, %v1108_v45  ;;  %2526 = vmatpush.bf16.msra.mxu1 %v6076_v40  ;;  %v6075_v40 = vld [vmem:[%s8555_s4 + $0x1d0] sm:$0xff] }
 0x1dd   : > { %v1305_v44 = vunpack.c.l.b16 %v7163_v11 }
 0x1df   : > { %v2204_v41 = vpop.f32.mrf.mxu2  ;;  %v1457_v45 = vpack.c.b16 %v1305_v44, %v8686_v13  ;;  %v1050_v44 = vshll.u32 %v6755_v62, 16 }
 0x1e0   : > { %2527 = vmatpush.bf16.msra.mxu1 %v6075_v40 }
 0x1e1   : > { %v7153_v20 = vpop.f32.mrf.mxu0  ;;  %v1174_v14 = vrot.slane %v1050_v44, 1 }
 0x1e2   : > { %v2263_v53 = vpop.f32.mrf.mxu3 }
 0x1e4   : > { %v2143_v54 = vpop.f32.mrf.mxu1  ;;  %2369 = vmatmul.bf16.gmra.mxu2 %v1406_v57  ;;  %v1295_v57 = vunpack.c.h.b16 %v1170_v27 }
 0x1e5   : > { %v2144_v10 = vadd.f32 %v6871_v36, %v2143_v54 }
 0x1e6   : > { %v1428_v30 = vpack.c.b16 %v6500_v15, %v1295_v57 }
 0x1e7   : > { %2304 = vmatmul.bf16.gmra.mxu1 %v6696_v24  ;;  %2426 = vmatmul.bf16.gmra.mxu3 %v1427_v55  ;;  %v2205_v58 = vadd.f32 %v2204_v41, %v2144_v10  ;;  %v7178_v7 = vpop.f32.mrf.mxu2  ;;  %v1037_v24 = vsel %vm973_vm4, %v6662_v12, %v6488_v6  ;;  %v6083_v12 = vld [vmem:[%s8555_s4 + $0x210] sm:$0xff] }
 0x1e8   : > { %v1275_v54 = vunpack.c.l.b16 %v1037_v24  ;;  %2588 = vmatpush.bf16.msra.mxu2 %v6083_v12 }
 0x1e9   : > { %v7172_v59 = vpop.f32.mrf.mxu0 }
 0x1ea   : > { %v2265_v19 = vpop.f32.mrf.mxu3  ;;  %v1384_v41 = vpack.c.b16 %v1275_v54, %v1274_v22  ;;  %v8688_v22 = vshrl.u32 %v6755_v62, 16 }
 0x1eb   : > { %v7176_v39 = vadd.f32 %v2265_v19, %v2205_v58 }
 0x1ec   : > { %2513 = vmatmul.bf16.gmra.mxu0 %v1457_v45  ;;  %v7192_v58 = vpop.f32.mrf.mxu1  ;;  %v8687_v45 = vunpack.c.l.b16 %v6797_v33  ;;  %v1175_v57 = vor.u32 %v1174_v14, %v8688_v22 }
 0x1ee   : > { %v1407_v24 = vpack.c.b16 %v8687_v45, %v6459_v50  ;;  %v1176_v12 = vsel %vm1146_vm6, %v1175_v57, %v6432_v29 }
 0x1f1   : > { %v2481_v53 = vpop.f32.mrf.mxu0 }
 0x1f2   : > { %v7199_v13 = vpop.f32.mrf.mxu3  ;;  %v1052_v53 = vor.u32 %v1050_v44, %v6820_v35  ;;  %v8690_v35 = vshrl.u32 %v6813_v37, 16 }
 0x1f4   : > { %2373 = vmatmul.bf16.gmra.mxu2 %v6755_v62 }
 0x1f7   : > { %v2209_v10 = vpop.f32.mrf.mxu2  ;;  %2308 = vmatmul.bf16.gmra.mxu1 %v1384_v41  ;;  %2430 = vmatmul.bf16.gmra.mxu3 %v1428_v30  ;;  %v8689_v41 = vshll.u32 %v6813_v37, 16  ;;  %v6082_v37 = vld [vmem:[%s8555_s4 + $0x208] sm:$0xff] }
 0x1f8   : > { %v1138_v10 = vsel %vm6504_vm7, 0, %v1052_v53  ;;  %2589 = vmatpush.bf16.msra.mxu2 %v6082_v37 }
 0x1f9   : > { %v7186_v55 = vpop.f32.mrf.mxu0  ;;  %v1180_v30 = vrot.slane %v8689_v41, 1 }
 0x1fb   : > { %v1181_v44 = vor.u32 %v1180_v30, %v8690_v35 }
 0x1ff   : > { %v2210_v27 = vpop.f32.mrf.mxu2 }
 0x201   : > { %v7197_v19 = vpop.f32.mrf.mxu0 }
 0x204   : > { %v2148_v54 = vpop.f32.mrf.mxu1  ;;  %2378 = vmatmul.bf16.gmra.mxu2 %v1407_v24  ;;  %v1182_v24 = vsel %vm1146_vm6, %v1181_v44, %v6432_v29 }
 0x205   : > { %v1298_v41 = vunpack.c.l.b16 %v1182_v24  ;;  %v1299_v37 = vunpack.c.h.b16 %v1182_v24 }
 0x207   : > { %v2213_v40 = vpop.f32.mrf.mxu2  ;;  %2312 = vmatmul.bf16.gmra.mxu1 %v1138_v10  ;;  %2434 = vmatmul.bf16.gmra.mxu3 %v1176_v12  ;;  %v8691_v10 = vunpack.c.l.b16 %v6802_v51 }
 0x209   : > { %v2488_v33 = vpop.f32.mrf.mxu0  ;;  %v1408_v12 = vpack.c.b16 %v6459_v50, %v8691_v10 }
 0x20a   : > { %v2270_v62 = vpop.f32.mrf.mxu3 }
 0x20b   : > { %v6074_v62 = vld [vmem:[%s8555_s4 + $0x1c8] sm:$0xff] }
 0x20c   : > { %v2149_v14 = vpop.f32.mrf.mxu1  ;;  %2528 = vmatpush.bf16.msra.mxu1 %v6074_v62 }
 0x20d   : > { %v2150_v45 = vadd.f32 %v6871_v36, %v2149_v14 }
 0x20f   : > { %v2215_v22 = vpop.f32.mrf.mxu2  ;;  %v2211_v54 = vadd.f32 %v2210_v27, %v2150_v45  ;;  %v1430_v27 = vpack.c.b16 %v1298_v41, %v6500_v15 }
 0x210   : > { %v2105_v22 = vadd.f32 %v6871_v36, %v7032_v1 }
 0x211   : > { %v7218_v53 = vpop.f32.mrf.mxu0 }
 0x212   : > { %v2271_v57 = vpop.f32.mrf.mxu3 }
 0x213   : > { %v7223_v33 = vadd.f32 %v2271_v57, %v2211_v54  ;;  %v2166_v57 = vadd.f32 %v6732_v5, %v2105_v22 }
 0x214   : > { %v2152_v30 = vpop.f32.mrf.mxu1  ;;  %2382 = vmatmul.bf16.gmra.mxu2 %v1408_v12  ;;  %v1280_v12 = vunpack.c.h.b16 %v6842_v34 }
 0x215   : > { %v2153_v35 = vadd.f32 %v6871_v36, %v2152_v30  ;;  %v2227_v1 = vadd.f32 %v6767_v25, %v2166_v57 }
 0x217   : > { %2317 = vmatmul.bf16.gmra.mxu1 %v6848_v60  ;;  %v2348_v44 = vpop.f32.mrf.mxu2  ;;  %2439 = vmatmul.bf16.gmra.mxu3 %v1430_v27  ;;  %v2214_v51 = vadd.f32 %v2213_v40, %v2153_v35  ;;  %v1069_v40 = vsel %vm973_vm4, %v6824_v8, %v6488_v6  ;;  %v2107_v35 = vadd.f32 %v6871_v36, %v7058_v23  ;;  %v1082_v23 = vshll.u32 %v6897_v38, 16 }
 0x218   : > { %v1281_v27 = vunpack.c.l.b16 %v1069_v40  ;;  %v6081_v40 = vld [vmem:[%s8555_s4 + $0x200] sm:$0xff] }
 0x219   : > { %v7234_v14 = vpop.f32.mrf.mxu0  ;;  %v2168_v8 = vadd.f32 %v6757_v4, %v2107_v35  ;;  %v5476_v4 = vld [vmem:[%s8559_s8 + $0x30] sm:$0xf]  ;;  %2590 = vmatpush.bf16.msra.mxu2 %v6081_v40 }
 0x21a   : > { %v2274_v45 = vpop.f32.mrf.mxu3  ;;  %v1387_v62 = vpack.c.b16 %v1281_v27, %v1280_v12  ;;  %v8692_v27 = vunpack.c.l.b16 %v6946_v0  ;;  %v2111_v0 = vadd.f32 %v6871_v36, %v7082_v49  ;;  %v8695_v49 = vshrl.u32 %v6980_v56, 16 }
 0x21b   : > { %v7238_v54 = vadd.f32 %v2274_v45, %v2214_v51  ;;  %v1431_v45 = vpack.c.b16 %v6500_v15, %v1299_v37  ;;  %v2229_v57 = vadd.f32 %v6777_v16, %v2168_v8  ;;  %v6073_v16 = vld [vmem:[%s8555_s4 + $0x1c0] sm:$0xff]  ;;  %v8693_v8 = vshrl.u32 %v6897_v38, 16 }
 0x21c   : > { %v2154_v41 = vpop.f32.mrf.mxu1  ;;  %2529 = vmatpush.bf16.msra.mxu1 %v6073_v16 }
 0x21f   : > { %v2350_v60 = vpop.f32.mrf.mxu2 }
 0x221   : > { %v2494_v10 = vpop.f32.mrf.mxu0 }
 0x222   : > { %v2276_v30 = vpop.f32.mrf.mxu3 }
 0x223   : > { %v1186_v30 = vrot.slane %v1082_v23, 1 }
 0x224   : > { %v2287_v51 = vpop.f32.mrf.mxu1  ;;  %2386 = vmatmul.bf16.gmra.mxu2 %v6897_v38 }
 0x225   : > { %v2288_v5 = vadd.f32 %v2287_v51, %v2227_v1  ;;  %v1409_v51 = vpack.c.b16 %v8692_v27, %v6459_v50  ;;  %v1109_v27 = vsel %vm973_vm4, %v7143_v48, %v6488_v6  ;;  %v8697_v48 = vld [vmem:[#allocation28_spill] sm:$0xff] }
 0x227   : > { %2321 = vmatmul.bf16.gmra.mxu1 %v1387_v62  ;;  %v2353_v22 = vpop.f32.mrf.mxu2  ;;  %2443 = vmatmul.bf16.gmra.mxu3 %v1431_v45  ;;  %v2349_v34 = vadd.f32 %v2348_v44, %v2288_v5  ;;  %v6100_v44 = vld [vmem:[%s8559_s8 + $0x34] sm:$0xf0]  ;;  %v1084_v45 = vor.u32 %v1082_v23, %v6990_v63  ;;  %v8694_v63 = vshll.u32 %v6980_v56, 16 }
 0x228   : > { %v5477_v37 = vor.u32 %v6100_v44, %v5476_v4  ;;  %v6099_v22 = vld [vmem:[%s8559_s8 + $0x34] sm:$0xf] }
 0x229   : > { %v7251_v24 = vpop.f32.mrf.mxu0  ;;  %v1192_v23 = vrot.slane %v8694_v63, 1  ;;  %v1142_v38 = vsel %vm6504_vm7, 0, %v1084_v45  ;;  %v1307_v45 = vunpack.c.l.b16 %v1109_v27  ;;  %v8698_v63 = vunpack.c.l.b16 %v8697_v48  ;;  %v8700_v27 = vld [vmem:[#allocation30_spill] sm:$0xff] }
 0x22a   : > { %v2409_v41 = vpop.f32.mrf.mxu3  ;;  %3087 = vmatpush.bf16.msra.mxu3 %v5477_v37 }
 0x22b   : > { %v7254_v25 = vadd.f32 %v2409_v41, %v2349_v34  ;;  %v5478_v34 = vld [vmem:[%s8559_s8 + $0x38] sm:$0xf0] }
 0x22c   : > { %v2289_v10 = vpop.f32.mrf.mxu1  ;;  %v5481_v41 = vor.u32 %v6099_v22, %v5478_v34  ;;  %v8696_v22 = vld [vmem:[#allocation16_spill] sm:$0xff] }
 0x22d   : > { %v2290_v12 = vadd.f32 %v2289_v10, %v2229_v57  ;;  %v2172_v10 = vadd.f32 %v6775_v61, %v2111_v0  ;;  %v1306_v61 = vunpack.c.h.b16 %v7163_v11  ;;  %v1410_v11 = vpack.c.b16 %v6459_v50, %v8698_v63  ;;  %v8704_v63 = vld [vmem:[#allocation21_spill] sm:$0xff] }
 0x22e   : > { %3116 = vmatpush.bf16.msrb.mxu0 %v5481_v41 }
 0x22f   : > { %v2354_v35 = vpop.f32.mrf.mxu2  ;;  %v7266_v1 = vadd.f32 %v2350_v60, %v2290_v12  ;;  %v1187_v60 = vor.u32 %v1186_v30, %v8693_v8  ;;  %v1193_v12 = vor.u32 %v1192_v23, %v8695_v49  ;;  %v2114_v30 = vadd.f32 %v6871_v36, %v7095_v18  ;;  %v8699_v23 = vld [vmem:[#allocation19_spill] sm:$0xff] }
 0x230   : > { %v2233_v16 = vadd.f32 %v6838_v31, %v2172_v10  ;;  %v1458_v56 = vpack.c.b16 %v1307_v45, %v1306_v61 }
 0x231   : > { %v7274_v5 = vpop.f32.mrf.mxu0  ;;  %v1188_v40 = vsel %vm1146_vm6, %v1187_v60, %v6432_v29  ;;  %v1194_v60 = vsel %vm1146_vm6, %v1193_v12, %v6432_v29  ;;  %v2175_v34 = vadd.f32 %v8696_v22, %v2114_v30 }
 0x232   : > { %v7276_v62 = vpop.f32.mrf.mxu3  ;;  %2517 = vmatmul.bf16.gmra.mxu0 %v1458_v56  ;;  %v1302_v18 = vunpack.c.l.b16 %v1194_v60 }
 0x234   : > { %v2292_v57 = vpop.f32.mrf.mxu1  ;;  %2391 = vmatmul.bf16.gmra.mxu2 %v1409_v51 }
 0x237   : > { %2325 = vmatmul.bf16.gmra.mxu1 %v1142_v38  ;;  %v2357_v4 = vpop.f32.mrf.mxu2  ;;  %2447 = vmatmul.bf16.gmra.mxu3 %v1188_v40  ;;  %v2236_v38 = vadd.f32 %v8699_v23, %v2175_v34  ;;  %v1303_v34 = vunpack.c.h.b16 %v1194_v60 }
 0x239   : > { %v2501_v44 = vpop.f32.mrf.mxu0 }
 0x23a   : > { %v2414_v37 = vpop.f32.mrf.mxu3  ;;  %v1433_v44 = vpack.c.b16 %v1302_v18, %v6500_v15  ;;  %v8702_v18 = vld [vmem:[#allocation4_spill] sm:$0xff] }
 0x23c   : > { %v2293_v51 = vpop.f32.mrf.mxu1 }
 0x23d   : > { %v2294_v8 = vadd.f32 %v2293_v51, %v2233_v16  ;;  %v1101_v51 = vsel %vm973_vm4, %v8700_v27, %v6488_v6 }
 0x23e   : > { %v1287_v22 = vunpack.c.l.b16 %v1101_v51 }
 0x23f   : > { %v2359_v0 = vpop.f32.mrf.mxu2  ;;  %v7308_v41 = vadd.f32 %v2354_v35, %v2294_v8  ;;  %v8701_v8 = vld [vmem:[#allocation33_spill] sm:$0xff] }
 0x240   : > { %v1286_v56 = vunpack.c.h.b16 %v8701_v8  ;;  %v6098_v8 = vld [vmem:[%s8559_s8 + $0x24] sm:$0xf0] }
 0x241   : > { %v7310_v31 = vpop.f32.mrf.mxu0 }
 0x242   : > { %v7312_v57 = vpop.f32.mrf.mxu3  ;;  %v1390_v23 = vpack.c.b16 %v1287_v22, %v1286_v56  ;;  %v8707_v22 = vld [vmem:[#allocation7_spill] sm:$0xff] }
 0x244   : > { %v2296_v40 = vpop.f32.mrf.mxu1  ;;  %2395 = vmatmul.bf16.gmra.mxu2 %v1410_v11 }
 0x245   : > { %v2297_v10 = vadd.f32 %v2296_v40, %v2236_v38  ;;  %v1434_v38 = vpack.c.b16 %v6500_v15, %v1303_v34  ;;  %v1244_v34 = vunpack.c.l.b16 %v8707_v22 }
 0x247   : > { %2330 = vmatmul.bf16.gmra.mxu1 %v7026_v47  ;;  %v2361_v35 = vpop.f32.mrf.mxu2  ;;  %2452 = vmatmul.bf16.gmra.mxu3 %v1433_v44  ;;  %v2358_v49 = vadd.f32 %v2357_v4, %v2297_v10  ;;  %v8703_v4 = vld [vmem:[#allocation24_spill] sm:$0xff]  ;;  %v8705_v10 = vld [vmem:[#allocation22_spill] sm:$0xff] }
 0x248   : > { %v2120_v48 = vadd.f32 %v6871_v36, %v8703_v4 }
 0x249   : > { %v7320_v12 = vpop.f32.mrf.mxu0 }
 0x24a   : > { %v2418_v37 = vpop.f32.mrf.mxu3  ;;  %v2181_v44 = vadd.f32 %v8705_v10, %v2120_v48  ;;  %v1492_v48 = vpack.c.b16 %v1244_v34, %v6500_v15  ;;  %v8709_v10 = vld [vmem:[#allocation3_spill] sm:$0xff] }
 0x24b   : > { %v7322_v30 = vadd.f32 %v2418_v37, %v2358_v49  ;;  %v8706_v37 = vld [vmem:[#allocation26_spill] sm:$0xff] }
 0x24c   : > { %v2298_v16 = vpop.f32.mrf.mxu1 }
 0x24d   : > { %v2242_v16 = vadd.f32 %v8706_v37, %v2181_v44  ;;  %v8710_v44 = vld [vmem:[#allocation25_spill] sm:$0xff] }
 0x24f   : > { %v2363_v61 = vpop.f32.mrf.mxu2 }
 0x251   : > { %v2507_v45 = vpop.f32.mrf.mxu0 }
 0x252   : > { %v2420_v47 = vpop.f32.mrf.mxu3  ;;  %v5468_v45 = vld [vmem:[%s8559_s8 + $0x20] sm:$0xf] }
 0x254   : > { %v2300_v0 = vpop.f32.mrf.mxu1  ;;  %2591 = vmatmul.bf16.vlgmr.msra.gmra.mxu2 %v8702_v18 }
 0x255   : > { %v2301_v11 = vadd.f32 %v2300_v0, %v8704_v63  ;;  %v6097_v63 = vld [vmem:[%s8559_s8 + $0x24] sm:$0xf] }
 0x257   : > { %2334 = vmatmul.bf16.gmra.mxu1 %v1390_v23  ;;  %v2366_v6 = vpop.f32.mrf.mxu2  ;;  %2456 = vmatmul.bf16.gmra.mxu3 %v1434_v38  ;;  %v2362_v40 = vadd.f32 %v2361_v35, %v2301_v11  ;;  %v5469_v35 = vor.u32 %v6098_v8, %v5468_v45  ;;  %v5470_v11 = vld [vmem:[%s8559_s8 + $0x28] sm:$0xf0] }
 0x258   : > { %v5473_v23 = vor.u32 %v6097_v63, %v5470_v11 }
 0x259   : > { %v7334_v49 = vpop.f32.mrf.mxu0  ;;  %3088 = vmatpush.bf16.msra.mxu3 %v5469_v35  ;;  %v1245_v35 = vunpack.c.h.b16 %v8707_v22 }
 0x25a   : > { %v2422_v60 = vpop.f32.mrf.mxu3  ;;  %3117 = vmatpush.bf16.msrb.mxu0 %v5473_v23 }
 0x25b   : > { %v7337_v27 = vadd.f32 %v2422_v60, %v2362_v40  ;;  %v1493_v11 = vpack.c.b16 %v6500_v15, %v1245_v35  ;;  %v2133_v35 = vadd.f32 %v6871_v36, %v7097_v32 }
 0x25c   : > { %v2302_v51 = vpop.f32.mrf.mxu1 }
 0x25d   : > { %v2303_v56 = vadd.f32 %v2302_v51, %v2242_v16  ;;  %v8711_v51 = vld [vmem:[#allocation32_spill] sm:$0xff] }
 0x25f   : > { %v2367_v47 = vpop.f32.mrf.mxu2  ;;  %v7346_v0 = vadd.f32 %v2363_v61, %v2303_v56  ;;  %v8708_v61 = vld [vmem:[#allocation29_spill] sm:$0xff] }
 0x260   : > { %v2124_v6 = vadd.f32 %v6871_v36, %v8708_v61  ;;  %v5460_v36 = vld [vmem:[%s8559_s8 + $0x10] sm:$0xf] }
 0x261   : > { %v7348_v18 = vpop.f32.mrf.mxu0 }
 0x262   : > { %v7350_v4 = vpop.f32.mrf.mxu3  ;;  %v2185_v60 = vadd.f32 %v8710_v44, %v2124_v6  ;;  %v8713_v6 = vld [vmem:[#allocation5_spill] sm:$0xff] }
 0x264   : > { %v2305_v38 = vpop.f32.mrf.mxu1  ;;  %2596 = vmatmul.bf16.gmra.mxu2 %v1492_v48  ;;  %v2246_v45 = vadd.f32 %v8711_v51, %v2185_v60 }
 0x265   : > { %v8712_v38 = vld [vmem:[#allocation35_spill] sm:$0xff] }
 0x267   : > { %v2370_v40 = vpop.f32.mrf.mxu2  ;;  %2530 = vmatmul.bf16.vlgmr.msra.gmra.mxu1 %v8709_v10  ;;  %v8714_v10 = vunpack.c.l.b16 %v8713_v6 }
 0x269   : > { %v2514_v37 = vpop.f32.mrf.mxu0  ;;  %v1471_v44 = vpack.c.b16 %v8714_v10, %v6459_v50 }
 0x26a   : > { %v2427_v16 = vpop.f32.mrf.mxu3 }
 0x26c   : > { %v2306_v8 = vpop.f32.mrf.mxu1 }
 0x26d   : > { %v2307_v56 = vadd.f32 %v2306_v8, %v2246_v45 }
 0x26f   : > { %v2372_v34 = vpop.f32.mrf.mxu2  ;;  %v7365_v63 = vadd.f32 %v2367_v47, %v2307_v56  ;;  %v8715_v56 = vld [vmem:[#allocation9_spill] sm:$0xff] }
 0x272   : > { %v7367_v48 = vpop.f32.mrf.mxu3 }
 0x274   : > { %v2309_v23 = vpop.f32.mrf.mxu1  ;;  %2600 = vmatmul.bf16.gmra.mxu2 %v1493_v11  ;;  %v8716_v11 = vld [vmem:[#allocation6_spill] sm:$0xff] }
 0x275   : > { %v2310_v61 = vadd.f32 %v2309_v23, %v8712_v38  ;;  %v8717_v23 = vunpack.c.l.b16 %v8716_v11 }
 0x277   : > { %v2374_v60 = vpop.f32.mrf.mxu2  ;;  %2535 = vmatmul.bf16.gmra.mxu1 %v1471_v44  ;;  %v2371_v37 = vadd.f32 %v2370_v40, %v2310_v61  ;;  %v1472_v38 = vpack.c.b16 %v6459_v50, %v8717_v23  ;;  %v2194_v61 = vadd.f32 %v7080_v3, %v2133_v35  ;;  %v6095_v35 = vld [vmem:[%s8559_s8 + $0x14] sm:$0xf] }
 0x279   : > { %v2255_v44 = vadd.f32 %v7106_v46, %v2194_v61 }
 0x27a   : > { %v2431_v16 = vpop.f32.mrf.mxu3 }
 0x27b   : > { %v7374_v22 = vadd.f32 %v2431_v16, %v2371_v37 }
 0x27c   : > { %v2311_v47 = vpop.f32.mrf.mxu1 }
 0x27f   : > { %v2376_v51 = vpop.f32.mrf.mxu2 }
 0x282   : > { %v2433_v45 = vpop.f32.mrf.mxu3 }
 0x283   : > { %v8718_v45 = vld [vmem:[#allocation13_spill] sm:$0xff] }
 0x284   : > { %v2313_v8 = vpop.f32.mrf.mxu1  ;;  %2604 = vmatmul.bf16.gmra.mxu2 %v8715_v56 }
 0x285   : > { %v2314_v34 = vadd.f32 %v2313_v8, %v7075_v9  ;;  %v6096_v9 = vld [vmem:[%s8559_s8 + $0x14] sm:$0xf0] }
 0x286   : > { %v5461_v47 = vor.u32 %v6096_v9, %v5460_v36  ;;  %v1249_v9 = vunpack.c.h.b16 %v8718_v45 }
 0x287   : > { %v2379_v6 = vpop.f32.mrf.mxu2  ;;  %2539 = vmatmul.bf16.gmra.mxu1 %v1472_v38  ;;  %v2375_v40 = vadd.f32 %v2374_v60, %v2314_v34  ;;  %v1248_v60 = vunpack.c.l.b16 %v8718_v45  ;;  %v5462_v34 = vld [vmem:[%s8559_s8 + $0x18] sm:$0xf0] }
 0x288   : > { %3089 = vmatpush.bf16.msra.mxu3 %v5461_v47  ;;  %v5465_v11 = vor.u32 %v6095_v35, %v5462_v34 }
 0x289   : > { %v1495_v56 = vpack.c.b16 %v1248_v60, %v6500_v15 }
 0x28a   : > { %v2435_v10 = vpop.f32.mrf.mxu3  ;;  %3118 = vmatpush.bf16.msrb.mxu0 %v5465_v11 }
 0x28b   : > { %v7385_v37 = vadd.f32 %v2435_v10, %v2375_v40  ;;  %v8719_v40 = vld [vmem:[#allocation8_spill] sm:$0xff] }
 0x28c   : > { %v2315_v16 = vpop.f32.mrf.mxu1 }
 0x28d   : > { %v2316_v32 = vadd.f32 %v2315_v16, %v2255_v44 }
 0x28f   : > { %v2380_v8 = vpop.f32.mrf.mxu2  ;;  %v7394_v3 = vadd.f32 %v2376_v51, %v2316_v32  ;;  %v6243_v51 = vld [vmem:[%s8556_s5] ss:$0 sm:$0xff] }
 0x290   : > { %v2137_v38 = vadd.f32 %v6243_v51, %v7116_v2  ;;  %v1496_v2 = vpack.c.b16 %v6500_v15, %v1249_v9  ;;  %v8723_v9 = vld [vmem:[#allocation11_spill] sm:$0xff] }
 0x292   : > { %v7396_v46 = vpop.f32.mrf.mxu3  ;;  %v2198_v61 = vadd.f32 %v7100_v28, %v2137_v38  ;;  %v8720_v28 = vld [vmem:[#allocation10_spill] sm:$0xff] }
 0x293   : > { %v8721_v34 = vunpack.c.l.b16 %v8720_v28  ;;  %v5454_v28 = vld [vmem:[%s8559_s8 + $0x8] sm:$0xf0] }
 0x294   : > { %v2318_v23 = vpop.f32.mrf.mxu1  ;;  %2609 = vmatmul.bf16.gmra.mxu2 %v1495_v56  ;;  %v2259_v44 = vadd.f32 %v7124_v42, %v2198_v61 }
 0x295   : > { %v1473_v42 = vpack.c.b16 %v8721_v34, %v6459_v50 }
 0x297   : > { %v2383_v6 = vpop.f32.mrf.mxu2  ;;  %2543 = vmatmul.bf16.gmra.mxu1 %v8719_v40 }
 0x29a   : > { %v2440_v10 = vpop.f32.mrf.mxu3 }
 0x29c   : > { %v2319_v16 = vpop.f32.mrf.mxu1 }
 0x29d   : > { %v2320_v36 = vadd.f32 %v2319_v16, %v2259_v44  ;;  %v8722_v44 = vld [vmem:[#allocation15_spill] sm:$0xff]  ;;  %v2146_v16 = vadd.f32 %v6243_v51, %v7192_v58 }
 0x29e   : > { %v6094_v58 = vld [vmem:[%s8559_s8 + $0x4] sm:$0xf0] }
 0x29f   : > { %v2385_v32 = vpop.f32.mrf.mxu2  ;;  %v7413_v47 = vadd.f32 %v2380_v8, %v2320_v36  ;;  %v2207_v34 = vadd.f32 %v7178_v7, %v2146_v16 }
 0x2a0   : > { %v8724_v32 = vunpack.c.l.b16 %v8723_v9 }
 0x2a2   : > { %v7415_v60 = vpop.f32.mrf.mxu3 }
 0x2a4   : > { %v2322_v56 = vpop.f32.mrf.mxu1  ;;  %2613 = vmatmul.bf16.gmra.mxu2 %v1496_v2  ;;  %v1474_v2 = vpack.c.b16 %v6459_v50, %v8724_v32 }
 0x2a5   : > { %v2323_v35 = vadd.f32 %v2322_v56, %v7145_v43  ;;  %v7426_v43 = vpop.f32.mrf.mxu0 }
 0x2a7   : > { %v2387_v11 = vpop.f32.mrf.mxu2  ;;  %2548 = vmatmul.bf16.gmra.mxu1 %v1473_v42  ;;  %v2384_v23 = vadd.f32 %v2383_v6, %v2323_v35  ;;  %v5452_v35 = vld [vmem:[%s8559_s8] sm:$0xf] }
 0x2a8   : > { %v5453_v51 = vor.u32 %v6094_v58, %v5452_v35  ;;  %v8726_v35 = vld [vmem:[#allocation14_spill] sm:$0xff] }
 0x2aa   : > { %v2444_v45 = vpop.f32.mrf.mxu3  ;;  %3090 = vmatpush.bf16.msra.mxu3 %v5453_v51 }
 0x2ab   : > { %v7422_v38 = vadd.f32 %v2444_v45, %v2384_v23  ;;  %v2268_v23 = vadd.f32 %v7199_v13, %v2207_v34 }
 0x2ac   : > { %v2324_v8 = vpop.f32.mrf.mxu1 }
 0x2ad   : > { %v6089_v8 = vld [vmem:[%s7448_s17] sm:$0xff] }
 0x2ae   : > { %5482 = vmatmul.msk.bf16.vlgmr.msra.gmra.mxu3 %vm691_vm0, %v6089_v8 }
 0x2af   : > { %v2389_v40 = vpop.f32.mrf.mxu2 }
 0x2b2   : > { %v2446_v61 = vpop.f32.mrf.mxu3 }
 0x2b4   : > { %v2326_v10 = vpop.f32.mrf.mxu1  ;;  %2617 = vmatmul.bf16.gmra.mxu2 %v8722_v44  ;;  %v2518_v44 = vpop.f32.mrf.mxu0 }
 0x2b5   : > { %v2327_v36 = vadd.f32 %v2326_v10, %v7176_v39  ;;  %v6093_v39 = vld [vmem:[%s8559_s8 + $0x4] sm:$0xf] }
 0x2b6   : > { %v5457_v42 = vor.u32 %v6093_v39, %v5454_v28  ;;  %v6090_v39 = vld [vmem:[%s7448_s17 + $0x8] sm:$0xff] }
 0x2b7   : > { %v2392_v6 = vpop.f32.mrf.mxu2  ;;  %2552 = vmatmul.bf16.gmra.mxu1 %v1474_v2  ;;  %v2388_v56 = vadd.f32 %v2387_v11, %v2327_v36  ;;  %v8725_v36 = vld [vmem:[#allocation20_spill] sm:$0xff] }
 0x2b8   : > { %3119 = vmatpush.bf16.msrb.mxu0 %v5457_v42  ;;  %v1252_v9 = vunpack.c.l.b16 %v8725_v36 }
 0x2ba   : > { %v2448_v11 = vpop.f32.mrf.mxu3  ;;  %v1498_v13 = vpack.c.b16 %v1252_v9, %v6500_v15 }
 0x2bb   : > { %v7452_v45 = vadd.f32 %v2448_v11, %v2388_v56  ;;  %5486 = vmatmul.msk.bf16.vlgmr.msrb.gmra.mxu0 %vm691_vm0, %v6089_v8 }
 0x2bc   : > { %v2328_v61 = vpop.f32.mrf.mxu1  ;;  %v2520_v6 = vpop.f32.mrf.mxu0 }
 0x2bd   : > { %v2329_v10 = vadd.f32 %v2328_v61, %v2268_v23 }
 0x2be   : > { %5483 = vmatmul.msk.bf16.gmra.mxu3 %vm691_vm0, %v6090_v39 }
 0x2bf   : > { %v2393_v7 = vpop.f32.mrf.mxu2  ;;  %v7458_v16 = vadd.f32 %v2389_v40, %v2329_v10  ;;  %v1253_v40 = vunpack.c.h.b16 %v8725_v36 }
 0x2c1   : > { %v1499_v23 = vpack.c.b16 %v6500_v15, %v1253_v40 }
 0x2c2   : > { %v7460_v32 = vpop.f32.mrf.mxu3 }
 0x2c4   : > { %v2331_v2 = vpop.f32.mrf.mxu1  ;;  %2622 = vmatmul.bf16.gmra.mxu2 %v1498_v13 }
 0x2c7   : > { %v2396_v56 = vpop.f32.mrf.mxu2  ;;  %2556 = vmatmul.bf16.gmra.mxu1 %v8726_v35  ;;  %v6091_v35 = vld [vmem:[%s7448_s17 + $0x10] sm:$0xff] }
 0x2ca   : > { %v2453_v58 = vpop.f32.mrf.mxu3 }
 0x2cb   : > { %5487 = vmatmul.msk.bf16.gmra.mxu0 %vm691_vm0, %v6090_v39  ;;  %v6116_v39 = vld [vmem:[%s8557_s6 + $0x74] sm:$0xf0] }
 0x2cc   : > { %v2332_v51 = vpop.f32.mrf.mxu1 }
 0x2cd   : > { %v2333_v28 = vadd.f32 %v2332_v51, %v7223_v33  ;;  %v8727_v33 = vld [vmem:[#allocation17_spill] sm:$0xff] }
 0x2ce   : > { %v8728_v10 = vunpack.c.l.b16 %v8727_v33  ;;  %5484 = vmatmul.msk.bf16.gmra.mxu3 %vm691_vm0, %v6091_v35  ;;  %v5542_v33 = vld [vmem:[%s8557_s6 + $0x68] sm:$0xf0] }
 0x2cf   : > { %v2398_v34 = vpop.f32.mrf.mxu2  ;;  %v7469_v42 = vadd.f32 %v2393_v7, %v2333_v28  ;;  %v5548_v7 = vld [vmem:[%s8557_s6 + $0x70] sm:$0xf]  ;;  %v5550_v28 = vld [vmem:[%s8557_s6 + $0x78] sm:$0xf0] }
 0x2d0   : > { %v1475_v9 = vpack.c.b16 %v8728_v10, %v6459_v50 }
 0x2d2   : > { %v7471_v11 = vpop.f32.mrf.mxu3 }
 0x2d4   : > { %v2335_v8 = vpop.f32.mrf.mxu1  ;;  %2626 = vmatmul.bf16.gmra.mxu2 %v1499_v23  ;;  %v5540_v23 = vld [vmem:[%s8557_s6 + $0x60] sm:$0xf] }
 0x2d5   : > { %v2336_v61 = vadd.f32 %v2335_v8, %v7238_v54  ;;  %v6115_v54 = vld [vmem:[%s8557_s6 + $0x74] sm:$0xf]  ;;  %v6113_v8 = vld [vmem:[%s8557_s6 + $0x64] sm:$0xf] }
 0x2d6   : > { %v5553_v40 = vor.u32 %v6115_v54, %v5550_v28  ;;  %v5545_v10 = vor.u32 %v6113_v8, %v5542_v33  ;;  %v8730_v54 = vld [vmem:[#allocation18_spill] sm:$0xff]  ;;  %v6110_v33 = vld [vmem:[%s8557_s6 + $0x44] sm:$0xf0] }
 0x2d7   : > { %2561 = vmatmul.bf16.gmra.mxu1 %v1475_v9  ;;  %v2592_v13 = vpop.f32.mrf.mxu2  ;;  %v2397_v36 = vadd.f32 %v2396_v56, %v2336_v61  ;;  %v5549_v56 = vor.u32 %v6116_v39, %v5548_v7 }
 0x2d8   : > { %3320 = vmatpush.bf16.msra.mxu0 %v5553_v40 }
 0x2d9   : > { %3291 = vmatpush.bf16.msrb.mxu3 %v5549_v56  ;;  %v8731_v56 = vunpack.c.l.b16 %v8730_v54 }
 0x2da   : > { %v2457_v2 = vpop.f32.mrf.mxu3 }
 0x2db   : > { %v2458_v6 = vadd.f32 %v2457_v2, %v2397_v36  ;;  %5488 = vmatmul.msk.bf16.gmra.mxu0 %vm691_vm0, %v6091_v35  ;;  %v2471_v36 = vadd.f32 %v7110_v52, %v7254_v25  ;;  %v5532_v2 = vld [vmem:[%s8557_s6 + $0x50] sm:$0xf]  ;;  %v6111_v35 = vld [vmem:[%s8557_s6 + $0x54] sm:$0xf]  ;;  %v5534_v52 = vld [vmem:[%s8557_s6 + $0x58] sm:$0xf0]  ;;  %v1476_v28 = vpack.c.b16 %v6459_v50, %v8731_v56 }
 0x2dc   : > { %v2337_v58 = vpop.f32.mrf.mxu1  ;;  %3321 = vmatpush.bf16.msra.mxu0 %v5545_v10  ;;  %v5537_v40 = vor.u32 %v6111_v35, %v5534_v52  ;;  %v6109_v10 = vld [vmem:[%s8557_s6 + $0x44] sm:$0xf]  ;;  %v6092_v35 = vld [vmem:[%s7448_s17 + $0x18] sm:$0xff] }
 0x2dd   : > { %v7488_v51 = vadd.f32 %v2518_v44, %v2458_v6  ;;  %v6114_v44 = vld [vmem:[%s8557_s6 + $0x64] sm:$0xf0]  ;;  %v6112_v6 = vld [vmem:[%s8557_s6 + $0x54] sm:$0xf0] }
 0x2de   : > { %v5541_v61 = vor.u32 %v6114_v44, %v5540_v23  ;;  %v8729_v58 = vld [vmem:[#allocation27_spill] sm:$0xff]  ;;  %v5533_v39 = vor.u32 %v6112_v6, %v5532_v2  ;;  %v2412_v23 = vadd.f32 %v7276_v62, %v7266_v1  ;;  %v7543_v6 = vsel %vm1146_vm6, %v7056_v21, %v6432_v29  ;;  %v5518_v21 = vld [vmem:[%s8557_s6 + $0x38] sm:$0xf0]  ;;  %5485 = vmatmul.msk.bf16.gmra.mxu3 %vm691_vm0, %v6092_v35 }
 0x2df   : > { %v2594_v34 = vpop.f32.mrf.mxu2  ;;  %v5526_v1 = vld [vmem:[%s8557_s6 + $0x48] sm:$0xf0] }
 0x2e0   : > { %3292 = vmatpush.bf16.msrb.mxu3 %v5541_v61  ;;  %v5524_v61 = vld [vmem:[%s8557_s6 + $0x40] sm:$0xf]  ;;  %3322 = vmatpush.bf16.msra.mxu0 %v5537_v40  ;;  %v2473_v2 = vadd.f32 %v7122_v26, %v2412_v23  ;;  %v6107_v26 = vld [vmem:[%s8557_s6 + $0x34] sm:$0xf] }
 0x2e1   : > { %v5521_v56 = vor.u32 %v6107_v26, %v5518_v21  ;;  %v6103_v26 = vld [vmem:[%s8557_s6 + $0x14] sm:$0xf]  ;;  %v5502_v21 = vld [vmem:[%s8557_s6 + $0x18] sm:$0xf0] }
 0x2e2   : > { %v2459_v9 = vpop.f32.mrf.mxu3 }
 0x2e3   : > { %v5525_v9 = vor.u32 %v6110_v33, %v5524_v61  ;;  %v6106_v61 = vld [vmem:[%s8557_s6 + $0x24] sm:$0xf0]  ;;  %v6105_v33 = vld [vmem:[%s8557_s6 + $0x24] sm:$0xf] }
 0x2e4   : > { %v2531_v7 = vpop.f32.mrf.mxu1  ;;  %2630 = vmatmul.bf16.gmra.mxu2 %v8729_v58  ;;  %3293 = vmatpush.bf16.msrb.mxu3 %v5533_v39  ;;  %v6108_v58 = vld [vmem:[%s8557_s6 + $0x34] sm:$0xf0] }
 0x2e5   : > { %v2532_v25 = vadd.f32 %v2531_v7, %v2471_v36  ;;  %v5516_v7 = vld [vmem:[%s8557_s6 + $0x30] sm:$0xf] }
 0x2e6   : > { %v5517_v52 = vor.u32 %v6108_v58, %v5516_v7  ;;  %v5500_v7 = vld [vmem:[%s8557_s6 + $0x10] sm:$0xf]  ;;  %v6104_v58 = vld [vmem:[%s8557_s6 + $0x14] sm:$0xf0] }
 0x2e7   : > { %v2593_v44 = vadd.f32 %v2592_v13, %v2532_v25  ;;  %2565 = vmatmul.bf16.gmra.mxu1 %v1476_v28  ;;  %v2597_v8 = vpop.f32.mrf.mxu2  ;;  %v5529_v13 = vor.u32 %v6109_v10, %v5526_v1  ;;  %v1308_v28 = vunpack.c.l.b16 %v7543_v6 }
 0x2e8   : > { %3294 = vmatpush.bf16.msrb.mxu3 %v5525_v9  ;;  %v5508_v8 = vld [vmem:[%s8557_s6 + $0x20] sm:$0xf] }
 0x2e9   : > { %v2644_v62 = vmax.f32 %v2593_v44, 0.0  ;;  %3323 = vmatpush.bf16.msra.mxu0 %v5529_v13  ;;  %v5509_v10 = vor.u32 %v6106_v61, %v5508_v8  ;;  %v1501_v13 = vpack.c.b16 %v1308_v28, %v6500_v15  ;;  %v5505_v28 = vor.u32 %v6103_v26, %v5502_v21 }
 0x2ea   : > { %v2416_v8 = vadd.f32 %v7312_v57, %v7308_v41 }
 0x2eb   : > { %v2660_v36 = vpack.c.bf16 %v2644_v62, %v2644_v62  ;;  %5489 = vmatmul.msk.bf16.gmra.mxu0 %vm691_vm0, %v6092_v35 }
 0x2ec   : > { %v2533_v39 = vpop.f32.mrf.mxu1  ;;  %3295 = vmatpush.bf16.msrb.mxu3 %v5517_v52  ;;  %v5501_v52 = vor.u32 %v6104_v58, %v5500_v7 }
 0x2ed   : > { %v2684_v25 = vunpack.c.l.b16 %v2660_v36  ;;  %v2534_v54 = vadd.f32 %v2533_v39, %v2473_v2  ;;  %3324 = vmatpush.bf16.msra.mxu0 %v5521_v56 }
 0x2ef   : > { %v2692_v40 = vpack.c.b16 %v2684_v25, %v2684_v25  ;;  %v2595_v23 = vadd.f32 %v2594_v34, %v2534_v54  ;;  %v2598_v44 = vpop.f32.mrf.mxu2  ;;  %v5510_v34 = vld [vmem:[%s8557_s6 + $0x28] sm:$0xf0] }
 0x2f0   : > { %v5513_v62 = vor.u32 %v6105_v33, %v5510_v34  ;;  %3296 = vmatpush.bf16.msrb.mxu3 %v5509_v10  ;;  %v6102_v34 = vld [vmem:[%s8557_s6 + $0x4] sm:$0xf0] }
 0x2f1   : > { %v2701_v9 = vshll.u32 %v2692_v40, 16  ;;  %v2645_v1 = vmax.f32 %v2595_v23, 0.0  ;;  %v2740_v25 = vrot.slane %v2692_v40, 1  ;;  %v8734_v40 = vld [vmem:[#allocation23_spill] sm:$0xff] }
 0x2f2   : > { %3325 = vmatpush.bf16.msra.mxu0 %v5513_v62  ;;  %v5494_v62 = vld [vmem:[%s8557_s6 + $0x8] sm:$0xf0] }
 0x2f3   : > { %v2703_v2 = vrot.slane %v2701_v9, 1  ;;  %v2661_v35 = vpack.c.bf16 %v2645_v1, %v2645_v1  ;;  %v6101_v1 = vld [vmem:[%s8557_s6 + $0x4] sm:$0xf]  ;;  %v2748_v41 = vrot.slane %v2701_v9, 2 }
 0x2f4   : > { %v2536_v39 = vpop.f32.mrf.mxu1  ;;  %2635 = vmatmul.bf16.gmra.mxu2 %v1501_v13  ;;  %3297 = vmatpush.bf16.msrb.mxu3 %v5501_v52  ;;  %v2477_v52 = vadd.f32 %v7153_v20, %v2416_v8 }
 0x2f5   : > { %v2852_v54 = vsel %vm6504_vm7, %v2660_v36, %v2703_v2  ;;  %v2772_v56 = vunpack.c.l.b16 %v2661_v35  ;;  %v5492_v36 = vld [vmem:[%s8557_s6] sm:$0xf]  ;;  %v5497_v35 = vor.u32 %v6101_v1, %v5494_v62 }
 0x2f6   : > { %v2863_v61 = vsel %vm1127_vm5, %v2852_v54, %v2740_v25  ;;  %3326 = vmatpush.bf16.msra.mxu0 %v5505_v28  ;;  %v5493_v57 = vor.u32 %v6102_v34, %v5492_v36  ;;  %v1309_v28 = vunpack.c.h.b16 %v7543_v6 }
 0x2f7   : > { %v2780_v33 = vpack.c.b16 %v2772_v56, %v2772_v56  ;;  %2569 = vmatmul.bf16.gmra.mxu1 %v8734_v40  ;;  %v2601_v10 = vpop.f32.mrf.mxu2  ;;  %v2896_v7 = vsel %vm7590_vm10, %v2863_v61, %v2748_v41 }
 0x2f8   : > { %3298 = vmatpush.bf16.msrb.mxu3 %v5493_v57  ;;  %v1502_v20 = vpack.c.b16 %v6500_v15, %v1309_v28 }
 0x2f9   : > { %v2788_v13 = vrot.slane %v2780_v33, 6  ;;  %v2797_v2 = vshll.u32 %v2780_v33, 16  ;;  %v2836_v26 = vrot.slane %v2780_v33, 7  ;;  %v2480_v33 = vadd.f32 %v7172_v59, %v7322_v30 }
 0x2fa   : > { %3327 = vmatpush.bf16.msra.mxu0 %v5497_v35 }
 0x2fb   : > { %v2799_v39 = vrot.slane %v2797_v2, 7  ;;  %v2907_v9 = vsel %vm2893_vm9, %v2896_v7, %v2788_v13  ;;  %v8738_v13 = vld [vmem:[#allocation31_spill] sm:$0xff] }
 0x2fc   : > { %v2537_v21 = vpop.f32.mrf.mxu1  ;;  %v8739_v35 = vunpack.c.l.b16 %v8738_v13  ;;  %v8740_v13 = vld [vmem:[#allocation34_spill] sm:$0xff] }
 0x2fd   : > { %v2940_v25 = vsel %vm7614_vm13, %v2907_v9, %v2799_v39  ;;  %v2538_v54 = vadd.f32 %v2537_v21, %v2477_v52 }
 0x2fe   : > { %v2951_v56 = vsel %vm2937_vm11, %v2940_v25, %v2836_v26  ;;  %v1477_v6 = vpack.c.b16 %v8739_v35, %v6459_v50  ;;  %v8741_v35 = vunpack.c.l.b16 %v8740_v13 }
 0x2ff   : > { %v2599_v61 = vadd.f32 %v2598_v44, %v2538_v54  ;;  %v2603_v40 = vpop.f32.mrf.mxu2  ;;  %v2981_v34 = vsel %vm6474_vm3, %v2951_v56, %v2797_v2 }
 0x301   : > { %v2646_v1 = vmax.f32 %v2599_v61, 0.0 }
 0x303   : > { %v2662_v8 = vpack.c.bf16 %v2646_v1, %v2646_v1 }
 0x304   : > { %v2540_v41 = vpop.f32.mrf.mxu1  ;;  %2639 = vmatmul.bf16.gmra.mxu2 %v1502_v20 }
 0x305   : > { %v2685_v57 = vunpack.c.l.b16 %v2662_v8  ;;  %v2541_v62 = vadd.f32 %v2540_v41, %v2480_v33  ;;  %v2484_v33 = vadd.f32 %v7186_v55, %v7337_v27 }
 0x307   : > { %v2693_v44 = vpack.c.b16 %v2685_v57, %v2685_v57  ;;  %v2602_v7 = vadd.f32 %v2601_v10, %v2541_v62  ;;  %2574 = vmatmul.bf16.gmra.mxu1 %v1477_v6  ;;  %v2605_v39 = vpop.f32.mrf.mxu2  ;;  %v1478_v6 = vpack.c.b16 %v6459_v50, %v8741_v35 }
 0x309   : > { %v2705_v2 = vshll.u32 %v2693_v44, 16  ;;  %v2647_v9 = vmax.f32 %v2602_v7, 0.0  ;;  %v2741_v21 = vrot.slane %v2693_v44, 1  ;;  %v2425_v7 = vadd.f32 %v7350_v4, %v7346_v0 }
 0x30b   : > { %v2707_v52 = vrot.slane %v2705_v2, 1  ;;  %v2663_v15 = vpack.c.bf16 %v2647_v9, %v2647_v9  ;;  %v2749_v28 = vrot.slane %v2705_v2, 2 }
 0x30c   : > { %v2542_v26 = vpop.f32.mrf.mxu1 }
 0x30d   : > { %v2853_v59 = vsel %vm6504_vm7, %v2662_v8, %v2707_v52  ;;  %v2773_v30 = vunpack.c.l.b16 %v2663_v15  ;;  %v3195_v52 = vunpack.c.l.b16 %v2981_v34 }
 0x30e   : > { %v2867_v25 = vsel %vm1127_vm5, %v2853_v59, %v2741_v21  ;;  %v2486_v59 = vadd.f32 %v7197_v19, %v2425_v7  ;;  %v2429_v19 = vadd.f32 %v7367_v48, %v7365_v63 }
 0x30f   : > { %v2781_v54 = vpack.c.b16 %v2773_v30, %v2773_v30  ;;  %v2607_v56 = vpop.f32.mrf.mxu2  ;;  %v2897_v10 = vsel %vm7590_vm10, %v2867_v25, %v2749_v28 }
 0x311   : > { %v2789_v61 = vrot.slane %v2781_v54, 6  ;;  %v2801_v40 = vshll.u32 %v2781_v54, 16  ;;  %v2837_v41 = vrot.slane %v2781_v54, 7 }
 0x313   : > { %v2803_v1 = vrot.slane %v2801_v40, 7  ;;  %v2911_v20 = vsel %vm2893_vm9, %v2897_v10, %v2789_v61 }
 0x314   : > { %v2544_v57 = vpop.f32.mrf.mxu1 }
 0x315   : > { %v2941_v8 = vsel %vm7614_vm13, %v2911_v20, %v2803_v1  ;;  %v2545_v62 = vadd.f32 %v2544_v57, %v2484_v33 }
 0x316   : > { %v2955_v44 = vsel %vm2937_vm11, %v2941_v8, %v2837_v41 }
 0x317   : > { %v2982_v2 = vsel %vm6474_vm3, %v2955_v44, %v2801_v40  ;;  %v2606_v9 = vadd.f32 %v2605_v39, %v2545_v62  ;;  %2578 = vmatmul.bf16.gmra.mxu1 %v1478_v6  ;;  %v2610_v55 = vpop.f32.mrf.mxu2  ;;  %v2490_v6 = vadd.f32 %v7218_v53, %v2429_v19  ;;  %v2493_v53 = vadd.f32 %v7234_v14, %v7374_v22 }
 0x318   : > { %v3196_v27 = vunpack.c.l.b16 %v2982_v2 }
 0x319   : > { %v2648_v15 = vmax.f32 %v2606_v9, 0.0 }
 0x31a   : > { %v3203_v26 = vpack.c.b16 %v3196_v27, %v3195_v52 }
 0x31b   : > { %v2664_v21 = vpack.c.bf16 %v2648_v15, %v2648_v15 }
 0x31c   : > { %v2546_v30 = vpop.f32.mrf.mxu1  ;;  %3299 = vmatmul.bf16.vlgmr.msrb.gmra.mxu3 %v3203_v26  ;;  %3328 = vmatmul.bf16.vlgmr.msra.gmra.mxu0 %v3203_v26 }
 0x31d   : > { %v2686_v50 = vunpack.c.l.b16 %v2664_v21  ;;  %v2547_v25 = vadd.f32 %v2546_v30, %v2486_v59 }
 0x31f   : > { %v2694_v54 = vpack.c.b16 %v2686_v50, %v2686_v50  ;;  %v2608_v0 = vadd.f32 %v2607_v56, %v2547_v25  ;;  %v2611_v4 = vpop.f32.mrf.mxu2 }
 0x321   : > { %v2709_v28 = vshll.u32 %v2694_v54, 16  ;;  %v2649_v61 = vmax.f32 %v2608_v0, 0.0  ;;  %v2742_v1 = vrot.slane %v2694_v54, 1 }
 0x323   : > { %v2711_v39 = vrot.slane %v2709_v28, 1  ;;  %v2665_v40 = vpack.c.bf16 %v2649_v61, %v2649_v61  ;;  %v2750_v8 = vrot.slane %v2709_v28, 2 }
 0x324   : > { %v2549_v10 = vpop.f32.mrf.mxu1 }
 0x325   : > { %v2854_v34 = vsel %vm6504_vm7, %v2664_v21, %v2711_v39  ;;  %v2774_v20 = vunpack.c.l.b16 %v2665_v40 }
 0x326   : > { %v2871_v33 = vsel %vm1127_vm5, %v2854_v34, %v2742_v1 }
 0x327   : > { %v2782_v41 = vpack.c.b16 %v2774_v20, %v2774_v20  ;;  %v2614_v57 = vpop.f32.mrf.mxu2  ;;  %v2898_v13 = vsel %vm7590_vm10, %v2871_v33, %v2750_v8 }
 0x329   : > { %v2790_v56 = vrot.slane %v2782_v41, 6  ;;  %v2805_v62 = vshll.u32 %v2782_v41, 16  ;;  %v2838_v7 = vrot.slane %v2782_v41, 7 }
 0x32b   : > { %v2807_v35 = vrot.slane %v2805_v62, 7  ;;  %v2915_v44 = vsel %vm2893_vm9, %v2898_v13, %v2790_v56 }
 0x32c   : > { %v2550_v2 = vpop.f32.mrf.mxu1 }
 0x32d   : > { %v2551_v9 = vadd.f32 %v2550_v2, %v2490_v6  ;;  %v2942_v63 = vsel %vm7614_vm13, %v2915_v44, %v2807_v35 }
 0x32e   : > { %v2959_v48 = vsel %vm2937_vm11, %v2942_v63, %v2838_v7 }
 0x32f   : > { %v2612_v55 = vadd.f32 %v2611_v4, %v2551_v9  ;;  %v2616_v27 = vpop.f32.mrf.mxu2  ;;  %v2983_v52 = vsel %vm6474_vm3, %v2959_v48, %v2805_v62  ;;  %v2497_v62 = vadd.f32 %v7251_v24, %v7385_v37  ;;  %v2438_v9 = vadd.f32 %v7396_v46, %v7394_v3  ;;  %v3005_v37 = vld [vmem:[%s8560_s9] sm:$0x3] }
 0x330   : > { %v3197_v27 = vunpack.c.l.b16 %v2983_v52  ;;  %v7690_v46 = vperm.slane %v3005_v37, 1 }
 0x331   : > { %v2650_v15 = vmax.f32 %v2612_v55, 0.0  ;;  %v3092_v33 = vpop.f32.mrf.mxu3  ;;  %v2499_v3 = vadd.f32 %v7274_v5, %v2438_v9 }
 0x333   : > { %v2666_v26 = vpack.c.bf16 %v2650_v15, %v2650_v15 }
 0x334   : > { %v2553_v21 = vpop.f32.mrf.mxu1 }
 0x335   : > { %v2687_v59 = vunpack.c.l.b16 %v2666_v26  ;;  %v2554_v30 = vadd.f32 %v2553_v21, %v2493_v53 }
 0x337   : > { %v2695_v50 = vpack.c.b16 %v2687_v59, %v2687_v59  ;;  %v2615_v25 = vadd.f32 %v2614_v57, %v2554_v30  ;;  %v2618_v54 = vpop.f32.mrf.mxu2 }
 0x338   : > { %v3121_v22 = vpop.f32.mrf.mxu0 }
 0x339   : > { %v2713_v0 = vshll.u32 %v2695_v50, 16  ;;  %v2651_v28 = vmax.f32 %v2615_v25, 0.0  ;;  %v2743_v40 = vrot.slane %v2695_v50, 1  ;;  %v7687_v53 = vpop.f32.mrf.mxu3 }
 0x33b   : > { %v2715_v61 = vrot.slane %v2713_v0, 1  ;;  %v2667_v39 = vpack.c.bf16 %v2651_v28, %v2651_v28  ;;  %v2751_v19 = vrot.slane %v2713_v0, 2  ;;  %v3122_v28 = vadd.f32 %v3121_v22, %v7690_v46 }
 0x33c   : > { %v2555_v4 = vpop.f32.mrf.mxu1 }
 0x33d   : > { %v2855_v10 = vsel %vm6504_vm7, %v2666_v26, %v2715_v61  ;;  %v2775_v1 = vunpack.c.l.b16 %v2667_v39  ;;  %v7693_v61 = vperm.slane %v3005_v37, 0 }
 0x33e   : > { %v2875_v34 = vsel %vm1127_vm5, %v2855_v10, %v2743_v40 }
 0x33f   : > { %v2783_v20 = vpack.c.b16 %v2775_v1, %v2775_v1  ;;  %v2620_v14 = vpop.f32.mrf.mxu2  ;;  %v2899_v8 = vsel %vm7590_vm10, %v2875_v34, %v2751_v19  ;;  %v3093_v40 = vadd.f32 %v3092_v33, %v7693_v61  ;;  %v2442_v33 = vadd.f32 %v7415_v60, %v7413_v47 }
 0x340   : > { %v7685_v26 = vpop.f32.mrf.mxu0 }
 0x341   : > { %v2791_v41 = vrot.slane %v2783_v20, 6  ;;  %v2809_v57 = vshll.u32 %v2783_v20, 16  ;;  %v2839_v35 = vrot.slane %v2783_v20, 7  ;;  %v7696_v1 = vpack.c.bf16 %v3122_v28, %v3093_v40  ;;  %v3097_v20 = vpop.f32.mrf.mxu3 }
 0x343   : > { %v2811_v56 = vrot.slane %v2809_v57, 7  ;;  %v2919_v13 = vsel %vm2893_vm9, %v2899_v8, %v2791_v41  ;;  %v3149_v58 = vunpack.c.l.bf16 %v7696_v1 }
 0x344   : > { %v2557_v6 = vpop.f32.mrf.mxu1 }
 0x345   : > { %v2558_v44 = vadd.f32 %v2557_v6, %v2497_v62  ;;  %v2943_v7 = vsel %vm7614_vm13, %v2919_v13, %v2811_v56 }
 0x346   : > { %v2963_v2 = vsel %vm2937_vm11, %v2943_v7, %v2839_v35 }
 0x347   : > { %v2619_v63 = vadd.f32 %v2618_v54, %v2558_v44  ;;  %v2623_v48 = vpop.f32.mrf.mxu2  ;;  %v2984_v55 = vsel %vm6474_vm3, %v2963_v2, %v2809_v57 }
 0x348   : > { %v3198_v24 = vunpack.c.l.b16 %v2984_v55  ;;  %v3126_v34 = vpop.f32.mrf.mxu0 }
 0x349   : > { %v2652_v15 = vmax.f32 %v2619_v63, 0.0  ;;  %v3127_v41 = vadd.f32 %v3126_v34, %v7690_v46  ;;  %v2503_v63 = vadd.f32 %v7310_v31, %v2442_v33 }
 0x34a   : > { %v3204_v21 = vpack.c.b16 %v3198_v24, %v3197_v27 }
 0x34b   : > { %v2668_v59 = vpack.c.bf16 %v2652_v15, %v2652_v15 }
 0x34c   : > { %v2559_v30 = vpop.f32.mrf.mxu1  ;;  %3304 = vmatmul.bf16.gmra.mxu3 %v3204_v21  ;;  %3333 = vmatmul.bf16.gmra.mxu0 %v3204_v21 }
 0x34d   : > { %v2688_v52 = vunpack.c.l.b16 %v2668_v59  ;;  %v2560_v50 = vadd.f32 %v2559_v30, %v2499_v3  ;;  %v7718_v3 = vpop.f32.mrf.mxu3 }
 0x34f   : > { %v2696_v25 = vpack.c.b16 %v2688_v52, %v2688_v52  ;;  %v2621_v54 = vadd.f32 %v2620_v14, %v2560_v50  ;;  %v2624_v0 = vpop.f32.mrf.mxu2  ;;  %v3098_v14 = vadd.f32 %v3097_v20, %v7693_v61  ;;  %v2506_v52 = vadd.f32 %v7320_v12, %v7422_v38 }
 0x350   : > { %v7713_v60 = vpop.f32.mrf.mxu0 }
 0x351   : > { %v2717_v39 = vshll.u32 %v2696_v25, 16  ;;  %v2653_v4 = vmax.f32 %v2621_v54, 0.0  ;;  %v2744_v57 = vrot.slane %v2696_v25, 1  ;;  %v7702_v56 = vpack.c.bf16 %v3127_v41, %v3098_v14 }
 0x353   : > { %v2719_v10 = vrot.slane %v2717_v39, 1  ;;  %v2669_v5 = vpack.c.bf16 %v2653_v4, %v2653_v4  ;;  %v2752_v6 = vrot.slane %v2717_v39, 2 }
 0x354   : > { %v2562_v19 = vpop.f32.mrf.mxu1 }
 0x355   : > { %v2856_v22 = vsel %vm6504_vm7, %v2668_v59, %v2719_v10  ;;  %v2776_v8 = vunpack.c.l.b16 %v2669_v5  ;;  %v3102_v34 = vpop.f32.mrf.mxu3 }
 0x356   : > { %v2879_v62 = vsel %vm1127_vm5, %v2856_v22, %v2744_v57  ;;  %v3103_v41 = vadd.f32 %v3102_v34, %v7693_v61 }
 0x357   : > { %v2784_v13 = vpack.c.b16 %v2776_v8, %v2776_v8  ;;  %v2627_v35 = vpop.f32.mrf.mxu2  ;;  %v2900_v2 = vsel %vm7590_vm10, %v2879_v62, %v2752_v6 }
 0x358   : > { %v3131_v40 = vpop.f32.mrf.mxu0 }
 0x359   : > { %v2792_v44 = vrot.slane %v2784_v13, 6  ;;  %v2813_v7 = vshll.u32 %v2784_v13, 16  ;;  %v2840_v55 = vrot.slane %v2784_v13, 7  ;;  %v3132_v5 = vadd.f32 %v3131_v40, %v7690_v46 }
 0x35b   : > { %v2815_v9 = vrot.slane %v2813_v7, 7  ;;  %v2923_v48 = vsel %vm2893_vm9, %v2900_v2, %v2792_v44  ;;  %v7726_v22 = vpack.c.bf16 %v3132_v5, %v3103_v41 }
 0x35c   : > { %v2563_v27 = vpop.f32.mrf.mxu1 }
 0x35d   : > { %v2564_v24 = vadd.f32 %v2563_v27, %v2503_v63  ;;  %v2944_v47 = vsel %vm7614_vm13, %v2923_v48, %v2815_v9  ;;  %v2510_v9 = vadd.f32 %v7334_v49, %v7452_v45  ;;  %v7736_v27 = vpop.f32.mrf.mxu3 }
 0x35e   : > { %v2967_v37 = vsel %vm2937_vm11, %v2944_v47, %v2840_v55 }
 0x35f   : > { %v2625_v15 = vadd.f32 %v2624_v0, %v2564_v24  ;;  %v2629_v21 = vpop.f32.mrf.mxu2  ;;  %v2985_v59 = vsel %vm6474_vm3, %v2967_v37, %v2813_v7 }
 0x360   : > { %v7731_v7 = vpop.f32.mrf.mxu0  ;;  %v3199_v45 = vunpack.c.l.b16 %v2985_v59 }
 0x361   : > { %v2654_v31 = vmax.f32 %v2625_v15, 0.0  ;;  %v2451_v15 = vadd.f32 %v7460_v32, %v7458_v16  ;;  %v6124_v16 = vld [vmem:[%s8561_s10 + $0x38] sm:$0xff] }
 0x362   : > { %v6132_v32 = vld [vmem:[%s8561_s10 + $0x78] sm:$0xff]  ;;  %3561 = vmatpush.bf16.msra.mxu3 %v6124_v16 }
 0x363   : > { %v2670_v30 = vpack.c.bf16 %v2654_v31, %v2654_v31  ;;  %3590 = vmatpush.bf16.msrb.mxu0 %v6132_v32 }
 0x364   : > { %v2566_v50 = vpop.f32.mrf.mxu1 }
 0x365   : > { %v2689_v25 = vunpack.c.l.b16 %v2670_v30  ;;  %v2567_v54 = vadd.f32 %v2566_v50, %v2506_v52 }
 0x367   : > { %v2697_v28 = vpack.c.b16 %v2689_v25, %v2689_v25  ;;  %v2628_v39 = vadd.f32 %v2627_v35, %v2567_v54  ;;  %v2631_v4 = vpop.f32.mrf.mxu2  ;;  %v2512_v54 = vadd.f32 %v7348_v18, %v2451_v15 }
 0x369   : > { %v2721_v10 = vshll.u32 %v2697_v28, 16  ;;  %v2655_v0 = vmax.f32 %v2628_v39, 0.0  ;;  %v2745_v57 = vrot.slane %v2697_v28, 1  ;;  %v3136_v39 = vpop.f32.mrf.mxu0 }
 0x36a   : > { %v3137_v40 = vadd.f32 %v3136_v39, %v7690_v46 }
 0x36b   : > { %v2723_v20 = vrot.slane %v2721_v10, 1  ;;  %v2671_v19 = vpack.c.bf16 %v2655_v0, %v2655_v0  ;;  %v2753_v13 = vrot.slane %v2721_v10, 2  ;;  %v3107_v10 = vpop.f32.mrf.mxu3 }
 0x36c   : > { %v2568_v14 = vpop.f32.mrf.mxu1  ;;  %v3108_v34 = vadd.f32 %v3107_v10, %v7693_v61  ;;  %v6126_v10 = vld [vmem:[%s8561_s10 + $0x48] sm:$0xff] }
 0x36d   : > { %v2857_v12 = vsel %vm6504_vm7, %v2670_v30, %v2723_v20  ;;  %v2777_v38 = vunpack.c.l.b16 %v2671_v19  ;;  %v6123_v20 = vld [vmem:[%s8561_s10 + $0x30] sm:$0xff] }
 0x36e   : > { %v2883_v8 = vsel %vm1127_vm5, %v2857_v12, %v2745_v57  ;;  %v6131_v19 = vld [vmem:[%s8561_s10 + $0x70] sm:$0xff]  ;;  %v7760_v57 = vpack.c.bf16 %v3137_v40, %v3108_v34  ;;  %3562 = vmatpush.bf16.msra.mxu3 %v6123_v20  ;;  %v6118_v40 = vld [vmem:[%s8561_s10 + $0x8] sm:$0xff] }
 0x36f   : > { %v2785_v33 = vpack.c.b16 %v2777_v38, %v2777_v38  ;;  %v2633_v62 = vpop.f32.mrf.mxu2  ;;  %v2901_v44 = vsel %vm7590_vm10, %v2883_v8, %v2753_v13  ;;  %3591 = vmatpush.bf16.msrb.mxu0 %v6131_v19  ;;  %v6117_v19 = vld [vmem:[%s8561_s10] sm:$0xff] }
 0x371   : > { %v2793_v35 = vrot.slane %v2785_v33, 6  ;;  %v2817_v6 = vshll.u32 %v2785_v33, 16  ;;  %v2841_v48 = vrot.slane %v2785_v33, 7  ;;  %v6122_v33 = vld [vmem:[%s8561_s10 + $0x28] sm:$0xff] }
 0x372   : > { %3563 = vmatpush.bf16.msra.mxu3 %v6122_v33 }
 0x373   : > { %v2819_v2 = vrot.slane %v2817_v6, 7  ;;  %v2927_v63 = vsel %vm2893_vm9, %v2901_v44, %v2793_v35  ;;  %v2455_v44 = vadd.f32 %v7471_v11, %v7469_v42  ;;  %v7814_v20 = vpop.f32.mrf.mxu3 }
 0x374   : > { %v2570_v55 = vpop.f32.mrf.mxu1 }
 0x375   : > { %v2571_v24 = vadd.f32 %v2570_v55, %v2510_v9  ;;  %v2945_v47 = vsel %vm7614_vm13, %v2927_v63, %v2819_v2  ;;  %v6121_v55 = vld [vmem:[%s8561_s10 + $0x20] sm:$0xff]  ;;  %v2516_v11 = vadd.f32 %v7426_v43, %v2455_v44  ;;  %v6140_v43 = vld [vmem:[%s8563_s12 + $0x38] sm:$0xff] }
 0x376   : > { %v2971_v37 = vsel %vm2937_vm11, %v2945_v47, %v2841_v48  ;;  %3564 = vmatpush.bf16.msra.mxu3 %v6121_v55  ;;  %4339 = vmatpush.bf16.msrb.mxu1 %v6140_v43 }
 0x377   : > { %v2632_v21 = vadd.f32 %v2631_v4, %v2571_v24  ;;  %v2636_v31 = vpop.f32.mrf.mxu2  ;;  %v2986_v49 = vsel %vm6474_vm3, %v2971_v37, %v2817_v6  ;;  %v6129_v24 = vld [vmem:[%s8561_s10 + $0x60] sm:$0xff] }
 0x378   : > { %v3200_v30 = vunpack.c.l.b16 %v2986_v49 }
 0x379   : > { %v2656_v52 = vmax.f32 %v2632_v21, 0.0 }
 0x37a   : > { %v3205_v50 = vpack.c.b16 %v3200_v30, %v3199_v45  ;;  %v6120_v45 = vld [vmem:[%s8561_s10 + $0x18] sm:$0xff] }
 0x37b   : > { %v2672_v25 = vpack.c.bf16 %v2656_v52, %v2656_v52  ;;  %v6128_v30 = vld [vmem:[%s8561_s10 + $0x58] sm:$0xff]  ;;  %3565 = vmatpush.bf16.msra.mxu3 %v6120_v45 }
 0x37c   : > { %v2572_v28 = vpop.f32.mrf.mxu1  ;;  %3309 = vmatmul.bf16.gmra.mxu3 %v3205_v50  ;;  %3338 = vmatmul.bf16.gmra.mxu0 %v3205_v50 }
 0x37d   : > { %v2690_v4 = vunpack.c.l.b16 %v2672_v25  ;;  %v2573_v59 = vadd.f32 %v2572_v28, %v2512_v54  ;;  %v6119_v54 = vld [vmem:[%s8561_s10 + $0x10] sm:$0xff] }
 0x37e   : > { %v6127_v28 = vld [vmem:[%s8561_s10 + $0x50] sm:$0xff] }
 0x37f   : > { %v2698_v18 = vpack.c.b16 %v2690_v4, %v2690_v4  ;;  %v2634_v0 = vadd.f32 %v2633_v62, %v2573_v59  ;;  %v2637_v5 = vpop.f32.mrf.mxu2  ;;  %v6130_v62 = vld [vmem:[%s8561_s10 + $0x68] sm:$0xff]  ;;  %v7805_v59 = vpop.f32.mrf.mxu0  ;;  %3566 = vmatpush.bf16.msra.mxu3 %v6119_v54 }
 0x380   : > { %3592 = vmatpush.bf16.msrb.mxu0 %v6130_v62 }
 0x381   : > { %v2725_v41 = vshll.u32 %v2698_v18, 16  ;;  %v2657_v14 = vmax.f32 %v2634_v0, 0.0  ;;  %v2746_v13 = vrot.slane %v2698_v18, 1 }
 0x383   : > { %v2727_v12 = vrot.slane %v2725_v41, 1  ;;  %v2673_v38 = vpack.c.bf16 %v2657_v14, %v2657_v14  ;;  %v2754_v48 = vrot.slane %v2725_v41, 2  ;;  %3567 = vmatpush.bf16.msra.mxu3 %v6118_v40  ;;  %v6125_v41 = vld [vmem:[%s8561_s10 + $0x40] sm:$0xff] }
 0x384   : > { %v2575_v8 = vpop.f32.mrf.mxu1  ;;  %3593 = vmatpush.bf16.msrb.mxu0 %v6129_v24 }
 0x385   : > { %v2858_v35 = vsel %vm6504_vm7, %v2672_v25, %v2727_v12  ;;  %v2778_v6 = vunpack.c.l.b16 %v2673_v38 }
 0x386   : > { %v2887_v2 = vsel %vm1127_vm5, %v2858_v35, %v2746_v13  ;;  %v6139_v35 = vld [vmem:[%s8563_s12 + $0x30] sm:$0xff] }
 0x387   : > { %v2786_v9 = vpack.c.b16 %v2778_v6, %v2778_v6  ;;  %v2640_v63 = vpop.f32.mrf.mxu2  ;;  %v2902_v15 = vsel %vm7590_vm10, %v2887_v2, %v2754_v48  ;;  %3568 = vmatpush.bf16.msra.mxu3 %v6117_v19  ;;  %4340 = vmatpush.bf16.msrb.mxu1 %v6139_v35 }
 0x388   : > { %3594 = vmatpush.bf16.msrb.mxu0 %v6128_v30 }
 0x389   : > { %v2794_v47 = vrot.slane %v2786_v9, 6  ;;  %v2821_v37 = vshll.u32 %v2786_v9, 16  ;;  %v2842_v31 = vrot.slane %v2786_v9, 7  ;;  %v3124_v9 = vadd.f32 %v7685_v26, %v7690_v46 }
 0x38b   : > { %v2823_v42 = vrot.slane %v2821_v37, 7  ;;  %v2931_v21 = vsel %vm2893_vm9, %v2902_v15, %v2794_v47 }
 0x38c   : > { %v2576_v49 = vpop.f32.mrf.mxu1  ;;  %3595 = vmatpush.bf16.msrb.mxu0 %v6127_v28 }
 0x38d   : > { %v2577_v52 = vadd.f32 %v2576_v49, %v2516_v11  ;;  %v2946_v50 = vsel %vm7614_vm13, %v2931_v21, %v2823_v42 }
 0x38e   : > { %v2975_v25 = vsel %vm2937_vm11, %v2946_v50, %v2842_v31  ;;  %v3181_v31 = vld [vmem:[%s8558_s7] sm:$0x3] }
 0x38f   : > { %v2638_v39 = vadd.f32 %v2637_v5, %v2577_v52  ;;  %v2642_v16 = vpop.f32.mrf.mxu2  ;;  %v7803_v32 = vsel %vm6474_vm3, %v2975_v25, %v2821_v37  ;;  %v7842_v52 = vperm.slane %v3181_v31, 1 }
 0x390   : > { %3596 = vmatpush.bf16.msrb.mxu0 %v6126_v10  ;;  %v3201_v54 = vunpack.c.l.b16 %v7803_v32 }
 0x391   : > { %v2658_v4 = vmax.f32 %v2638_v39, 0.0 }
 0x393   : > { %v2674_v18 = vpack.c.bf16 %v2658_v4, %v2658_v4 }
 0x394   : > { %v2579_v0 = vpop.f32.mrf.mxu1  ;;  %3597 = vmatpush.bf16.msrb.mxu0 %v6125_v41 }
 0x395   : > { %v2691_v5 = vunpack.c.l.b16 %v2674_v18  ;;  %v2580_v34 = vadd.f32 %v2579_v0, %v7488_v51 }
 0x397   : > { %v2699_v14 = vpack.c.b16 %v2691_v5, %v2691_v5  ;;  %v2641_v12 = vadd.f32 %v2640_v63, %v2580_v34  ;;  %v3095_v63 = vadd.f32 %v7687_v53, %v7693_v61  ;;  %v7838_v53 = vperm.slane %v3181_v31, 0 }
 0x398   : > { %v3150_v5 = vunpack.c.h.bf16 %v7696_v1 }
 0x399   : > { %v2729_v38 = vshll.u32 %v2699_v14, 16  ;;  %v2659_v8 = vmax.f32 %v2641_v12, 0.0  ;;  %v3329_v62 = vpop.f32.mrf.mxu0  ;;  %v2747_v6 = vrot.slane %v2699_v14, 1  ;;  %v3142_v11 = vpack.c.bf16 %v3124_v9, %v3095_v63 }
 0x39a   : > { %v3330_v40 = vadd.f32 %v3329_v62, %v7842_v52  ;;  %v3129_v9 = vadd.f32 %v7713_v60, %v7690_v46  ;;  %v3100_v63 = vadd.f32 %v7718_v3, %v7693_v61 }
 0x39b   : > { %v2731_v33 = vrot.slane %v2729_v38, 1  ;;  %v2675_v51 = vpack.c.bf16 %v2659_v8, %v2659_v8  ;;  %v2755_v47 = vrot.slane %v2729_v38, 2  ;;  %v3151_v50 = vunpack.c.l.bf16 %v3142_v11 }
 0x39c   : > { %v2581_v13 = vpop.f32.mrf.mxu1  ;;  %v3152_v10 = vunpack.c.h.bf16 %v3142_v11  ;;  %v3350_v32 = vadd.f32 %v3330_v40, %v3150_v5  ;;  %v6147_v5 = vld [vmem:[%s8563_s12 + $0x70] sm:$0xff] }
 0x39d   : > { %v2859_v44 = vsel %vm6504_vm7, %v2674_v18, %v2731_v33  ;;  %v2779_v2 = vunpack.c.l.b16 %v2675_v51 }
 0x39e   : > { %v2891_v48 = vsel %vm1127_vm5, %v2859_v44, %v2747_v6  ;;  %v3366_v12 = vmax.f32 %v3350_v32, 0.0  ;;  %v6138_v6 = vld [vmem:[%s8563_s12 + $0x28] sm:$0xff]  ;;  %v6137_v44 = vld [vmem:[%s8563_s12 + $0x20] sm:$0xff]  ;;  %v3134_v32 = vadd.f32 %v7731_v7, %v7690_v46  ;;  %v3158_v7 = vunpack.c.h.bf16 %v7726_v22 }
 0x39f   : > { %v2787_v55 = vpack.c.b16 %v2779_v2, %v2779_v2  ;;  %v3300_v24 = vpop.f32.mrf.mxu3  ;;  %v2903_v42 = vsel %vm7590_vm10, %v2891_v48, %v2755_v47  ;;  %4341 = vmatpush.bf16.msrb.mxu1 %v6138_v6  ;;  %v3144_v47 = vpack.c.bf16 %v3129_v9, %v3100_v63 }
 0x3a0   : > { %v3301_v28 = vadd.f32 %v3300_v24, %v7838_v53 }
 0x3a1   : > { %v2795_v37 = vrot.slane %v2787_v55, 6  ;;  %v2825_v15 = vshll.u32 %v2787_v55, 16  ;;  %v2843_v49 = vrot.slane %v2787_v55, 7  ;;  %v3331_v45 = vpop.f32.mrf.mxu0  ;;  %v3155_v3 = vunpack.c.l.bf16 %v3144_v47 }
 0x3a2   : > { %v3332_v39 = vadd.f32 %v3331_v45, %v7842_v52  ;;  %v3349_v36 = vadd.f32 %v3301_v28, %v3149_v58 }
 0x3a3   : > { %v2827_v21 = vrot.slane %v2825_v15, 7  ;;  %v2935_v26 = vsel %vm2893_vm9, %v2903_v42, %v2795_v37  ;;  %4342 = vmatpush.bf16.msrb.mxu1 %v6137_v44  ;;  %v3154_v42 = vunpack.c.h.bf16 %v7702_v56 }
 0x3a4   : > { %v3352_v34 = vadd.f32 %v3332_v39, %v3152_v10  ;;  %v3365_v41 = vmax.f32 %v3349_v36, 0.0  ;;  %v6136_v10 = vld [vmem:[%s8563_s12 + $0x18] sm:$0xff] }
 0x3a5   : > { %v2947_v30 = vsel %vm7614_vm13, %v2935_v26, %v2827_v21  ;;  %v3156_v26 = vunpack.c.h.bf16 %v3144_v47 }
 0x3a6   : > { %v2979_v23 = vsel %vm2937_vm11, %v2947_v30, %v2843_v49  ;;  %v3368_v14 = vmax.f32 %v3352_v34, 0.0  ;;  %v7856_v8 = vpack.c.bf16 %v3366_v12, %v3365_v41  ;;  %v6146_v34 = vld [vmem:[%s8563_s12 + $0x68] sm:$0xff]  ;;  %v6145_v41 = vld [vmem:[%s8563_s12 + $0x60] sm:$0xff] }
 0x3a7   : > { %v3302_v43 = vpop.f32.mrf.mxu3  ;;  %v2988_v25 = vsel %vm6474_vm3, %v2979_v23, %v2825_v15  ;;  %v3153_v15 = vunpack.c.l.bf16 %v7702_v56  ;;  %4343 = vmatpush.bf16.msrb.mxu1 %v6136_v10  ;;  %v6161_v10 = vld [vmem:[%s8563_s12 + $0xe0] sm:$0xff] }
 0x3a8   : > { %v3303_v16 = vadd.f32 %v3302_v43, %v7838_v53  ;;  %v3202_v4 = vunpack.c.l.b16 %v2988_v25  ;;  %v3433_v62 = vunpack.c.l.b16 %v7856_v8  ;;  %v3434_v1 = vunpack.c.h.b16 %v7856_v8 }
 0x3aa   : > { %v3351_v18 = vadd.f32 %v3303_v16, %v3151_v50  ;;  %v3206_v0 = vpack.c.b16 %v3202_v4, %v3201_v54 }
 0x3ac   : > { %3314 = vmatmul.bf16.gmra.mxu3 %v3206_v0  ;;  %3343 = vmatmul.bf16.gmra.mxu0 %v3206_v0  ;;  %v3367_v19 = vmax.f32 %v3351_v18, 0.0  ;;  %v6148_v18 = vld [vmem:[%s8563_s12 + $0x78] sm:$0xff]  ;;  %v6135_v0 = vld [vmem:[%s8563_s12 + $0x10] sm:$0xff] }
 0x3ad   : > { %4380 = vmatpush.bf16.msrb.mxu2 %v6148_v18  ;;  %4344 = vmatpush.bf16.msrb.mxu1 %v6135_v0  ;;  %v8743_v18 = vld [vmem:[#allocation12_spill] sm:$0xff]  ;;  %v6152_v0 = vld [vmem:[%s8563_s12 + $0x98] sm:$0xff] }
 0x3ae   : > { %v7854_v38 = vpack.c.bf16 %v3368_v14, %v3367_v19  ;;  %v3105_v19 = vadd.f32 %v7736_v27, %v7693_v61 }
 0x3b0   : > { %v3435_v33 = vunpack.c.l.b16 %v7854_v38  ;;  %v3436_v51 = vunpack.c.h.b16 %v7854_v38 }
 0x3b1   : > { %4381 = vmatpush.bf16.msrb.mxu2 %v6147_v5  ;;  %v6160_v5 = vld [vmem:[%s8563_s12 + $0xd8] sm:$0xff] }
 0x3b2   : > { %v3449_v13 = vpack.c.b16 %v3435_v33, %v3433_v62  ;;  %v3450_v35 = vpack.c.b16 %v3436_v51, %v3434_v1  ;;  %v3146_v51 = vpack.c.bf16 %v3134_v32, %v3105_v19  ;;  %v3157_v1 = vunpack.c.l.bf16 %v7726_v22  ;;  %v6150_v19 = vld [vmem:[%s8563_s12 + $0x88] sm:$0xff] }
 0x3b4   : > { %v3160_v6 = vunpack.c.h.bf16 %v3146_v51  ;;  %v3159_v63 = vunpack.c.l.bf16 %v3146_v51 }
 0x3b5   : > { %4382 = vmatpush.bf16.msrb.mxu2 %v6146_v34  ;;  %v6159_v34 = vld [vmem:[%s8563_s12 + $0xd0] sm:$0xff] }
 0x3b9   : > { %4383 = vmatpush.bf16.msrb.mxu2 %v6145_v41  ;;  %v6158_v41 = vld [vmem:[%s8563_s12 + $0xc8] sm:$0xff] }
 0x3bc   : > { %3569 = vmatmul.bf16.vlgmr.msra.gmra.mxu3 %v3449_v13  ;;  %3598 = vmatmul.bf16.vlgmr.msrb.gmra.mxu0 %v3450_v35 }
 0x3c9   : > { %v3334_v2 = vpop.f32.mrf.mxu0 }
 0x3ca   : > { %v3335_v37 = vadd.f32 %v3334_v2, %v7842_v52 }
 0x3cc   : > { %v3354_v31 = vadd.f32 %v3335_v37, %v3154_v42  ;;  %v6143_v42 = vld [vmem:[%s8563_s12 + $0x50] sm:$0xff] }
 0x3ce   : > { %v3370_v23 = vmax.f32 %v3354_v31, 0.0 }
 0x3cf   : > { %v3305_v48 = vpop.f32.mrf.mxu3 }
 0x3d0   : > { %v3306_v55 = vadd.f32 %v3305_v48, %v7838_v53 }
 0x3d1   : > { %v3336_v24 = vpop.f32.mrf.mxu0 }
 0x3d2   : > { %v3353_v11 = vadd.f32 %v3306_v55, %v3153_v15  ;;  %v3337_v21 = vadd.f32 %v3336_v24, %v7842_v52  ;;  %v6144_v55 = vld [vmem:[%s8563_s12 + $0x58] sm:$0xff] }
 0x3d3   : > { %4384 = vmatpush.bf16.msrb.mxu2 %v6144_v55 }
 0x3d4   : > { %v3369_v49 = vmax.f32 %v3353_v11, 0.0  ;;  %v3356_v45 = vadd.f32 %v3337_v21, %v3156_v26 }
 0x3d6   : > { %v7878_v43 = vpack.c.bf16 %v3370_v23, %v3369_v49  ;;  %v3372_v25 = vmax.f32 %v3356_v45, 0.0  ;;  %v6142_v49 = vld [vmem:[%s8563_s12 + $0x48] sm:$0xff]  ;;  %v6156_v23 = vld [vmem:[%s8563_s12 + $0xb8] sm:$0xff] }
 0x3d7   : > { %v3307_v60 = vpop.f32.mrf.mxu3  ;;  %4385 = vmatpush.bf16.msrb.mxu2 %v6143_v42  ;;  %4421 = vmatpush.bf16.msrb.mxu3 %v6156_v23 }
 0x3d8   : > { %v3308_v30 = vadd.f32 %v3307_v60, %v7838_v53  ;;  %v3437_v56 = vunpack.c.l.b16 %v7878_v43  ;;  %v3438_v16 = vunpack.c.h.b16 %v7878_v43 }
 0x3da   : > { %v3355_v50 = vadd.f32 %v3308_v30, %v3155_v3  ;;  %v6141_v30 = vld [vmem:[%s8563_s12 + $0x40] sm:$0xff] }
 0x3db   : > { %4386 = vmatpush.bf16.msrb.mxu2 %v6142_v49 }
 0x3dc   : > { %v3371_v54 = vmax.f32 %v3355_v50, 0.0  ;;  %v6164_v50 = vld [vmem:[%s8563_s12 + $0xf8] sm:$0xff] }
 0x3dd   : > { %4462 = vmatpush.bf16.msra.mxu0 %v6164_v50 }
 0x3de   : > { %v7880_v28 = vpack.c.bf16 %v3372_v25, %v3371_v54  ;;  %v6134_v25 = vld [vmem:[%s8563_s12 + $0x8] sm:$0xff]  ;;  %v6155_v54 = vld [vmem:[%s8563_s12 + $0xb0] sm:$0xff] }
 0x3df   : > { %4387 = vmatpush.bf16.msrb.mxu2 %v6141_v30  ;;  %4345 = vmatpush.bf16.msrb.mxu1 %v6134_v25 }
 0x3e0   : > { %v3439_v39 = vunpack.c.l.b16 %v7880_v28  ;;  %v3440_v4 = vunpack.c.h.b16 %v7880_v28  ;;  %4422 = vmatpush.bf16.msrb.mxu3 %v6155_v54 }
 0x3e2   : > { %v3451_v58 = vpack.c.b16 %v3439_v39, %v3437_v56  ;;  %v3452_v40 = vpack.c.b16 %v3440_v4, %v3438_v16  ;;  %v6163_v56 = vld [vmem:[%s8563_s12 + $0xf0] sm:$0xff]  ;;  %v8742_v39 = vmov 0   ;;  %v6133_v16 = vld [vmem:[%s8563_s12] sm:$0xff]  ;;  %v6154_v4 = vld [vmem:[%s8563_s12 + $0xa8] sm:$0xff] }
 0x3e3   : > { %4388 = vmatmul.bf16.vlgmr.msrb.gmra.mxu2 %v8742_v39  ;;  %4463 = vmatpush.bf16.msra.mxu0 %v6163_v56 }
 0x3e4   : > { %3574 = vmatmul.bf16.gmra.mxu3 %v3451_v58  ;;  %3603 = vmatmul.bf16.gmra.mxu0 %v3452_v40  ;;  %v6162_v58 = vld [vmem:[%s8563_s12 + $0xe8] sm:$0xff]  ;;  %v6153_v40 = vld [vmem:[%s8563_s12 + $0xa0] sm:$0xff] }
 0x3e5   : > { %4346 = vmatpush.bf16.msrb.mxu1 %v6133_v16  ;;  %4423 = vmatpush.bf16.msrb.mxu3 %v6154_v4 }
 0x3e7   : > { %4464 = vmatpush.bf16.msra.mxu0 %v6162_v58 }
 0x3e8   : > { %4347 = vmatmul.bf16.vlgmr.msrb.gmra.mxu1 %v8743_v18 }
 0x3e9   : > { %4424 = vmatpush.bf16.msrb.mxu3 %v6153_v40 }
 0x3eb   : > { %4465 = vmatpush.bf16.msra.mxu0 %v6161_v10 }
 0x3ed   : > { %4425 = vmatpush.bf16.msrb.mxu3 %v6152_v0 }
 0x3ef   : > { %4466 = vmatpush.bf16.msra.mxu0 %v6160_v5 }
 0x3f3   : > { %4467 = vmatpush.bf16.msra.mxu0 %v6159_v34  ;;  %v6172_v34 = vld [vmem:[%s8563_s12 + $0x138] sm:$0xff] }
 0x3f4   : > { %4503 = vmatpush.bf16.msra.mxu1 %v6172_v34 }
 0x3f7   : > { %4468 = vmatpush.bf16.msra.mxu0 %v6158_v41 }
 0x3f9   : > { %v3339_v36 = vpop.f32.mrf.mxu0 }
 0x3fa   : > { %v3340_v62 = vadd.f32 %v3339_v36, %v7842_v52  ;;  %v6151_v36 = vld [vmem:[%s8563_s12 + $0x90] sm:$0xff] }
 0x3fb   : > { %4426 = vmatpush.bf16.msrb.mxu3 %v6151_v36 }
 0x3fc   : > { %v3358_v35 = vadd.f32 %v3340_v62, %v3158_v7  ;;  %v6149_v62 = vld [vmem:[%s8563_s12 + $0x80] sm:$0xff] }
 0x3fe   : > { %v3374_v24 = vmax.f32 %v3358_v35, 0.0 }
 0x3ff   : > { %v3310_v14 = vpop.f32.mrf.mxu3  ;;  %4427 = vmatpush.bf16.msrb.mxu3 %v6150_v19 }
 0x400   : > { %v3311_v12 = vadd.f32 %v3310_v14, %v7838_v53  ;;  %v3139_v14 = vadd.f32 %v7805_v59, %v7690_v46  ;;  %v3161_v46 = vunpack.c.l.bf16 %v7760_v57 }
 0x401   : > { %v3341_v33 = vpop.f32.mrf.mxu0 }
 0x402   : > { %v3357_v13 = vadd.f32 %v3311_v12, %v3157_v1  ;;  %v3342_v27 = vadd.f32 %v3341_v33, %v7842_v52  ;;  %v3110_v12 = vadd.f32 %v7814_v20, %v7693_v61  ;;  %v6157_v1 = vld [vmem:[%s8563_s12 + $0xc0] sm:$0xff]  ;;  %v3162_v61 = vunpack.c.h.bf16 %v7760_v57 }
 0x403   : > { %4428 = vmatpush.bf16.msrb.mxu3 %v6149_v62  ;;  %4469 = vmatpush.bf16.msra.mxu0 %v6157_v1  ;;  %v8005_v57 = vld [vmem:[%s8562_s11] ss:$0 sm:$0xff] }
 0x404   : > { %v3373_v2 = vmax.f32 %v3357_v13, 0.0  ;;  %v3360_v9 = vadd.f32 %v3342_v27, %v3160_v6  ;;  %v3148_v13 = vpack.c.bf16 %v3139_v14, %v3110_v12  ;;  %v8038_v14 = vsel %vm8029_vm15, %v6432_v29, 0 }
 0x406   : > { %v7917_v37 = vpack.c.bf16 %v3374_v24, %v3373_v2  ;;  %v3376_v22 = vmax.f32 %v3360_v9, 0.0  ;;  %v3164_v6 = vunpack.c.h.bf16 %v3148_v13 }
 0x407   : > { %v3312_v44 = vpop.f32.mrf.mxu3 }
 0x408   : > { %v3313_v48 = vadd.f32 %v3312_v44, %v7838_v53  ;;  %v3441_v21 = vunpack.c.l.b16 %v7917_v37  ;;  %v3442_v26 = vunpack.c.h.b16 %v7917_v37 }
 0x40a   : > { %v3359_v47 = vadd.f32 %v3313_v48, %v3159_v63  ;;  %v3163_v63 = vunpack.c.l.bf16 %v3148_v13 }
 0x40c   : > { %v3375_v15 = vmax.f32 %v3359_v47, 0.0 }
 0x40e   : > { %v7922_v11 = vpack.c.bf16 %v3376_v22, %v3375_v15 }
 0x410   : > { %v3443_v31 = vunpack.c.l.b16 %v7922_v11  ;;  %v3444_v60 = vunpack.c.h.b16 %v7922_v11 }
 0x412   : > { %v3453_v45 = vpack.c.b16 %v3443_v31, %v3441_v21  ;;  %v3454_v3 = vpack.c.b16 %v3444_v60, %v3442_v26 }
 0x414   : > { %3579 = vmatmul.bf16.gmra.mxu3 %v3453_v45  ;;  %3608 = vmatmul.bf16.gmra.mxu0 %v3454_v3 }
 0x429   : > { %v3344_v32 = vpop.f32.mrf.mxu0 }
 0x42a   : > { %v3345_v7 = vadd.f32 %v3344_v32, %v7842_v52 }
 0x42c   : > { %v3362_v35 = vadd.f32 %v3345_v7, %v3162_v61 }
 0x42e   : > { %v3378_v55 = vmax.f32 %v3362_v35, 0.0 }
 0x42f   : > { %v3315_v33 = vpop.f32.mrf.mxu3 }
 0x430   : > { %v3316_v51 = vadd.f32 %v3315_v33, %v7838_v53 }
 0x431   : > { %v3346_v59 = vpop.f32.mrf.mxu0 }
 0x432   : > { %v3361_v20 = vadd.f32 %v3316_v51, %v3161_v46  ;;  %v3347_v27 = vadd.f32 %v3346_v59, %v7842_v52  ;;  %v6171_v51 = vld [vmem:[%s8563_s12 + $0x130] sm:$0xff] }
 0x433   : > { %4504 = vmatpush.bf16.msra.mxu1 %v6171_v51 }
 0x434   : > { %v3377_v44 = vmax.f32 %v3361_v20, 0.0  ;;  %v3364_v9 = vadd.f32 %v3347_v27, %v3164_v6  ;;  %v6170_v27 = vld [vmem:[%s8563_s12 + $0x128] sm:$0xff] }
 0x436   : > { %v8000_v47 = vpack.c.bf16 %v3378_v55, %v3377_v44  ;;  %v3380_v22 = vmax.f32 %v3364_v9, 0.0 }
 0x437   : > { %v3317_v2 = vpop.f32.mrf.mxu3  ;;  %4505 = vmatpush.bf16.msra.mxu1 %v6170_v27 }
 0x438   : > { %v3318_v48 = vadd.f32 %v3317_v2, %v7838_v53  ;;  %v3445_v31 = vunpack.c.l.b16 %v8000_v47  ;;  %v3446_v60 = vunpack.c.h.b16 %v8000_v47 }
 0x439   : > { %v3599_v42 = vpop.f32.mrf.mxu0 }
 0x43a   : > { %v3363_v24 = vadd.f32 %v3318_v48, %v3163_v63 }
 0x43c   : > { %v3379_v15 = vmax.f32 %v3363_v24, 0.0 }
 0x43e   : > { %v8007_v52 = vpack.c.bf16 %v3380_v22, %v3379_v15 }
 0x43f   : > { %v3570_v21 = vpop.f32.mrf.mxu3 }
 0x440   : > { %v3571_v26 = vadd.f32 %v8005_v57, %v3570_v21  ;;  %v3447_v53 = vunpack.c.l.b16 %v8007_v52  ;;  %v3448_v49 = vunpack.c.h.b16 %v8007_v52 }
 0x441   : > { %v3601_v16 = vpop.f32.mrf.mxu0 }
 0x442   : > { %v3600_v45 = vadd.f32 %v3599_v42, %v3571_v26  ;;  %v3455_v3 = vpack.c.b16 %v3447_v53, %v3445_v31  ;;  %v3456_v30 = vpack.c.b16 %v3448_v49, %v3446_v60 }
 0x444   : > { %v3619_v23 = vmax.f32 %v3600_v45, 0.0  ;;  %3584 = vmatmul.bf16.gmra.mxu3 %v3455_v3  ;;  %3613 = vmatmul.bf16.gmra.mxu0 %v3456_v30 }
 0x446   : > { %v8014_v50 = vpack.c.bf16 %v3619_v23, %v3619_v23  ;;  %v6169_v23 = vld [vmem:[%s8563_s12 + $0x120] sm:$0xff] }
 0x447   : > { %v3572_v25 = vpop.f32.mrf.mxu3  ;;  %4506 = vmatpush.bf16.msra.mxu1 %v6169_v23 }
 0x448   : > { %v3573_v54 = vadd.f32 %v8005_v57, %v3572_v25  ;;  %5906 = vmatmul.msk.bf16.gmra.mxu2 %vm1199_vm1, %v8014_v50  ;;  %v3637_v56 = vsel %vm1199_vm1, %v8014_v50, 0 }
 0x449   : > { %v3660_v4 = vshrl.u32 %v3637_v56, 16  ;;  %v3663_v10 = vshll.u32 %v3637_v56, 16 }
 0x44a   : > { %v3602_v58 = vadd.f32 %v3601_v16, %v3573_v54 }
 0x44b   : > { %v3662_v40 = vrot.slane %v3660_v4, 7  ;;  %v3724_v7 = vrot.slane %v3663_v10, 1 }
 0x44c   : > { %v3620_v0 = vmax.f32 %v3602_v58, 0.0 }
 0x44d   : > { %v3665_v5 = vor.u32 %v3663_v10, %v3662_v40  ;;  %v3725_v46 = vor.u32 %v3724_v7, %v3660_v4  ;;  %v6168_v40 = vld [vmem:[%s8563_s12 + $0x118] sm:$0xff] }
 0x44e   : > { %v8021_v36 = vpack.c.bf16 %v3620_v0, %v3620_v0  ;;  %4507 = vmatpush.bf16.msra.mxu1 %v6168_v40 }
 0x44f   : > { %v3716_v32 = vsel %vm6504_vm7, 0, %v3665_v5  ;;  %v8053_v59 = vsel %vm8029_vm15, %v3725_v46, 0 }
 0x450   : > { %4351 = vmatmul.bf16.gmra.mxu1 %v3716_v32  ;;  %v3640_v41 = vsel %vm1199_vm1, %v8021_v36, 0 }
 0x451   : > { %v3666_v12 = vshrl.u32 %v3640_v41, 16  ;;  %v3669_v62 = vshll.u32 %v3640_v41, 16 }
 0x453   : > { %v3668_v33 = vrot.slane %v3666_v12, 7  ;;  %v3726_v6 = vrot.slane %v3669_v62, 1 }
 0x454   : > { %4429 = vmatmul.bf16.vlgmr.msrb.gmra.mxu3 %v8038_v14  ;;  %4470 = vmatmul.bf16.vlgmr.msra.gmra.mxu0 %v3716_v32 }
 0x455   : > { %v3671_v1 = vor.u32 %v3669_v62, %v3668_v33  ;;  %v3727_v63 = vor.u32 %v3726_v6, %v3666_v12  ;;  %v6167_v12 = vld [vmem:[%s8563_s12 + $0x110] sm:$0xff] }
 0x456   : > { %4508 = vmatpush.bf16.msra.mxu1 %v6167_v12 }
 0x457   : > { %v8048_v29 = vsel %vm6504_vm7, 0, %v3671_v1  ;;  %v8070_v42 = vsel %vm8029_vm15, %v3727_v63, 0 }
 0x458   : > { %5907 = vmatmul.msk.bf16.gmra.mxu2 %vm1199_vm1, %v8021_v36 }
 0x460   : > { %4355 = vmatmul.bf16.gmra.mxu1 %v8048_v29 }
 0x461   : > { %v3604_v13 = vpop.f32.mrf.mxu0 }
 0x464   : > { %4433 = vmatmul.bf16.gmra.mxu3 %v8053_v59  ;;  %4474 = vmatmul.bf16.gmra.mxu0 %v8048_v29 }
 0x465   : > { %v4348_v7 = vpop.f32.mrf.mxu1 }
 0x466   : > { %v4389_v62 = vpop.f32.mrf.mxu2 }
 0x467   : > { %v3575_v61 = vpop.f32.mrf.mxu3 }
 0x468   : > { %v3576_v20 = vadd.f32 %v8005_v57, %v3575_v61 }
 0x469   : > { %v3606_v24 = vpop.f32.mrf.mxu0 }
 0x46a   : > { %v3605_v35 = vadd.f32 %v3604_v13, %v3576_v20  ;;  %v6180_v20 = vld [vmem:[%s8563_s12 + $0x178] sm:$0xff] }
 0x46b   : > { %4544 = vmatpush.bf16.msra.mxu2 %v6180_v20  ;;  %v6174_v20 = vld [vmem:[%s8563_s12 + $0x148] sm:$0xff] }
 0x46c   : > { %v3621_v44 = vmax.f32 %v3605_v35, 0.0 }
 0x46e   : > { %v8061_v2 = vpack.c.bf16 %v3621_v44, %v3621_v44 }
 0x46f   : > { %v3577_v9 = vpop.f32.mrf.mxu3 }
 0x470   : > { %v3578_v48 = vadd.f32 %v8005_v57, %v3577_v9  ;;  %5908 = vmatmul.msk.bf16.gmra.mxu2 %vm1199_vm1, %v8061_v2  ;;  %v3643_v55 = vsel %vm1199_vm1, %v8061_v2, 0  ;;  %v6179_v9 = vld [vmem:[%s8563_s12 + $0x170] sm:$0xff] }
 0x471   : > { %v3672_v22 = vshrl.u32 %v3643_v55, 16  ;;  %v3675_v31 = vshll.u32 %v3643_v55, 16  ;;  %4545 = vmatpush.bf16.msra.mxu2 %v6179_v9  ;;  %v6195_v9 = vld [vmem:[%s8563_s12 + $0x1f0] sm:$0xff] }
 0x472   : > { %v3607_v15 = vadd.f32 %v3606_v24, %v3578_v48  ;;  %v4391_v24 = vpop.f32.mrf.mxu2 }
 0x473   : > { %v3674_v21 = vrot.slane %v3672_v22, 7  ;;  %v3728_v3 = vrot.slane %v3675_v31, 1  ;;  %v6181_v24 = vld [vmem:[%s8563_s12 + $0x180] sm:$0xff] }
 0x474   : > { %v3622_v26 = vmax.f32 %v3607_v15, 0.0  ;;  %4437 = vmatmul.bf16.gmra.mxu3 %v8070_v42 }
 0x475   : > { %v3677_v53 = vor.u32 %v3675_v31, %v3674_v21  ;;  %v3729_v25 = vor.u32 %v3728_v3, %v3672_v22  ;;  %v4350_v31 = vpop.f32.mrf.mxu1  ;;  %v6178_v3 = vld [vmem:[%s8563_s12 + $0x168] sm:$0xff] }
 0x476   : > { %v8073_v60 = vpack.c.bf16 %v3622_v26, %v3622_v26  ;;  %4546 = vmatpush.bf16.msra.mxu2 %v6178_v3 }
 0x477   : > { %v8077_v49 = vsel %vm6504_vm7, 0, %v3677_v53  ;;  %v8090_v16 = vsel %vm8029_vm15, %v3729_v25, 0 }
 0x478   : > { %4359 = vmatmul.bf16.gmra.mxu1 %v8077_v49  ;;  %4478 = vmatmul.bf16.gmra.mxu0 %v8077_v49  ;;  %v3646_v45 = vsel %vm1199_vm1, %v8073_v60, 0 }
 0x479   : > { %v3678_v30 = vshrl.u32 %v3646_v45, 16  ;;  %v3681_v56 = vshll.u32 %v3646_v45, 16 }
 0x47b   : > { %v3680_v54 = vrot.slane %v3678_v30, 7  ;;  %v3730_v10 = vrot.slane %v3681_v56, 1 }
 0x47d   : > { %v3683_v4 = vor.u32 %v3681_v56, %v3680_v54  ;;  %v3731_v0 = vor.u32 %v3730_v10, %v3678_v30  ;;  %v6188_v30 = vld [vmem:[%s8563_s12 + $0x1b8] sm:$0xff]  ;;  %v6177_v54 = vld [vmem:[%s8563_s12 + $0x160] sm:$0xff]  ;;  %v6187_v56 = vld [vmem:[%s8563_s12 + $0x1b0] sm:$0xff] }
 0x47e   : > { %4585 = vmatpush.bf16.msra.mxu3 %v6188_v30  ;;  %4547 = vmatpush.bf16.msra.mxu2 %v6177_v54  ;;  %v6204_v30 = vld [vmem:[%s8563_s12 + $0x238] sm:$0xff]  ;;  %v6191_v54 = vld [vmem:[%s8563_s12 + $0x1d0] sm:$0xff] }
 0x47f   : > { %v8095_v58 = vsel %vm6504_vm7, 0, %v3683_v4  ;;  %v8104_v5 = vsel %vm8029_vm15, %v3731_v0, 0  ;;  %v6166_v4 = vld [vmem:[%s8563_s12 + $0x108] sm:$0xff]  ;;  %v8159_v0 = vld [vmem:[%s8564_s13] ss:$0 sm:$0xff] }
 0x480   : > { %5909 = vmatmul.msk.bf16.gmra.mxu2 %vm1199_vm1, %v8073_v60  ;;  %4509 = vmatpush.bf16.msra.mxu1 %v6166_v4 }
 0x482   : > { %4586 = vmatpush.bf16.msra.mxu3 %v6187_v56 }
 0x484   : > { %4441 = vmatmul.bf16.gmra.mxu3 %v8090_v16 }
 0x488   : > { %4363 = vmatmul.bf16.gmra.mxu1 %v8095_v58  ;;  %4482 = vmatmul.bf16.gmra.mxu0 %v8095_v58 }
 0x491   : > { %v3609_v34 = vpop.f32.mrf.mxu0 }
 0x494   : > { %4445 = vmatmul.bf16.gmra.mxu3 %v8104_v5 }
 0x497   : > { %v3580_v32 = vpop.f32.mrf.mxu3 }
 0x498   : > { %v3581_v41 = vadd.f32 %v8005_v57, %v3580_v32  ;;  %v6186_v32 = vld [vmem:[%s8563_s12 + $0x1a8] sm:$0xff] }
 0x499   : > { %v3611_v27 = vpop.f32.mrf.mxu0  ;;  %4587 = vmatpush.bf16.msra.mxu3 %v6186_v32 }
 0x49a   : > { %v3610_v33 = vadd.f32 %v3609_v34, %v3581_v41  ;;  %v6176_v34 = vld [vmem:[%s8563_s12 + $0x158] sm:$0xff]  ;;  %v4349_v41 = vadd.f32 %v8159_v0, %v4348_v7 }
 0x49b   : > { %4548 = vmatpush.bf16.msra.mxu2 %v6176_v34 }
 0x49c   : > { %v3623_v51 = vmax.f32 %v3610_v33, 0.0 }
 0x49e   : > { %v8111_v1 = vpack.c.bf16 %v3623_v51, %v3623_v51  ;;  %v6175_v51 = vld [vmem:[%s8563_s12 + $0x150] sm:$0xff] }
 0x49f   : > { %v3582_v46 = vpop.f32.mrf.mxu3  ;;  %4549 = vmatpush.bf16.msra.mxu2 %v6175_v51 }
 0x4a0   : > { %v3583_v13 = vadd.f32 %v8005_v57, %v3582_v46  ;;  %5910 = vmatmul.msk.bf16.gmra.mxu2 %vm1199_vm1, %v8111_v1  ;;  %v3649_v61 = vsel %vm1199_vm1, %v8111_v1, 0  ;;  %v6185_v46 = vld [vmem:[%s8563_s12 + $0x1a0] sm:$0xff] }
 0x4a1   : > { %v3684_v35 = vshrl.u32 %v3649_v61, 16  ;;  %v3687_v6 = vshll.u32 %v3649_v61, 16  ;;  %4588 = vmatpush.bf16.msra.mxu3 %v6185_v46 }
 0x4a2   : > { %v3612_v44 = vadd.f32 %v3611_v27, %v3583_v13  ;;  %v8174_v13 = vadd.f32 %v4389_v62, %v4349_v41  ;;  %v6184_v62 = vld [vmem:[%s8563_s12 + $0x198] sm:$0xff] }
 0x4a3   : > { %v3686_v63 = vrot.slane %v3684_v35, 7  ;;  %v3732_v48 = vrot.slane %v3687_v6, 1  ;;  %v6196_v27 = vld [vmem:[%s8563_s12 + $0x1f8] sm:$0xff]  ;;  %4550 = vmatpush.bf16.msra.mxu2 %v6174_v20 }
 0x4a4   : > { %v3624_v55 = vmax.f32 %v3612_v44, 0.0  ;;  %4626 = vmatpush.bf16.msrb.mxu0 %v6196_v27  ;;  %v6183_v44 = vld [vmem:[%s8563_s12 + $0x190] sm:$0xff] }
 0x4a5   : > { %v3689_v22 = vor.u32 %v3687_v6, %v3686_v63  ;;  %v3733_v15 = vor.u32 %v3732_v48, %v3684_v35  ;;  %v6165_v35 = vld [vmem:[%s8563_s12 + $0x100] sm:$0xff]  ;;  %4589 = vmatpush.bf16.msra.mxu3 %v6184_v62  ;;  %v6182_v63 = vld [vmem:[%s8563_s12 + $0x188] sm:$0xff] }
 0x4a6   : > { %v8124_v21 = vpack.c.bf16 %v3624_v55, %v3624_v55  ;;  %4510 = vmatpush.bf16.msra.mxu1 %v6165_v35  ;;  %v6173_v6 = vld [vmem:[%s8563_s12 + $0x140] sm:$0xff]  ;;  %v6194_v48 = vld [vmem:[%s8563_s12 + $0x1e8] sm:$0xff] }
 0x4a7   : > { %v8128_v26 = vsel %vm6504_vm7, 0, %v3689_v22  ;;  %v8132_v53 = vsel %vm8029_vm15, %v3733_v15, 0  ;;  %4551 = vmatpush.bf16.msra.mxu2 %v6173_v6  ;;  %v6193_v22 = vld [vmem:[%s8563_s12 + $0x1e0] sm:$0xff] }
 0x4a8   : > { %4367 = vmatmul.bf16.gmra.mxu1 %v8128_v26  ;;  %4449 = vmatmul.bf16.gmra.mxu3 %v8132_v53  ;;  %v3652_v45 = vsel %vm1199_vm1, %v8124_v21, 0 }
 0x4a9   : > { %4486 = vmatmul.bf16.gmra.mxu0 %v8128_v26  ;;  %v3690_v23 = vshrl.u32 %v3652_v45, 16  ;;  %v3693_v25 = vshll.u32 %v3652_v45, 16  ;;  %4590 = vmatpush.bf16.msra.mxu3 %v6183_v44  ;;  %v6192_v45 = vld [vmem:[%s8563_s12 + $0x1d8] sm:$0xff]  ;;  %v6189_v44 = vld [vmem:[%s8563_s12 + $0x1c0] sm:$0xff] }
 0x4aa   : > { %4627 = vmatpush.bf16.msrb.mxu0 %v6195_v9  ;;  %4667 = vmatpush.bf16.msrb.mxu1 %v6204_v30 }
 0x4ab   : > { %v3692_v40 = vrot.slane %v3690_v23, 7  ;;  %v3734_v10 = vrot.slane %v3693_v25, 1 }
 0x4ad   : > { %v3695_v12 = vor.u32 %v3693_v25, %v3692_v40  ;;  %v3735_v33 = vor.u32 %v3734_v10, %v3690_v23  ;;  %4591 = vmatpush.bf16.msra.mxu3 %v6182_v63 }
 0x4ae   : > { %4628 = vmatpush.bf16.msrb.mxu0 %v6194_v48 }
 0x4af   : > { %v8178_v61 = vsel %vm6504_vm7, 0, %v3695_v12  ;;  %v8182_v7 = vsel %vm8029_vm15, %v3735_v33, 0  ;;  %v6190_v33 = vld [vmem:[%s8563_s12 + $0x1c8] sm:$0xff] }
 0x4b0   : > { %5911 = vmatmul.msk.bf16.gmra.mxu2 %vm1199_vm1, %v8124_v21 }
 0x4b1   : > { %4592 = vmatpush.bf16.msra.mxu3 %v6181_v24 }
 0x4b2   : > { %4629 = vmatpush.bf16.msrb.mxu0 %v6193_v22 }
 0x4b6   : > { %4630 = vmatpush.bf16.msrb.mxu0 %v6192_v45 }
 0x4b8   : > { %4371 = vmatmul.bf16.gmra.mxu1 %v8178_v61  ;;  %4453 = vmatmul.bf16.gmra.mxu3 %v8182_v7 }
 0x4b9   : > { %4490 = vmatmul.bf16.gmra.mxu0 %v8178_v61 }
 0x4ba   : > { %4631 = vmatpush.bf16.msrb.mxu0 %v6191_v54 }
 0x4be   : > { %4632 = vmatpush.bf16.msrb.mxu0 %v6190_v33 }
 0x4c1   : > { %v3614_v55 = vpop.f32.mrf.mxu0 }
 0x4c2   : > { %4633 = vmatpush.bf16.msrb.mxu0 %v6189_v44 }
 0x4c7   : > { %v3585_v15 = vpop.f32.mrf.mxu3 }
 0x4c8   : > { %v3586_v31 = vadd.f32 %v8005_v57, %v3585_v15 }
 0x4c9   : > { %v3616_v3 = vpop.f32.mrf.mxu0 }
 0x4ca   : > { %v3615_v23 = vadd.f32 %v3614_v55, %v3586_v31 }
 0x4cb   : > { %v4393_v25 = vpop.f32.mrf.mxu2 }
 0x4cc   : > { %v3625_v56 = vmax.f32 %v3615_v23, 0.0  ;;  %v6203_v23 = vld [vmem:[%s8563_s12 + $0x230] sm:$0xff] }
 0x4cd   : > { %v4352_v4 = vpop.f32.mrf.mxu1  ;;  %4668 = vmatpush.bf16.msrb.mxu1 %v6203_v23 }
 0x4ce   : > { %v8230_v40 = vpack.c.bf16 %v3625_v56, %v3625_v56  ;;  %v4353_v10 = vadd.f32 %v8159_v0, %v4352_v4 }
 0x4cf   : > { %v3587_v34 = vpop.f32.mrf.mxu3 }
 0x4d0   : > { %v3588_v32 = vadd.f32 %v8005_v57, %v3587_v34  ;;  %5912 = vmatmul.msk.bf16.gmra.mxu2 %vm1199_vm1, %v8230_v40  ;;  %v3655_v41 = vsel %vm1199_vm1, %v8230_v40, 0  ;;  %v4394_v12 = vadd.f32 %v4393_v25, %v4353_v10 }
 0x4d1   : > { %v4471_v51 = vpop.f32.mrf.mxu0  ;;  %v3696_v46 = vshrl.u32 %v3655_v41, 16  ;;  %v3699_v20 = vshll.u32 %v3655_v41, 16 }
 0x4d2   : > { %v3617_v62 = vadd.f32 %v3616_v3, %v3588_v32 }
 0x4d3   : > { %v4395_v27 = vpop.f32.mrf.mxu2  ;;  %v3698_v35 = vrot.slane %v3696_v46, 7  ;;  %v3736_v6 = vrot.slane %v3699_v20, 1 }
 0x4d4   : > { %v3626_v57 = vmax.f32 %v3617_v62, 0.0 }
 0x4d5   : > { %v4354_v9 = vpop.f32.mrf.mxu1  ;;  %v3701_v63 = vor.u32 %v3699_v20, %v3698_v35  ;;  %v3737_v48 = vor.u32 %v3736_v6, %v3696_v46 }
 0x4d6   : > { %v8244_v55 = vpack.c.bf16 %v3626_v57, %v3626_v57  ;;  %v6202_v57 = vld [vmem:[%s8563_s12 + $0x228] sm:$0xff] }
 0x4d7   : > { %v4430_v24 = vpop.f32.mrf.mxu3  ;;  %v8248_v22 = vsel %vm6504_vm7, 0, %v3701_v63  ;;  %v8252_v15 = vsel %vm8029_vm15, %v3737_v48, 0  ;;  %4669 = vmatpush.bf16.msrb.mxu1 %v6202_v57 }
 0x4d8   : > { %v4431_v31 = vadd.f32 %v4430_v24, %v8174_v13  ;;  %4375 = vmatmul.bf16.gmra.mxu1 %v8248_v22  ;;  %4457 = vmatmul.bf16.gmra.mxu3 %v8252_v15  ;;  %v3658_v45 = vsel %vm1199_vm1, %v8244_v55, 0 }
 0x4d9   : > { %4494 = vmatmul.bf16.gmra.mxu0 %v8248_v22  ;;  %v4473_v3 = vpop.f32.mrf.mxu0  ;;  %v3705_v30 = vshll.u32 %v3658_v45, 16  ;;  %v3702_v56 = vshrl.u32 %v3658_v45, 16 }
 0x4da   : > { %v8263_v25 = vadd.f32 %v4471_v51, %v4431_v31  ;;  %v6201_v31 = vld [vmem:[%s8563_s12 + $0x220] sm:$0xff] }
 0x4db   : > { %v4397_v54 = vpop.f32.mrf.mxu2  ;;  %v3738_v13 = vrot.slane %v3705_v30, 1  ;;  %v3704_v41 = vrot.slane %v3702_v56, 7  ;;  %4670 = vmatpush.bf16.msrb.mxu1 %v6201_v31 }
 0x4dd   : > { %v4356_v4 = vpop.f32.mrf.mxu1  ;;  %v8265_v10 = vor.u32 %v3738_v13, %v3702_v56  ;;  %v3707_v62 = vor.u32 %v3705_v30, %v3704_v41  ;;  %v6200_v41 = vld [vmem:[%s8563_s12 + $0x218] sm:$0xff] }
 0x4de   : > { %v4357_v34 = vadd.f32 %v8159_v0, %v4356_v4 }
 0x4df   : > { %v4432_v32 = vpop.f32.mrf.mxu3  ;;  %v8271_v6 = vsel %vm6504_vm7, 0, %v3707_v62  ;;  %4671 = vmatpush.bf16.msrb.mxu1 %v6200_v41 }
 0x4e0   : > { %4552 = vmatmul.bf16.vlgmr.msra.gmra.mxu2 %v8053_v59  ;;  %v4398_v33 = vadd.f32 %v4397_v54, %v4357_v34 }
 0x4e1   : > { %v4475_v46 = vpop.f32.mrf.mxu0 }
 0x4e3   : > { %v4399_v20 = vpop.f32.mrf.mxu2 }
 0x4e5   : > { %v4358_v27 = vpop.f32.mrf.mxu1 }
 0x4e7   : > { %v4434_v51 = vpop.f32.mrf.mxu3 }
 0x4e8   : > { %v4435_v35 = vadd.f32 %v4434_v51, %v4394_v12  ;;  %5913 = vmatmul.msk.bf16.vlgmr.msra.gmra.mxu1 %vm1199_vm1, %v8014_v50  ;;  %4593 = vmatmul.bf16.vlgmr.msra.gmra.mxu3 %v8048_v29 }
 0x4e9   : > { %4498 = vmatmul.bf16.gmra.mxu0 %v8271_v6  ;;  %v4477_v59 = vpop.f32.mrf.mxu0 }
 0x4ea   : > { %v8280_v44 = vadd.f32 %v4475_v46, %v4435_v35 }
 0x4ef   : > { %v4436_v12 = vpop.f32.mrf.mxu3 }
 0x4f0   : > { %4556 = vmatmul.bf16.gmra.mxu2 %v8070_v42 }
 0x4f3   : > { %v4401_v17 = vpop.f32.mrf.mxu2 }
 0x4f5   : > { %v4360_v9 = vpop.f32.mrf.mxu1  ;;  %v4479_v63 = vpop.f32.mrf.mxu0 }
 0x4f6   : > { %v4361_v50 = vadd.f32 %v8159_v0, %v4360_v9 }
 0x4f7   : > { %v4438_v48 = vpop.f32.mrf.mxu3 }
 0x4f8   : > { %v4439_v29 = vadd.f32 %v4438_v48, %v4398_v33  ;;  %5914 = vmatmul.msk.bf16.gmra.mxu1 %vm1199_vm1, %v8021_v36  ;;  %4597 = vmatmul.bf16.gmra.mxu3 %v8077_v49  ;;  %v4402_v24 = vadd.f32 %v4401_v17, %v4361_v50 }
 0x4f9   : > { %5921 = vmatmul.msk.bf16.vlgmr.msrb.gmra.mxu0 %vm1199_vm1, %v8021_v36 }
 0x4fa   : > { %v8292_v45 = vadd.f32 %v4479_v63, %v4439_v29 }
 0x4fb   : > { %v4403_v3 = vpop.f32.mrf.mxu2 }
 0x4fd   : > { %v4362_v30 = vpop.f32.mrf.mxu1  ;;  %v4481_v23 = vpop.f32.mrf.mxu0 }
 0x4ff   : > { %v4440_v54 = vpop.f32.mrf.mxu3 }
 0x500   : > { %4560 = vmatmul.bf16.gmra.mxu2 %v8090_v16 }
 0x503   : > { %v4405_v56 = vpop.f32.mrf.mxu2 }
 0x505   : > { %v4364_v13 = vpop.f32.mrf.mxu1  ;;  %v4483_v49 = vpop.f32.mrf.mxu0 }
 0x506   : > { %v4365_v4 = vadd.f32 %v8159_v0, %v4364_v13 }
 0x507   : > { %v4442_v34 = vpop.f32.mrf.mxu3 }
 0x508   : > { %v4443_v36 = vadd.f32 %v4442_v34, %v4402_v24  ;;  %5915 = vmatmul.msk.bf16.gmra.mxu1 %vm1199_vm1, %v8061_v2  ;;  %4601 = vmatmul.bf16.gmra.mxu3 %v8095_v58  ;;  %v4406_v32 = vadd.f32 %v4405_v56, %v4365_v4  ;;  %v6197_v56 = vld [vmem:[%s8563_s12 + $0x200] sm:$0xff] }
 0x509   : > { %5922 = vmatmul.msk.bf16.gmra.mxu0 %vm1199_vm1, %v8061_v2  ;;  %v6199_v2 = vld [vmem:[%s8563_s12 + $0x210] sm:$0xff] }
 0x50a   : > { %v8304_v33 = vadd.f32 %v4483_v49, %v4443_v36  ;;  %4672 = vmatpush.bf16.msrb.mxu1 %v6199_v2 }
 0x50b   : > { %v4407_v46 = vpop.f32.mrf.mxu2 }
 0x50d   : > { %v4366_v20 = vpop.f32.mrf.mxu1  ;;  %v4485_v62 = vpop.f32.mrf.mxu0 }
 0x50f   : > { %v4444_v27 = vpop.f32.mrf.mxu3 }
 0x510   : > { %4564 = vmatmul.bf16.gmra.mxu2 %v8104_v5 }
 0x517   : > { %v4446_v51 = vpop.f32.mrf.mxu3 }
 0x518   : > { %v4447_v35 = vadd.f32 %v4446_v51, %v4406_v32  ;;  %5916 = vmatmul.msk.bf16.gmra.mxu1 %vm1199_vm1, %v8073_v60  ;;  %4605 = vmatmul.bf16.gmra.mxu3 %v8128_v26  ;;  %v6198_v26 = vld [vmem:[%s8563_s12 + $0x208] sm:$0xff] }
 0x519   : > { %5923 = vmatmul.msk.bf16.gmra.mxu0 %vm1199_vm1, %v8073_v60  ;;  %4673 = vmatpush.bf16.msrb.mxu1 %v6198_v26 }
 0x51d   : > { %4674 = vmatpush.bf16.msrb.mxu1 %v6197_v56 }
 0x51f   : > { %v4448_v58 = vpop.f32.mrf.mxu3 }
 0x520   : > { %4568 = vmatmul.bf16.gmra.mxu2 %v8132_v53 }
 0x523   : > { %v4409_v59 = vpop.f32.mrf.mxu2 }
 0x525   : > { %v4368_v57 = vpop.f32.mrf.mxu1 }
 0x526   : > { %v4369_v12 = vadd.f32 %v8159_v0, %v4368_v57  ;;  %v4487_v17 = vpop.f32.mrf.mxu0 }
 0x527   : > { %v8317_v9 = vadd.f32 %v4487_v17, %v4447_v35 }
 0x528   : > { %5917 = vmatmul.msk.bf16.gmra.mxu1 %vm1199_vm1, %v8111_v1  ;;  %4609 = vmatmul.bf16.gmra.mxu3 %v8178_v61  ;;  %v4410_v60 = vadd.f32 %v4409_v59, %v4369_v12 }
 0x529   : > { %5924 = vmatmul.msk.bf16.gmra.mxu0 %vm1199_vm1, %v8111_v1 }
 0x52b   : > { %v4411_v63 = vpop.f32.mrf.mxu2  ;;  %v4450_v50 = vpop.f32.mrf.mxu3 }
 0x52c   : > { %v4451_v48 = vadd.f32 %v4450_v50, %v4410_v60 }
 0x52d   : > { %v4370_v29 = vpop.f32.mrf.mxu1 }
 0x52e   : > { %v4489_v24 = vpop.f32.mrf.mxu0 }
 0x530   : > { %4572 = vmatmul.bf16.gmra.mxu2 %v8182_v7 }
 0x533   : > { %v4413_v31 = vpop.f32.mrf.mxu2  ;;  %v4452_v3 = vpop.f32.mrf.mxu3 }
 0x535   : > { %v4372_v30 = vpop.f32.mrf.mxu1 }
 0x536   : > { %v4373_v61 = vadd.f32 %v8159_v0, %v4372_v30  ;;  %v4491_v23 = vpop.f32.mrf.mxu0 }
 0x537   : > { %v8329_v54 = vadd.f32 %v4491_v23, %v4451_v48 }
 0x538   : > { %5918 = vmatmul.msk.bf16.gmra.mxu1 %vm1199_vm1, %v8124_v21  ;;  %4613 = vmatmul.bf16.gmra.mxu3 %v8248_v22  ;;  %v4414_v1 = vadd.f32 %v4413_v31, %v4373_v61 }
 0x539   : > { %5925 = vmatmul.msk.bf16.gmra.mxu0 %vm1199_vm1, %v8124_v21  ;;  %v8348_v21 = vsel %vm8029_vm15, %v8265_v10, 0 }
 0x53b   : > { %v4415_v13 = vpop.f32.mrf.mxu2  ;;  %v4454_v49 = vpop.f32.mrf.mxu3 }
 0x53c   : > { %v4455_v4 = vadd.f32 %v4454_v49, %v4414_v1 }
 0x53d   : > { %v4374_v34 = vpop.f32.mrf.mxu1 }
 0x53e   : > { %v4493_v36 = vpop.f32.mrf.mxu0 }
 0x540   : > { %4576 = vmatmul.bf16.gmra.mxu2 %v8252_v15 }
 0x543   : > { %v4456_v32 = vpop.f32.mrf.mxu3 }
 0x548   : > { %5919 = vmatmul.msk.bf16.gmra.mxu1 %vm1199_vm1, %v8230_v40  ;;  %4617 = vmatmul.bf16.gmra.mxu3 %v8271_v6 }
 0x549   : > { %5926 = vmatmul.msk.bf16.gmra.mxu0 %vm1199_vm1, %v8230_v40 }
 0x550   : > { %4580 = vmatmul.bf16.gmra.mxu2 %v8348_v21 }
 0x553   : > { %v4417_v22 = vpop.f32.mrf.mxu2 }
 0x555   : > { %v4376_v41 = vpop.f32.mrf.mxu1 }
 0x556   : > { %v4377_v46 = vadd.f32 %v8159_v0, %v4376_v41  ;;  %v4495_v20 = vpop.f32.mrf.mxu0  ;;  %v5986_v41 = vld [vmem:[%s8565_s14 + $0x70] sm:$0xf] }
 0x557   : > { %v8352_v62 = vadd.f32 %v4495_v20, %v4455_v4 }
 0x558   : > { %5920 = vmatmul.msk.bf16.gmra.mxu1 %vm1199_vm1, %v8244_v55  ;;  %4621 = vmatmul.bf16.gmra.mxu3 %v8743_v18  ;;  %v4418_v40 = vadd.f32 %v4417_v22, %v4377_v46  ;;  %v6220_v46 = vld [vmem:[%s8565_s14 + $0x74] sm:$0xf0] }
 0x559   : > { %5927 = vmatmul.msk.bf16.gmra.mxu0 %vm1199_vm1, %v8244_v55  ;;  %v5987_v20 = vor.u32 %v6220_v46, %v5986_v41 }
 0x55b   : > { %v4419_v19 = vpop.f32.mrf.mxu2  ;;  %v4458_v10 = vpop.f32.mrf.mxu3  ;;  %4866 = vmatpush.bf16.msrb.mxu2 %v5987_v20 }
 0x55c   : > { %v4459_v6 = vadd.f32 %v4458_v10, %v4418_v40 }
 0x55d   : > { %v4378_v27 = vpop.f32.mrf.mxu1 }
 0x55e   : > { %v4497_v51 = vpop.f32.mrf.mxu0 }
 0x563   : > { %v4460_v35 = vpop.f32.mrf.mxu3  ;;  %v4553_v2 = vpop.f32.mrf.mxu2 }
 0x565   : > { %v4512_v0 = vpop.f32.mrf.mxu1 }
 0x566   : > { %v4499_v58 = vpop.f32.mrf.mxu0  ;;  %v4513_v59 = vadd.f32 %v4512_v0, %v8263_v25 }
 0x567   : > { %v8360_v57 = vadd.f32 %v4499_v58, %v4459_v6 }
 0x568   : > { %4675 = vmatmul.bf16.vlgmr.msrb.gmra.mxu1 %v8070_v42  ;;  %v4554_v18 = vadd.f32 %v4553_v2, %v4513_v59 }
 0x569   : > { %4662 = vmatmul.bf16.gmra.mxu0 %v8742_v39 }
 0x56b   : > { %v4555_v12 = vpop.f32.mrf.mxu2  ;;  %v4594_v55 = vpop.f32.mrf.mxu3 }
 0x56c   : > { %v4595_v17 = vadd.f32 %v4594_v55, %v4554_v18  ;;  %v5978_v55 = vld [vmem:[%s8565_s14 + $0x60] sm:$0xf] }
 0x56d   : > { %v4514_v60 = vpop.f32.mrf.mxu1 }
 0x56e   : > { %v4501_v26 = vpop.f32.mrf.mxu0 }
 0x573   : > { %v4557_v63 = vpop.f32.mrf.mxu2  ;;  %v4596_v50 = vpop.f32.mrf.mxu3 }
 0x575   : > { %v4516_v48 = vpop.f32.mrf.mxu1 }
 0x576   : > { %v4517_v29 = vadd.f32 %v4516_v48, %v8280_v44  ;;  %v4635_v24 = vpop.f32.mrf.mxu0 }
 0x577   : > { %v8365_v31 = vadd.f32 %v4635_v24, %v4595_v17  ;;  %v6218_v17 = vld [vmem:[%s8565_s14 + $0x64] sm:$0xf0] }
 0x578   : > { %4679 = vmatmul.bf16.gmra.mxu1 %v8090_v16  ;;  %v4558_v25 = vadd.f32 %v4557_v63, %v4517_v29  ;;  %v5979_v60 = vor.u32 %v6218_v17, %v5978_v55 }
 0x57a   : > { %4867 = vmatpush.bf16.msrb.mxu2 %v5979_v60 }
 0x57b   : > { %v4559_v42 = vpop.f32.mrf.mxu2  ;;  %v4598_v3 = vpop.f32.mrf.mxu3 }
 0x57c   : > { %v4599_v30 = vadd.f32 %v4598_v3, %v4558_v25 }
 0x57d   : > { %v4518_v39 = vpop.f32.mrf.mxu1 }
 0x57e   : > { %v4637_v61 = vpop.f32.mrf.mxu0 }
 0x583   : > { %v4561_v23 = vpop.f32.mrf.mxu2  ;;  %v4600_v1 = vpop.f32.mrf.mxu3 }
 0x584   : > { %v5970_v1 = vld [vmem:[%s8565_s14 + $0x50] sm:$0xf] }
 0x585   : > { %v4520_v56 = vpop.f32.mrf.mxu1 }
 0x586   : > { %v4521_v13 = vadd.f32 %v4520_v56, %v8292_v45  ;;  %v4639_v49 = vpop.f32.mrf.mxu0  ;;  %v6219_v45 = vld [vmem:[%s8565_s14 + $0x74] sm:$0xf]  ;;  %v6216_v56 = vld [vmem:[%s8565_s14 + $0x54] sm:$0xf0] }
 0x587   : > { %v8369_v4 = vadd.f32 %v4639_v49, %v4599_v30 }
 0x588   : > { %4683 = vmatmul.bf16.gmra.mxu1 %v8104_v5  ;;  %v4562_v44 = vadd.f32 %v4561_v23, %v4521_v13  ;;  %v5988_v5 = vld [vmem:[%s8565_s14 + $0x78] sm:$0xf0]  ;;  %v5971_v13 = vor.u32 %v6216_v56, %v5970_v1 }
 0x589   : > { %v5991_v40 = vor.u32 %v6219_v45, %v5988_v5 }
 0x58a   : > { %4868 = vmatpush.bf16.msrb.mxu2 %v5971_v13 }
 0x58b   : > { %v4563_v34 = vpop.f32.mrf.mxu2  ;;  %v4602_v36 = vpop.f32.mrf.mxu3  ;;  %4895 = vmatpush.bf16.msrb.mxu3 %v5991_v40 }
 0x58c   : > { %v4603_v16 = vadd.f32 %v4602_v36, %v4562_v44 }
 0x58d   : > { %v4522_v32 = vpop.f32.mrf.mxu1 }
 0x58e   : > { %v4641_v22 = vpop.f32.mrf.mxu0 }
 0x593   : > { %v4565_v19 = vpop.f32.mrf.mxu2  ;;  %v4604_v10 = vpop.f32.mrf.mxu3 }
 0x594   : > { %v6214_v10 = vld [vmem:[%s8565_s14 + $0x44] sm:$0xf0] }
 0x595   : > { %v4524_v6 = vpop.f32.mrf.mxu1 }
 0x596   : > { %v4525_v27 = vadd.f32 %v4524_v6, %v8304_v33  ;;  %v4643_v51 = vpop.f32.mrf.mxu0  ;;  %v6217_v33 = vld [vmem:[%s8565_s14 + $0x64] sm:$0xf] }
 0x597   : > { %v8385_v35 = vadd.f32 %v4643_v51, %v4603_v16 }
 0x598   : > { %4687 = vmatmul.bf16.gmra.mxu1 %v8132_v53  ;;  %v4566_v2 = vadd.f32 %v4565_v19, %v4525_v27  ;;  %v5980_v53 = vld [vmem:[%s8565_s14 + $0x68] sm:$0xf0]  ;;  %v5962_v19 = vld [vmem:[%s8565_s14 + $0x40] sm:$0xf] }
 0x599   : > { %v5983_v26 = vor.u32 %v6217_v33, %v5980_v53  ;;  %v5963_v6 = vor.u32 %v6214_v10, %v5962_v19  ;;  %v5954_v53 = vld [vmem:[%s8565_s14 + $0x30] sm:$0xf] }
 0x59b   : > { %v4567_v0 = vpop.f32.mrf.mxu2  ;;  %v4606_v58 = vpop.f32.mrf.mxu3  ;;  %4896 = vmatpush.bf16.msrb.mxu3 %v5983_v26  ;;  %4869 = vmatpush.bf16.msrb.mxu2 %v5963_v6  ;;  %v6212_v26 = vld [vmem:[%s8565_s14 + $0x34] sm:$0xf0] }
 0x59c   : > { %v4607_v59 = vadd.f32 %v4606_v58, %v4566_v2 }
 0x59d   : > { %v4526_v18 = vpop.f32.mrf.mxu1 }
 0x59e   : > { %v4645_v12 = vpop.f32.mrf.mxu0 }
 0x5a3   : > { %v4569_v63 = vpop.f32.mrf.mxu2  ;;  %v4608_v50 = vpop.f32.mrf.mxu3 }
 0x5a4   : > { %v5955_v50 = vor.u32 %v6212_v26, %v5954_v53 }
 0x5a5   : > { %v4528_v48 = vpop.f32.mrf.mxu1 }
 0x5a6   : > { %v4529_v29 = vadd.f32 %v4528_v48, %v8317_v9  ;;  %v4647_v24 = vpop.f32.mrf.mxu0  ;;  %v6215_v9 = vld [vmem:[%s8565_s14 + $0x54] sm:$0xf]  ;;  %4870 = vmatpush.bf16.msrb.mxu2 %v5955_v50 }
 0x5a7   : > { %v8401_v25 = vadd.f32 %v4647_v24, %v4607_v59 }
 0x5a8   : > { %4691 = vmatmul.bf16.gmra.mxu1 %v8182_v7  ;;  %v4570_v42 = vadd.f32 %v4569_v63, %v4529_v29  ;;  %v5972_v7 = vld [vmem:[%s8565_s14 + $0x58] sm:$0xf0] }
 0x5a9   : > { %v5975_v49 = vor.u32 %v6215_v9, %v5972_v7  ;;  %v5938_v7 = vld [vmem:[%s8565_s14 + $0x10] sm:$0xf] }
 0x5ab   : > { %v4571_v3 = vpop.f32.mrf.mxu2  ;;  %v4610_v30 = vpop.f32.mrf.mxu3  ;;  %4897 = vmatpush.bf16.msrb.mxu3 %v5975_v49  ;;  %v6208_v49 = vld [vmem:[%s8565_s14 + $0x14] sm:$0xf0] }
 0x5ac   : > { %v4611_v39 = vadd.f32 %v4610_v30, %v4570_v42  ;;  %v5946_v42 = vld [vmem:[%s8565_s14 + $0x20] sm:$0xf]  ;;  %v6210_v3 = vld [vmem:[%s8565_s14 + $0x24] sm:$0xf0]  ;;  %v6209_v30 = vld [vmem:[%s8565_s14 + $0x24] sm:$0xf] }
 0x5ad   : > { %v4530_v61 = vpop.f32.mrf.mxu1 }
 0x5ae   : > { %v4649_v23 = vpop.f32.mrf.mxu0  ;;  %v5948_v61 = vld [vmem:[%s8565_s14 + $0x28] sm:$0xf0] }
 0x5af   : > { %v5951_v1 = vor.u32 %v6209_v30, %v5948_v61 }
 0x5b3   : > { %v4573_v44 = vpop.f32.mrf.mxu2  ;;  %v4612_v34 = vpop.f32.mrf.mxu3 }
 0x5b4   : > { %v5939_v34 = vor.u32 %v6208_v49, %v5938_v7 }
 0x5b5   : > { %v4532_v36 = vpop.f32.mrf.mxu1 }
 0x5b6   : > { %v4533_v16 = vadd.f32 %v4532_v36, %v8329_v54  ;;  %v4651_v32 = vpop.f32.mrf.mxu0  ;;  %v6213_v54 = vld [vmem:[%s8565_s14 + $0x44] sm:$0xf]  ;;  %v5940_v36 = vld [vmem:[%s8565_s14 + $0x18] sm:$0xf0] }
 0x5b7   : > { %v8417_v22 = vadd.f32 %v4651_v32, %v4611_v39  ;;  %v5947_v39 = vor.u32 %v6210_v3, %v5946_v42 }
 0x5b8   : > { %4695 = vmatmul.bf16.gmra.mxu1 %v8252_v15  ;;  %v4574_v41 = vadd.f32 %v4573_v44, %v4533_v16  ;;  %v5964_v15 = vld [vmem:[%s8565_s14 + $0x48] sm:$0xf0]  ;;  %v6207_v44 = vld [vmem:[%s8565_s14 + $0x14] sm:$0xf] }
 0x5b9   : > { %v5967_v27 = vor.u32 %v6213_v54, %v5964_v15  ;;  %4871 = vmatpush.bf16.msrb.mxu2 %v5947_v39  ;;  %v5943_v16 = vor.u32 %v6207_v44, %v5940_v36 }
 0x5bb   : > { %v4575_v46 = vpop.f32.mrf.mxu2  ;;  %v4614_v45 = vpop.f32.mrf.mxu3  ;;  %4898 = vmatpush.bf16.msrb.mxu3 %v5967_v27 }
 0x5bc   : > { %v4615_v20 = vadd.f32 %v4614_v45, %v4574_v41  ;;  %v5930_v46 = vld [vmem:[%s8565_s14] sm:$0xf]  ;;  %v6206_v45 = vld [vmem:[%s8565_s14 + $0x4] sm:$0xf0] }
 0x5bd   : > { %v4534_v5 = vpop.f32.mrf.mxu1  ;;  %4872 = vmatpush.bf16.msrb.mxu2 %v5939_v34 }
 0x5be   : > { %v4653_v40 = vpop.f32.mrf.mxu0  ;;  %v5931_v5 = vor.u32 %v6206_v45, %v5930_v46 }
 0x5bf   : > { %v5932_v40 = vld [vmem:[%s8565_s14 + $0x8] sm:$0xf0] }
 0x5c1   : > { %4873 = vmatpush.bf16.msrb.mxu2 %v5931_v5 }
 0x5c3   : > { %v4577_v51 = vpop.f32.mrf.mxu2  ;;  %v4616_v2 = vpop.f32.mrf.mxu3 }
 0x5c5   : > { %v4536_v0 = vpop.f32.mrf.mxu1 }
 0x5c6   : > { %v4537_v58 = vadd.f32 %v4536_v0, %v8352_v62  ;;  %v4655_v59 = vpop.f32.mrf.mxu0  ;;  %v6211_v62 = vld [vmem:[%s8565_s14 + $0x34] sm:$0xf] }
 0x5c7   : > { %v8433_v18 = vadd.f32 %v4655_v59, %v4615_v20 }
 0x5c8   : > { %4699 = vmatmul.bf16.gmra.mxu1 %v8348_v21  ;;  %v4578_v12 = vadd.f32 %v4577_v51, %v4537_v58  ;;  %v5956_v21 = vld [vmem:[%s8565_s14 + $0x38] sm:$0xf0] }
 0x5c9   : > { %v5959_v48 = vor.u32 %v6211_v62, %v5956_v21 }
 0x5cb   : > { %v4579_v55 = vpop.f32.mrf.mxu2  ;;  %v4618_v17 = vpop.f32.mrf.mxu3  ;;  %4899 = vmatpush.bf16.msrb.mxu3 %v5959_v48 }
 0x5cc   : > { %v4619_v33 = vadd.f32 %v4618_v17, %v4578_v12 }
 0x5cd   : > { %v4538_v60 = vpop.f32.mrf.mxu1 }
 0x5ce   : > { %v4657_v63 = vpop.f32.mrf.mxu0 }
 0x5cf   : > { %4900 = vmatpush.bf16.msrb.mxu3 %v5951_v1 }
 0x5d3   : > { %v4581_v29 = vpop.f32.mrf.mxu2  ;;  %v4620_v24 = vpop.f32.mrf.mxu3  ;;  %4901 = vmatpush.bf16.msrb.mxu3 %v5943_v16 }
 0x5d5   : > { %v4540_v23 = vpop.f32.mrf.mxu1 }
 0x5d6   : > { %v4541_v56 = vadd.f32 %v4540_v23, %v8360_v57  ;;  %v4659_v9 = vpop.f32.mrf.mxu0 }
 0x5d7   : > { %v8461_v13 = vadd.f32 %v4659_v9, %v4619_v33 }
 0x5d8   : > { %4703 = vmatmul.bf16.gmra.mxu1 %v8038_v14  ;;  %v4582_v57 = vadd.f32 %v4581_v29, %v4541_v56  ;;  %v6205_v14 = vld [vmem:[%s8565_s14 + $0x4] sm:$0xf] }
 0x5d9   : > { %v5935_v10 = vor.u32 %v6205_v14, %v5932_v40 }
 0x5db   : > { %v4583_v32 = vpop.f32.mrf.mxu2  ;;  %v4622_v41 = vpop.f32.mrf.mxu3  ;;  %4902 = vmatpush.bf16.msrb.mxu3 %v5935_v10 }
 0x5dc   : > { %v4623_v20 = vadd.f32 %v4622_v41, %v4582_v57 }
 0x5dd   : > { %v4542_v19 = vpop.f32.mrf.mxu1 }
 0x5de   : > { %v4661_v54 = vpop.f32.mrf.mxu0 }
 0x5e3   : > { %v4624_v6 = vpop.f32.mrf.mxu3 }
 0x5e5   : > { %v4676_v15 = vpop.f32.mrf.mxu1 }
 0x5e6   : > { %v4663_v27 = vpop.f32.mrf.mxu0  ;;  %v4677_v58 = vadd.f32 %v4676_v15, %v8365_v31  ;;  %v4756_v15 = vld [vmem:[%s8566_s15] sm:$0x3] }
 0x5e7   : > { %v4664_v51 = vadd.f32 %v4663_v27, %v4623_v20  ;;  %v8498_v27 = vperm.slane %v4756_v15, 0 }
 0x5e8   : > { %v4708_v59 = vmax.f32 %v4677_v58, 0.0 }
 0x5ea   : > { %v4716_v17 = vpack.c.bf16 %v4708_v59, %v4708_v59  ;;  %v4725_v59 = vunpack.c.h.bf16 %v7856_v8 }
 0x5ec   : > { %v4770_v53 = vunpack.c.l.b16 %v4716_v17 }
 0x5ed   : > { %v4678_v2 = vpop.f32.mrf.mxu1 }
 0x5ee   : > { %v4665_v0 = vpop.f32.mrf.mxu0 }
 0x5ef   : > { %v4724_v0 = vunpack.c.l.bf16 %v7856_v8  ;;  %v4726_v8 = vunpack.c.l.bf16 %v7854_v38 }
 0x5f5   : > { %v4680_v12 = vpop.f32.mrf.mxu1 }
 0x5f6   : > { %v4681_v55 = vadd.f32 %v4680_v12, %v8369_v4 }
 0x5f8   : > { %v4709_v33 = vmax.f32 %v4681_v55, 0.0 }
 0x5fa   : > { %v4717_v60 = vpack.c.bf16 %v4709_v33, %v4709_v33 }
 0x5fc   : > { %v4771_v26 = vunpack.c.l.b16 %v4717_v60 }
 0x5fd   : > { %v4682_v62 = vpop.f32.mrf.mxu1 }
 0x5fe   : > { %v4778_v63 = vpack.c.b16 %v4771_v26, %v4770_v53 }
 0x600   : > { %4874 = vmatmul.bf16.vlgmr.msrb.gmra.mxu2 %v4778_v63  ;;  %4903 = vmatmul.bf16.vlgmr.msrb.gmra.mxu3 %v4778_v63 }
 0x605   : > { %v4684_v50 = vpop.f32.mrf.mxu1 }
 0x606   : > { %v4685_v48 = vadd.f32 %v4684_v50, %v8385_v35  ;;  %v4727_v50 = vunpack.c.h.bf16 %v7854_v38 }
 0x608   : > { %v4710_v29 = vmax.f32 %v4685_v48, 0.0 }
 0x60a   : > { %v4718_v42 = vpack.c.bf16 %v4710_v29, %v4710_v29 }
 0x60c   : > { %v4772_v30 = vunpack.c.l.b16 %v4718_v42 }
 0x60d   : > { %v4686_v21 = vpop.f32.mrf.mxu1 }
 0x615   : > { %v4688_v24 = vpop.f32.mrf.mxu1 }
 0x616   : > { %v4689_v31 = vadd.f32 %v4688_v24, %v8401_v25 }
 0x618   : > { %v4711_v3 = vmax.f32 %v4689_v31, 0.0 }
 0x61a   : > { %v4719_v4 = vpack.c.bf16 %v4711_v3, %v4711_v3 }
 0x61c   : > { %v4773_v39 = vunpack.c.l.b16 %v4719_v4 }
 0x61d   : > { %v4690_v61 = vpop.f32.mrf.mxu1 }
 0x61e   : > { %v4779_v23 = vpack.c.b16 %v4773_v39, %v4772_v30  ;;  %v4728_v30 = vunpack.c.l.bf16 %v7878_v43  ;;  %v4729_v61 = vunpack.c.h.bf16 %v7878_v43 }
 0x620   : > { %4879 = vmatmul.bf16.gmra.mxu2 %v4779_v23  ;;  %4908 = vmatmul.bf16.gmra.mxu3 %v4779_v23 }
 0x625   : > { %v4692_v1 = vpop.f32.mrf.mxu1 }
 0x626   : > { %v4693_v9 = vadd.f32 %v4692_v1, %v8417_v22 }
 0x628   : > { %v4712_v7 = vmax.f32 %v4693_v9, 0.0 }
 0x62a   : > { %v4720_v44 = vpack.c.bf16 %v4712_v7, %v4712_v7 }
 0x62c   : > { %v4774_v34 = vunpack.c.l.b16 %v4720_v44  ;;  %v4730_v44 = vunpack.c.l.bf16 %v7880_v28 }
 0x62d   : > { %v4694_v56 = vpop.f32.mrf.mxu1 }
 0x635   : > { %v4696_v49 = vpop.f32.mrf.mxu1 }
 0x636   : > { %v4697_v35 = vadd.f32 %v4696_v49, %v8433_v18 }
 0x638   : > { %v4713_v57 = vmax.f32 %v4697_v35, 0.0 }
 0x63a   : > { %v4721_v25 = vpack.c.bf16 %v4713_v57, %v4713_v57 }
 0x63c   : > { %v4775_v36 = vunpack.c.l.b16 %v4721_v25  ;;  %v4731_v25 = vunpack.c.h.bf16 %v7880_v28 }
 0x63d   : > { %v4698_v16 = vpop.f32.mrf.mxu1 }
 0x63e   : > { %v4780_v32 = vpack.c.b16 %v4775_v36, %v4774_v34 }
 0x640   : > { %4884 = vmatmul.bf16.gmra.mxu2 %v4780_v32  ;;  %4913 = vmatmul.bf16.gmra.mxu3 %v4780_v32 }
 0x645   : > { %v4700_v41 = vpop.f32.mrf.mxu1 }
 0x646   : > { %v4701_v45 = vadd.f32 %v4700_v41, %v8461_v13  ;;  %v8500_v13 = vperm.slane %v4756_v15, 1  ;;  %v4734_v15 = vunpack.c.l.bf16 %v7922_v11 }
 0x648   : > { %v4714_v14 = vmax.f32 %v4701_v45, 0.0 }
 0x64a   : > { %v4722_v5 = vpack.c.bf16 %v4714_v14, %v4714_v14  ;;  %v4732_v14 = vunpack.c.l.bf16 %v7917_v37 }
 0x64c   : > { %v4776_v18 = vunpack.c.l.b16 %v4722_v5 }
 0x64d   : > { %v4702_v46 = vpop.f32.mrf.mxu1 }
 0x655   : > { %v4704_v20 = vpop.f32.mrf.mxu1 }
 0x656   : > { %v4705_v22 = vadd.f32 %v4704_v20, %v4664_v51 }
 0x658   : > { %v4715_v40 = vmax.f32 %v4705_v22, 0.0  ;;  %v4733_v22 = vunpack.c.h.bf16 %v7917_v37 }
 0x65a   : > { %v4723_v19 = vpack.c.bf16 %v4715_v40, %v4715_v40 }
 0x65c   : > { %v4777_v10 = vunpack.c.l.b16 %v4723_v19 }
 0x65d   : > { %v4706_v54 = vpop.f32.mrf.mxu1 }
 0x65e   : > { %v4781_v6 = vpack.c.b16 %v4777_v10, %v4776_v18 }
 0x660   : > { %4889 = vmatmul.bf16.gmra.mxu2 %v4781_v6  ;;  %4918 = vmatmul.bf16.gmra.mxu3 %v4781_v6 }
 0x683   : > { %v4875_v2 = vpop.f32.mrf.mxu2  ;;  %v4904_v51 = vpop.f32.mrf.mxu3 }
 0x684   : > { %v4876_v58 = vadd.f32 %v4875_v2, %v8498_v27  ;;  %v4905_v12 = vadd.f32 %v4904_v51, %v8500_v13  ;;  %v4735_v51 = vunpack.c.h.bf16 %v7922_v11 }
 0x686   : > { %v4924_v55 = vadd.f32 %v4876_v58, %v4724_v0  ;;  %v4925_v17 = vadd.f32 %v4905_v12, %v4725_v59 }
 0x688   : > { %v4940_v33 = vmax.f32 %v4924_v55, 0.0  ;;  %v4941_v60 = vmax.f32 %v4925_v17, 0.0 }
 0x68a   : > { %v4956_v53 = vpack.c.bf16 %v4941_v60, %v4940_v33  ;;  %v4736_v60 = vunpack.c.l.bf16 %v8000_v47 }
 0x68b   : > { %v4877_v26 = vpop.f32.mrf.mxu2  ;;  %v4906_v62 = vpop.f32.mrf.mxu3 }
 0x68c   : > { %4964 = vst [vmem:[%s8510_s27] sm:$0xff] %v4956_v53  ;;  %v4878_v63 = vadd.f32 %v4877_v26, %v8498_v27  ;;  %v4907_v21 = vadd.f32 %v4906_v62, %v8500_v13  ;;  %v4737_v26 = vunpack.c.h.bf16 %v8000_v47 }
 0x68e   : > { %v4926_v48 = vadd.f32 %v4878_v63, %v4726_v8  ;;  %v4927_v29 = vadd.f32 %v4907_v21, %v4727_v50 }
 0x690   : > { %v4942_v24 = vmax.f32 %v4926_v48, 0.0  ;;  %v4943_v31 = vmax.f32 %v4927_v29, 0.0 }
 0x692   : > { %v4957_v42 = vpack.c.bf16 %v4943_v31, %v4942_v24  ;;  %v4738_v24 = vunpack.c.l.bf16 %v8007_v52 }
 0x694   : > { %4965 = vst [vmem:[%s8510_s27 + $0x8] sm:$0xff] %v4957_v42  ;;  %v4739_v42 = vunpack.c.h.bf16 %v8007_v52 }
 0x6a3   : > { %v4880_v3 = vpop.f32.mrf.mxu2  ;;  %v4909_v4 = vpop.f32.mrf.mxu3 }
 0x6a4   : > { %v4881_v39 = vadd.f32 %v4880_v3, %v8498_v27  ;;  %v4910_v23 = vadd.f32 %v4909_v4, %v8500_v13 }
 0x6a6   : > { %v4928_v38 = vadd.f32 %v4881_v39, %v4728_v30  ;;  %v4929_v1 = vadd.f32 %v4910_v23, %v4729_v61 }
 0x6a8   : > { %v4944_v56 = vmax.f32 %v4928_v38, 0.0  ;;  %v4945_v9 = vmax.f32 %v4929_v1, 0.0 }
 0x6aa   : > { %v4958_v7 = vpack.c.bf16 %v4945_v9, %v4944_v56 }
 0x6ab   : > { %v4882_v49 = vpop.f32.mrf.mxu2  ;;  %v4911_v35 = vpop.f32.mrf.mxu3 }
 0x6ac   : > { %4966 = vst [vmem:[%s8510_s27 + $0x10] sm:$0xff] %v4958_v7  ;;  %v4883_v57 = vadd.f32 %v4882_v49, %v8498_v27  ;;  %v4912_v34 = vadd.f32 %v4911_v35, %v8500_v13 }
 0x6ae   : > { %v4930_v43 = vadd.f32 %v4883_v57, %v4730_v44  ;;  %v4931_v36 = vadd.f32 %v4912_v34, %v4731_v25 }
 0x6b0   : > { %v4946_v16 = vmax.f32 %v4930_v43, 0.0  ;;  %v4947_v32 = vmax.f32 %v4931_v36, 0.0 }
 0x6b2   : > { %v4959_v41 = vpack.c.bf16 %v4947_v32, %v4946_v16 }
 0x6b4   : > { %4967 = vst [vmem:[%s8510_s27 + $0x18] sm:$0xff] %v4959_v41 }
 0x6c3   : > { %v4885_v46 = vpop.f32.mrf.mxu2  ;;  %v4914_v45 = vpop.f32.mrf.mxu3 }
 0x6c4   : > { %v4886_v20 = vadd.f32 %v4885_v46, %v8498_v27  ;;  %v4915_v5 = vadd.f32 %v4914_v45, %v8500_v13 }
 0x6c6   : > { %v4932_v28 = vadd.f32 %v4886_v20, %v4732_v14  ;;  %v4933_v40 = vadd.f32 %v4915_v5, %v4733_v22 }
 0x6c8   : > { %v4948_v19 = vmax.f32 %v4932_v28, 0.0  ;;  %v4949_v18 = vmax.f32 %v4933_v40, 0.0 }
 0x6ca   : > { %v4960_v10 = vpack.c.bf16 %v4949_v18, %v4948_v19 }
 0x6cb   : > { %v4887_v54 = vpop.f32.mrf.mxu2  ;;  %v4916_v6 = vpop.f32.mrf.mxu3 }
 0x6cc   : > { %4968 = vst [vmem:[%s8510_s27 + $0x20] sm:$0xff] %v4960_v10  ;;  %v4888_v2 = vadd.f32 %v4887_v54, %v8498_v27  ;;  %v4917_v0 = vadd.f32 %v4916_v6, %v8500_v13 }
 0x6ce   : > { %v4934_v37 = vadd.f32 %v4888_v2, %v4734_v15  ;;  %v4935_v58 = vadd.f32 %v4917_v0, %v4735_v51 }
 0x6d0   : > { %v4950_v59 = vmax.f32 %v4934_v37, 0.0  ;;  %v4951_v12 = vmax.f32 %v4935_v58, 0.0 }
 0x6d2   : > { %v4961_v55 = vpack.c.bf16 %v4951_v12, %v4950_v59 }
 0x6d4   : > { %4969 = vst [vmem:[%s8510_s27 + $0x28] sm:$0xff] %v4961_v55 }
 0x6e3   : > { %v4890_v17 = vpop.f32.mrf.mxu2  ;;  %v4919_v33 = vpop.f32.mrf.mxu3 }
 0x6e4   : > { %v4891_v53 = vadd.f32 %v4890_v17, %v8498_v27  ;;  %v4920_v62 = vadd.f32 %v4919_v33, %v8500_v13 }
 0x6e6   : > { %v4936_v11 = vadd.f32 %v4891_v53, %v4736_v60  ;;  %v4937_v8 = vadd.f32 %v4920_v62, %v4737_v26 }
 0x6e8   : > { %v4952_v63 = vmax.f32 %v4936_v11, 0.0  ;;  %v4953_v50 = vmax.f32 %v4937_v8, 0.0 }
 0x6ea   : > { %v4962_v21 = vpack.c.bf16 %v4953_v50, %v4952_v63 }
 0x6eb   : > { %v4892_v48 = vpop.f32.mrf.mxu2  ;;  %v4921_v29 = vpop.f32.mrf.mxu3 }
 0x6ec   : > { %4970 = vst [vmem:[%s8510_s27 + $0x30] sm:$0xff] %v4962_v21  ;;  %v4893_v31 = vadd.f32 %v4892_v48, %v8498_v27  ;;  %v4922_v3 = vadd.f32 %v4921_v29, %v8500_v13 }
 0x6ee   : > { %v4938_v47 = vadd.f32 %v4893_v31, %v4738_v24  ;;  %v4939_v4 = vadd.f32 %v4922_v3, %v4739_v42 }
 0x6f0   : > { %v4954_v30 = vmax.f32 %v4938_v47, 0.0  ;;  %v4955_v39 = vmax.f32 %v4939_v4, 0.0 }
 0x6f2   : > { %v4963_v61 = vpack.c.bf16 %v4955_v39, %v4954_v30 }
 0x6f4   : > { %4971 = vst [vmem:[%s8510_s27 + $0x38] sm:$0xff] %v4963_v61 }
 0x6f5 PF: > { %s26_s21 = sadd.s32 1, %s6250_s21  }
 0x6f6   : > { %p23_p4 = scmp.ge.s32.totalorder %s26_s21, 4  }
 0x6f8   :  { %25 = sbr.rel (!%p23_p4) target bundleno = 2 (0x2), region = 117 }

</bundles_post_ra>
